<compile_context>
chip_gen: v6e
topology: v6e:2x2x1
jax: 0.10.0
libtpu: 0.0.40
codegen_flags: <defaults>
</compile_context>

<pallas_src>
import math

import jax
import jax.numpy as jnp
from jax.experimental import pallas as pl
from jax.experimental.pallas import tpu as pltpu

NODE_N = 57
IN_F = 25
HID_F = 128
POOL_F = HID_F // 2            # 64
CLASSES = 12
BN_EPS = 1e-5
BN_SCALE = 1.0 / math.sqrt(1.0 + BN_EPS)   # eval-mode BatchNorm1d multiplier


# --------------------------------------------------------------------------
# Fused forward kernel
# --------------------------------------------------------------------------
def _make_fused_kernel(bt: int, apply_bn2: bool):
    """Builds the fused forward kernel processing `bt` batch elements/step."""

    def kernel(x_ref,
               w_in, adj_in, b_in,
               w1, adj1, b1,
               w2, adj2, b2,
               w_oc, adj_oc, b_oc,
               w_att, adj_att, b_att,
               r0, r1, r2,
               a0, a1, a2,
               w_v2, adj_v2, b_v2,
               w_cls, b_cls,
               out_ref, att_ref, cls_ref):

        def bf(v):
            return v.astype(jnp.bfloat16)

        def gconv(h, w_r, adj_r, b_r):
            # support = h @ W ; out = adj @ support + b  (bf16 operands, f32 acc)
            sup = jnp.dot(bf(h), w_r[...], preferred_element_type=jnp.float32)
            return (jnp.dot(adj_r[...], bf(sup),
                            preferred_element_type=jnp.float32) + b_r[...])

        def gc_block(h):
            # GC_Block: gc1 -> bn -> relu -> gc2 -> bn -> relu -> residual
            t = gconv(h, w1, adj1, b1)
            t = jnp.maximum(t * BN_SCALE, 0.0)
            t = gconv(t, w2, adj2, b2)
            t = jnp.maximum(t * BN_SCALE, 0.0)
            return t + h

        for bb in range(bt):                                # static unroll
            x = x_ref[bb]                                   # (57, 25) f32

            # gcin + bn1 + relu (+ dropout = identity in eval)
            y = gconv(x, w_in, adj_in, b_in)
            y = jnp.maximum(y * BN_SCALE, 0.0)

            y = gc_block(y)                                 # gcbs #1
            y_corr = gc_block(y)                            # gcbs #2

            # correction + attention heads share y_corr (fused in one kernel)
            out_ref[bb] = gconv(y_corr, w_oc, adj_oc, b_oc)          # (57, 25)
            att_lin = gconv(y_corr, w_att, adj_att, b_att)           # (57, 1)
            att_ref[bb] = 1.0 / (1.0 + jnp.exp(-att_lin))

            # classification branch
            y = gc_block(y)                                 # gcbs #3, (57, 128)
            yb = bf(y)
            # AvgPool1d(2,2) + Conv2d(3,3,(1,3),pad=(0,1)) as matmuls:
            #   conv = sum_k A_k @ (Y @ R_k),  A_k = kron(Wc[:,:,0,k], I_19)
            t0 = jnp.dot(yb, r0[...], preferred_element_type=jnp.float32)
            t1 = jnp.dot(yb, r1[...], preferred_element_type=jnp.float32)
            t2 = jnp.dot(yb, r2[...], preferred_element_type=jnp.float32)
            conv = (jnp.dot(a0[...], bf(t0), preferred_element_type=jnp.float32)
                    + jnp.dot(a1[...], bf(t1), preferred_element_type=jnp.float32)
                    + jnp.dot(a2[...], bf(t2), preferred_element_type=jnp.float32))

            # gcont_class_v2 (+ bn2 only when batch > 1, like the reference) + relu
            y_cls = gconv(conv, w_v2, adj_v2, b_v2)          # (57, 25)
            if apply_bn2:
                y_cls = y_cls * BN_SCALE
            y_cls = jnp.maximum(y_cls, 0.0)

            # TODO(synk): self.maxpool(y) output is dead code in the reference
            # forward (immediately overwritten); skipped.

            # Linear(57*25 -> 12) as a per-class bilinear reduction (no flatten),
            # followed by LogSoftmax over the 12 classes.
            prods = y_cls[None, :, :] * w_cls[...]           # (12, 57, 25)
            sc = jnp.sum(prods, axis=2)                      # (12, 57)
            logits = jnp.sum(sc, axis=1, keepdims=True) + b_cls[...]   # (12, 1)
            m = jnp.max(logits, axis=0, keepdims=True)
            z = logits - m
            lse = jnp.log(jnp.sum(jnp.exp(z), axis=0, keepdims=True))
            cls_ref[bb] = z - lse                            # (12, 1)

    return kernel


WEIGHT_KEYS = ("w_in", "adj_in", "b_in",
               "w1", "adj1", "b1",
               "w2", "adj2", "b2",
               "w_oc", "adj_oc", "b_oc",
               "w_att", "adj_att", "b_att",
               "r0", "r1", "r2",
               "a0", "a1", "a2",
               "w_v2", "adj_v2", "b_v2",
               "w_cls", "b_cls")


# --------------------------------------------------------------------------
# Wrapper
# --------------------------------------------------------------------------
def forward(x, params, *, batch_block=1):
    B = x.shape[0]
    bt = batch_block if (batch_block > 0 and B % batch_block == 0) else 1
    kernel = _make_fused_kernel(bt=bt, apply_bn2=(B > 1))

    weights = [params[k] for k in WEIGHT_KEYS]

    def _full_spec(a):
        if a.ndim == 3:
            return pl.BlockSpec(a.shape, lambda i: (0, 0, 0))
        return pl.BlockSpec(a.shape, lambda i: (0, 0))

    in_specs = [pl.BlockSpec((bt, NODE_N, IN_F), lambda i: (i, 0, 0))]   # x
    in_specs += [_full_spec(a) for a in weights]                         # resident

    out_shape = (
        jax.ShapeDtypeStruct((B, NODE_N, IN_F), jnp.float32),   # correction out
        jax.ShapeDtypeStruct((B, NODE_N, 1), jnp.float32),      # attention
        jax.ShapeDtypeStruct((B, CLASSES, 1), jnp.float32),     # class log-probs
    )
    out_specs = (
        pl.BlockSpec((bt, NODE_N, IN_F), lambda i: (i, 0, 0)),
        pl.BlockSpec((bt, NODE_N, 1), lambda i: (i, 0, 0)),
        pl.BlockSpec((bt, CLASSES, 1), lambda i: (i, 0, 0)),
    )

    out, att, cls3 = pl.pallas_call(
        kernel,
        out_shape=out_shape,
        grid=(B // bt,),
        in_specs=in_specs,
        out_specs=out_specs,
        compiler_params=pltpu.CompilerParams(
            dimension_semantics=("parallel",)),
    )(x, *weights)
    return out, att, cls3.reshape(B, CLASSES)


# --------------------------------------------------------------------------
# Parameters (deterministic synthetic init mirroring the PyTorch shapes)
# --------------------------------------------------------------------------
def init_params(key):
    keys = iter(jax.random.split(key, 24))

    def u(shape, stdv):
        return jax.random.uniform(next(keys), shape, jnp.float32, -stdv, stdv)

    p = {}

    def gc(fin, fout):
        stdv = 1.0 / math.sqrt(fout)
        w = u((fin, fout), stdv).astype(jnp.bfloat16)          # matmul operand
        adj = u((NODE_N, NODE_N), stdv).astype(jnp.bfloat16)   # matmul operand
        b = u((fout,), stdv).reshape(1, fout)                  # f32 bias row
        return w, adj, b

    p["w_in"], p["adj_in"], p["b_in"] = gc(IN_F, HID_F)        # gcin
    p["w1"], p["adj1"], p["b1"] = gc(HID_F, HID_F)             # gcbs.gc1
    p["w2"], p["adj2"], p["b2"] = gc(HID_F, HID_F)             # gcbs.gc2
    p["w_oc"], p["adj_oc"], p["b_oc"] = gc(HID_F, IN_F)        # gcout_corr
    p["w_att"], p["adj_att"], p["b_att"] = gc(HID_F, 1)        # gcatt
    p["w_v2"], p["adj_v2"], p["b_v2"] = gc(POOL_F, IN_F)       # gcont_class_v2
    # (gcin2 / gcout_class exist in the module but are unused in forward.)

    # Conv2d(3, 3, (1, 3), padding=(0, 1), bias=False) -> node-mixing matrices.
    conv_w = u((3, 3, 1, 3), 1.0 / math.sqrt(3 * 1 * 3))
    eye19 = jnp.eye(19, dtype=jnp.float32)
    for k in range(3):
        p[f"a{k}"] = jnp.kron(conv_w[:, :, 0, k], eye19).astype(jnp.bfloat16)

    # AvgPool1d(k=2, s=2) folded with the conv width shifts: R_k = pool @ shift_k.
    idx = jnp.arange(POOL_F)
    pool_mat = jnp.zeros((HID_F, POOL_F), jnp.float32)
    pool_mat = pool_mat.at[2 * idx, idx].set(0.5).at[2 * idx + 1, idx].set(0.5)
    s_m1 = jnp.eye(POOL_F, k=1, dtype=jnp.float32)     # selects x[..., w-1]
    s_p1 = jnp.eye(POOL_F, k=-1, dtype=jnp.float32)    # selects x[..., w+1]
    p["r0"] = (pool_mat @ s_m1).astype(jnp.bfloat16)
    p["r1"] = pool_mat.astype(jnp.bfloat16)
    p["r2"] = (pool_mat @ s_p1).astype(jnp.bfloat16)

    # Linear(57*25 -> classes): weight reshaped to per-class (57, 25) matrices.
    stdv = 1.0 / math.sqrt(NODE_N * IN_F)
    p["w_cls"] = u((CLASSES, NODE_N * IN_F), stdv).reshape(CLASSES, NODE_N, IN_F)
    p["b_cls"] = u((CLASSES,), stdv).reshape(CLASSES, 1)
    return p


# --------------------------------------------------------------------------
if __name__ == "__main__":
    key = jax.random.PRNGKey(0)
    pkey, xkey = jax.random.split(key)
    params = init_params(pkey)

    B = 2
    x = jax.random.normal(xkey, (B, NODE_N, IN_F), jnp.float32)

    fwd = jax.jit(forward)
    out, att, y_class = fwd(x, params)
    jax.block_until_ready((out, att, y_class))

    assert out.shape == (B, NODE_N, IN_F)
    assert att.shape == (B, NODE_N, 1)
    assert y_class.shape == (B, CLASSES)
    assert bool(jnp.all(jnp.isfinite(out)))
    assert bool(jnp.all(jnp.isfinite(att)))
    assert bool(jnp.all(jnp.isfinite(y_class)))
    print("KERNEL_OK")
</pallas_src>

<mosaic_0001>
module attributes {stable_mosaic.version = 11 : i64} {
  func.func @kernel(%arg0: i32, %arg1: memref<1x57x25xf32, #tpu.memory_space<vmem>>, %arg2: memref<25x128xbf16, #tpu.memory_space<vmem>>, %arg3: memref<57x57xbf16, #tpu.memory_space<vmem>>, %arg4: memref<1x128xf32, #tpu.memory_space<vmem>>, %arg5: memref<128x128xbf16, #tpu.memory_space<vmem>>, %arg6: memref<57x57xbf16, #tpu.memory_space<vmem>>, %arg7: memref<1x128xf32, #tpu.memory_space<vmem>>, %arg8: memref<128x128xbf16, #tpu.memory_space<vmem>>, %arg9: memref<57x57xbf16, #tpu.memory_space<vmem>>, %arg10: memref<1x128xf32, #tpu.memory_space<vmem>>, %arg11: memref<128x25xbf16, #tpu.memory_space<vmem>>, %arg12: memref<57x57xbf16, #tpu.memory_space<vmem>>, %arg13: memref<1x25xf32, #tpu.memory_space<vmem>>, %arg14: memref<128x1xbf16, #tpu.memory_space<vmem>>, %arg15: memref<57x57xbf16, #tpu.memory_space<vmem>>, %arg16: memref<1x1xf32, #tpu.memory_space<vmem>>, %arg17: memref<128x64xbf16, #tpu.memory_space<vmem>>, %arg18: memref<128x64xbf16, #tpu.memory_space<vmem>>, %arg19: memref<128x64xbf16, #tpu.memory_space<vmem>>, %arg20: memref<57x57xbf16, #tpu.memory_space<vmem>>, %arg21: memref<57x57xbf16, #tpu.memory_space<vmem>>, %arg22: memref<57x57xbf16, #tpu.memory_space<vmem>>, %arg23: memref<64x25xbf16, #tpu.memory_space<vmem>>, %arg24: memref<57x57xbf16, #tpu.memory_space<vmem>>, %arg25: memref<1x25xf32, #tpu.memory_space<vmem>>, %arg26: memref<12x57x25xf32, #tpu.memory_space<vmem>>, %arg27: memref<12x1xf32, #tpu.memory_space<vmem>>, %arg28: memref<1x57x25xf32, #tpu.memory_space<vmem>>, %arg29: memref<1x57x1xf32, #tpu.memory_space<vmem>>, %arg30: memref<1x12x1xf32, #tpu.memory_space<vmem>>) attributes {dimension_semantics = [#tpu.dimension_semantics<parallel>], iteration_bounds = array<i64: 2>, scalar_prefetch = 0 : i64, scratch_operands = 0 : i64, tpu.core_type = #tpu.core_type<tc>, window_params = [{transform_indices = @transform_0, window_bounds = array<i64: 1, 57, 25>}, {pipeline_mode = #tpu.pipeline_mode<synchronous>, transform_indices = @transform_1, window_bounds = array<i64: 25, 128>}, {pipeline_mode = #tpu.pipeline_mode<synchronous>, transform_indices = @transform_2, window_bounds = array<i64: 57, 57>}, {pipeline_mode = #tpu.pipeline_mode<synchronous>, transform_indices = @transform_3, window_bounds = array<i64: 1, 128>}, {pipeline_mode = #tpu.pipeline_mode<synchronous>, transform_indices = @transform_4, window_bounds = array<i64: 128, 128>}, {pipeline_mode = #tpu.pipeline_mode<synchronous>, transform_indices = @transform_5, window_bounds = array<i64: 57, 57>}, {pipeline_mode = #tpu.pipeline_mode<synchronous>, transform_indices = @transform_6, window_bounds = array<i64: 1, 128>}, {pipeline_mode = #tpu.pipeline_mode<synchronous>, transform_indices = @transform_7, window_bounds = array<i64: 128, 128>}, {pipeline_mode = #tpu.pipeline_mode<synchronous>, transform_indices = @transform_8, window_bounds = array<i64: 57, 57>}, {pipeline_mode = #tpu.pipeline_mode<synchronous>, transform_indices = @transform_9, window_bounds = array<i64: 1, 128>}, {pipeline_mode = #tpu.pipeline_mode<synchronous>, transform_indices = @transform_10, window_bounds = array<i64: 128, 25>}, {pipeline_mode = #tpu.pipeline_mode<synchronous>, transform_indices = @transform_11, window_bounds = array<i64: 57, 57>}, {pipeline_mode = #tpu.pipeline_mode<synchronous>, transform_indices = @transform_12, window_bounds = array<i64: 1, 25>}, {pipeline_mode = #tpu.pipeline_mode<synchronous>, transform_indices = @transform_13, window_bounds = array<i64: 128, 1>}, {pipeline_mode = #tpu.pipeline_mode<synchronous>, transform_indices = @transform_14, window_bounds = array<i64: 57, 57>}, {pipeline_mode = #tpu.pipeline_mode<synchronous>, transform_indices = @transform_15, window_bounds = array<i64: 1, 1>}, {pipeline_mode = #tpu.pipeline_mode<synchronous>, transform_indices = @transform_16, window_bounds = array<i64: 128, 64>}, {pipeline_mode = #tpu.pipeline_mode<synchronous>, transform_indices = @transform_17, window_bounds = array<i64: 128, 64>}, {pipeline_mode = #tpu.pipeline_mode<synchronous>, transform_indices = @transform_18, window_bounds = array<i64: 128, 64>}, {pipeline_mode = #tpu.pipeline_mode<synchronous>, transform_indices = @transform_19, window_bounds = array<i64: 57, 57>}, {pipeline_mode = #tpu.pipeline_mode<synchronous>, transform_indices = @transform_20, window_bounds = array<i64: 57, 57>}, {pipeline_mode = #tpu.pipeline_mode<synchronous>, transform_indices = @transform_21, window_bounds = array<i64: 57, 57>}, {pipeline_mode = #tpu.pipeline_mode<synchronous>, transform_indices = @transform_22, window_bounds = array<i64: 64, 25>}, {pipeline_mode = #tpu.pipeline_mode<synchronous>, transform_indices = @transform_23, window_bounds = array<i64: 57, 57>}, {pipeline_mode = #tpu.pipeline_mode<synchronous>, transform_indices = @transform_24, window_bounds = array<i64: 1, 25>}, {pipeline_mode = #tpu.pipeline_mode<synchronous>, transform_indices = @transform_25, window_bounds = array<i64: 12, 57, 25>}, {pipeline_mode = #tpu.pipeline_mode<synchronous>, transform_indices = @transform_26, window_bounds = array<i64: 12, 1>}, {transform_indices = @transform_27, window_bounds = array<i64: 1, 57, 25>}, {transform_indices = @transform_28, window_bounds = array<i64: 1, 57, 1>}, {transform_indices = @transform_29, window_bounds = array<i64: 1, 12, 1>}]} {
    %c0 = arith.constant 0 : index
    %c0_0 = arith.constant 0 : index
    %c0_1 = arith.constant 0 : index
    %0 = vector.load %arg1[%c0, %c0_0, %c0_1] : memref<1x57x25xf32, #tpu.memory_space<vmem>>, vector<1x57x25xf32>
    %1 = vector.shape_cast %0 : vector<1x57x25xf32> to vector<57x25xf32>
    %2 = arith.truncf %1 : vector<57x25xf32> to vector<57x25xbf16>
    %c0_2 = arith.constant 0 : index
    %c0_3 = arith.constant 0 : index
    %3 = vector.load %arg2[%c0_2, %c0_3] : memref<25x128xbf16, #tpu.memory_space<vmem>>, vector<25x128xbf16>
    %cst = arith.constant dense<0.000000e+00> : vector<57x128xf32>
    %4 = tpu.matmul %2, %3, %cst {dimension_numbers = #tpu.dot_dimension_numbers<[1], [0], [0], [1], [0, 0, 1, 1], [], []>} : vector<57x25xbf16>, vector<25x128xbf16>, vector<57x128xf32> -> vector<57x128xf32>
    %c0_4 = arith.constant 0 : index
    %c0_5 = arith.constant 0 : index
    %5 = vector.load %arg3[%c0_4, %c0_5] : memref<57x57xbf16, #tpu.memory_space<vmem>>, vector<57x57xbf16>
    %6 = arith.truncf %4 : vector<57x128xf32> to vector<57x128xbf16>
    %cst_6 = arith.constant dense<0.000000e+00> : vector<57x128xf32>
    %7 = tpu.matmul %5, %6, %cst_6 {dimension_numbers = #tpu.dot_dimension_numbers<[1], [0], [0], [1], [0, 0, 1, 1], [], []>} : vector<57x57xbf16>, vector<57x128xbf16>, vector<57x128xf32> -> vector<57x128xf32>
    %c0_7 = arith.constant 0 : index
    %c0_8 = arith.constant 0 : index
    %8 = vector.load %arg4[%c0_7, %c0_8] : memref<1x128xf32, #tpu.memory_space<vmem>>, vector<1x128xf32>
    %9 = vector.broadcast %8 : vector<1x128xf32> to vector<57x128xf32>
    %10 = arith.addf %7, %9 : vector<57x128xf32>
    %cst_9 = arith.constant 0.999994993 : f32
    %11 = vector.broadcast %cst_9 : f32 to vector<57x128xf32>
    %12 = arith.mulf %10, %11 : vector<57x128xf32>
    %cst_10 = arith.constant 0.000000e+00 : f32
    %13 = vector.broadcast %cst_10 : f32 to vector<57x128xf32>
    %14 = arith.maximumf %12, %13 : vector<57x128xf32>
    %15 = arith.truncf %14 : vector<57x128xf32> to vector<57x128xbf16>
    %c0_11 = arith.constant 0 : index
    %c0_12 = arith.constant 0 : index
    %16 = vector.load %arg5[%c0_11, %c0_12] : memref<128x128xbf16, #tpu.memory_space<vmem>>, vector<128x128xbf16>
    %cst_13 = arith.constant dense<0.000000e+00> : vector<57x128xf32>
    %17 = tpu.matmul %15, %16, %cst_13 {dimension_numbers = #tpu.dot_dimension_numbers<[1], [0], [0], [1], [0, 0, 1, 1], [], []>} : vector<57x128xbf16>, vector<128x128xbf16>, vector<57x128xf32> -> vector<57x128xf32>
    %c0_14 = arith.constant 0 : index
    %c0_15 = arith.constant 0 : index
    %18 = vector.load %arg6[%c0_14, %c0_15] : memref<57x57xbf16, #tpu.memory_space<vmem>>, vector<57x57xbf16>
    %19 = arith.truncf %17 : vector<57x128xf32> to vector<57x128xbf16>
    %cst_16 = arith.constant dense<0.000000e+00> : vector<57x128xf32>
    %20 = tpu.matmul %18, %19, %cst_16 {dimension_numbers = #tpu.dot_dimension_numbers<[1], [0], [0], [1], [0, 0, 1, 1], [], []>} : vector<57x57xbf16>, vector<57x128xbf16>, vector<57x128xf32> -> vector<57x128xf32>
    %c0_17 = arith.constant 0 : index
    %c0_18 = arith.constant 0 : index
    %21 = vector.load %arg7[%c0_17, %c0_18] : memref<1x128xf32, #tpu.memory_space<vmem>>, vector<1x128xf32>
    %22 = vector.broadcast %21 : vector<1x128xf32> to vector<57x128xf32>
    %23 = arith.addf %20, %22 : vector<57x128xf32>
    %cst_19 = arith.constant 0.999994993 : f32
    %24 = vector.broadcast %cst_19 : f32 to vector<57x128xf32>
    %25 = arith.mulf %23, %24 : vector<57x128xf32>
    %cst_20 = arith.constant 0.000000e+00 : f32
    %26 = vector.broadcast %cst_20 : f32 to vector<57x128xf32>
    %27 = arith.maximumf %25, %26 : vector<57x128xf32>
    %28 = arith.truncf %27 : vector<57x128xf32> to vector<57x128xbf16>
    %c0_21 = arith.constant 0 : index
    %c0_22 = arith.constant 0 : index
    %29 = vector.load %arg8[%c0_21, %c0_22] : memref<128x128xbf16, #tpu.memory_space<vmem>>, vector<128x128xbf16>
    %cst_23 = arith.constant dense<0.000000e+00> : vector<57x128xf32>
    %30 = tpu.matmul %28, %29, %cst_23 {dimension_numbers = #tpu.dot_dimension_numbers<[1], [0], [0], [1], [0, 0, 1, 1], [], []>} : vector<57x128xbf16>, vector<128x128xbf16>, vector<57x128xf32> -> vector<57x128xf32>
    %c0_24 = arith.constant 0 : index
    %c0_25 = arith.constant 0 : index
    %31 = vector.load %arg9[%c0_24, %c0_25] : memref<57x57xbf16, #tpu.memory_space<vmem>>, vector<57x57xbf16>
    %32 = arith.truncf %30 : vector<57x128xf32> to vector<57x128xbf16>
    %cst_26 = arith.constant dense<0.000000e+00> : vector<57x128xf32>
    %33 = tpu.matmul %31, %32, %cst_26 {dimension_numbers = #tpu.dot_dimension_numbers<[1], [0], [0], [1], [0, 0, 1, 1], [], []>} : vector<57x57xbf16>, vector<57x128xbf16>, vector<57x128xf32> -> vector<57x128xf32>
    %c0_27 = arith.constant 0 : index
    %c0_28 = arith.constant 0 : index
    %34 = vector.load %arg10[%c0_27, %c0_28] : memref<1x128xf32, #tpu.memory_space<vmem>>, vector<1x128xf32>
    %35 = vector.broadcast %34 : vector<1x128xf32> to vector<57x128xf32>
    %36 = arith.addf %33, %35 : vector<57x128xf32>
    %cst_29 = arith.constant 0.999994993 : f32
    %37 = vector.broadcast %cst_29 : f32 to vector<57x128xf32>
    %38 = arith.mulf %36, %37 : vector<57x128xf32>
    %cst_30 = arith.constant 0.000000e+00 : f32
    %39 = vector.broadcast %cst_30 : f32 to vector<57x128xf32>
    %40 = arith.maximumf %38, %39 : vector<57x128xf32>
    %41 = arith.addf %40, %14 : vector<57x128xf32>
    %42 = arith.truncf %41 : vector<57x128xf32> to vector<57x128xbf16>
    %c0_31 = arith.constant 0 : index
    %c0_32 = arith.constant 0 : index
    %43 = vector.load %arg5[%c0_31, %c0_32] : memref<128x128xbf16, #tpu.memory_space<vmem>>, vector<128x128xbf16>
    %cst_33 = arith.constant dense<0.000000e+00> : vector<57x128xf32>
    %44 = tpu.matmul %42, %43, %cst_33 {dimension_numbers = #tpu.dot_dimension_numbers<[1], [0], [0], [1], [0, 0, 1, 1], [], []>} : vector<57x128xbf16>, vector<128x128xbf16>, vector<57x128xf32> -> vector<57x128xf32>
    %c0_34 = arith.constant 0 : index
    %c0_35 = arith.constant 0 : index
    %45 = vector.load %arg6[%c0_34, %c0_35] : memref<57x57xbf16, #tpu.memory_space<vmem>>, vector<57x57xbf16>
    %46 = arith.truncf %44 : vector<57x128xf32> to vector<57x128xbf16>
    %cst_36 = arith.constant dense<0.000000e+00> : vector<57x128xf32>
    %47 = tpu.matmul %45, %46, %cst_36 {dimension_numbers = #tpu.dot_dimension_numbers<[1], [0], [0], [1], [0, 0, 1, 1], [], []>} : vector<57x57xbf16>, vector<57x128xbf16>, vector<57x128xf32> -> vector<57x128xf32>
    %c0_37 = arith.constant 0 : index
    %c0_38 = arith.constant 0 : index
    %48 = vector.load %arg7[%c0_37, %c0_38] : memref<1x128xf32, #tpu.memory_space<vmem>>, vector<1x128xf32>
    %49 = vector.broadcast %48 : vector<1x128xf32> to vector<57x128xf32>
    %50 = arith.addf %47, %49 : vector<57x128xf32>
    %cst_39 = arith.constant 0.999994993 : f32
    %51 = vector.broadcast %cst_39 : f32 to vector<57x128xf32>
    %52 = arith.mulf %50, %51 : vector<57x128xf32>
    %cst_40 = arith.constant 0.000000e+00 : f32
    %53 = vector.broadcast %cst_40 : f32 to vector<57x128xf32>
    %54 = arith.maximumf %52, %53 : vector<57x128xf32>
    %55 = arith.truncf %54 : vector<57x128xf32> to vector<57x128xbf16>
    %c0_41 = arith.constant 0 : index
    %c0_42 = arith.constant 0 : index
    %56 = vector.load %arg8[%c0_41, %c0_42] : memref<128x128xbf16, #tpu.memory_space<vmem>>, vector<128x128xbf16>
    %cst_43 = arith.constant dense<0.000000e+00> : vector<57x128xf32>
    %57 = tpu.matmul %55, %56, %cst_43 {dimension_numbers = #tpu.dot_dimension_numbers<[1], [0], [0], [1], [0, 0, 1, 1], [], []>} : vector<57x128xbf16>, vector<128x128xbf16>, vector<57x128xf32> -> vector<57x128xf32>
    %c0_44 = arith.constant 0 : index
    %c0_45 = arith.constant 0 : index
    %58 = vector.load %arg9[%c0_44, %c0_45] : memref<57x57xbf16, #tpu.memory_space<vmem>>, vector<57x57xbf16>
    %59 = arith.truncf %57 : vector<57x128xf32> to vector<57x128xbf16>
    %cst_46 = arith.constant dense<0.000000e+00> : vector<57x128xf32>
    %60 = tpu.matmul %58, %59, %cst_46 {dimension_numbers = #tpu.dot_dimension_numbers<[1], [0], [0], [1], [0, 0, 1, 1], [], []>} : vector<57x57xbf16>, vector<57x128xbf16>, vector<57x128xf32> -> vector<57x128xf32>
    %c0_47 = arith.constant 0 : index
    %c0_48 = arith.constant 0 : index
    %61 = vector.load %arg10[%c0_47, %c0_48] : memref<1x128xf32, #tpu.memory_space<vmem>>, vector<1x128xf32>
    %62 = vector.broadcast %61 : vector<1x128xf32> to vector<57x128xf32>
    %63 = arith.addf %60, %62 : vector<57x128xf32>
    %cst_49 = arith.constant 0.999994993 : f32
    %64 = vector.broadcast %cst_49 : f32 to vector<57x128xf32>
    %65 = arith.mulf %63, %64 : vector<57x128xf32>
    %cst_50 = arith.constant 0.000000e+00 : f32
    %66 = vector.broadcast %cst_50 : f32 to vector<57x128xf32>
    %67 = arith.maximumf %65, %66 : vector<57x128xf32>
    %68 = arith.addf %67, %41 : vector<57x128xf32>
    %69 = arith.truncf %68 : vector<57x128xf32> to vector<57x128xbf16>
    %c0_51 = arith.constant 0 : index
    %c0_52 = arith.constant 0 : index
    %70 = vector.load %arg11[%c0_51, %c0_52] : memref<128x25xbf16, #tpu.memory_space<vmem>>, vector<128x25xbf16>
    %cst_53 = arith.constant dense<0.000000e+00> : vector<57x25xf32>
    %71 = tpu.matmul %69, %70, %cst_53 {dimension_numbers = #tpu.dot_dimension_numbers<[1], [0], [0], [1], [0, 0, 1, 1], [], []>} : vector<57x128xbf16>, vector<128x25xbf16>, vector<57x25xf32> -> vector<57x25xf32>
    %c0_54 = arith.constant 0 : index
    %c0_55 = arith.constant 0 : index
    %72 = vector.load %arg12[%c0_54, %c0_55] : memref<57x57xbf16, #tpu.memory_space<vmem>>, vector<57x57xbf16>
    %73 = arith.truncf %71 : vector<57x25xf32> to vector<57x25xbf16>
    %cst_56 = arith.constant dense<0.000000e+00> : vector<57x25xf32>
    %74 = tpu.matmul %72, %73, %cst_56 {dimension_numbers = #tpu.dot_dimension_numbers<[1], [0], [0], [1], [0, 0, 1, 1], [], []>} : vector<57x57xbf16>, vector<57x25xbf16>, vector<57x25xf32> -> vector<57x25xf32>
    %c0_57 = arith.constant 0 : index
    %c0_58 = arith.constant 0 : index
    %75 = vector.load %arg13[%c0_57, %c0_58] : memref<1x25xf32, #tpu.memory_space<vmem>>, vector<1x25xf32>
    %76 = vector.broadcast %75 : vector<1x25xf32> to vector<57x25xf32>
    %77 = arith.addf %74, %76 : vector<57x25xf32>
    %c0_59 = arith.constant 0 : index
    %c0_60 = arith.constant 0 : index
    %c0_61 = arith.constant 0 : index
    %78 = vector.load %arg28[%c0_59, %c0_60, %c0_61] : memref<1x57x25xf32, #tpu.memory_space<vmem>>, vector<1x57x25xf32>
    %79 = vector.shape_cast %78 : vector<1x57x25xf32> to vector<57x25xf32>
    %80 = vector.shape_cast %77 : vector<57x25xf32> to vector<1x57x25xf32>
    tpu.vector_store %arg28[%c0_59, %c0_60, %c0_61], %80 {strides = array<i32>} : memref<1x57x25xf32, #tpu.memory_space<vmem>>, vector<1x57x25xf32>,
    %81 = arith.truncf %68 : vector<57x128xf32> to vector<57x128xbf16>
    %c0_62 = arith.constant 0 : index
    %c0_63 = arith.constant 0 : index
    %82 = vector.load %arg14[%c0_62, %c0_63] : memref<128x1xbf16, #tpu.memory_space<vmem>>, vector<128x1xbf16>
    %cst_64 = arith.constant dense<0.000000e+00> : vector<57x1xf32>
    %83 = tpu.matmul %81, %82, %cst_64 {dimension_numbers = #tpu.dot_dimension_numbers<[1], [0], [0], [1], [0, 0, 1, 1], [], []>} : vector<57x128xbf16>, vector<128x1xbf16>, vector<57x1xf32> -> vector<57x1xf32>
    %c0_65 = arith.constant 0 : index
    %c0_66 = arith.constant 0 : index
    %84 = vector.load %arg15[%c0_65, %c0_66] : memref<57x57xbf16, #tpu.memory_space<vmem>>, vector<57x57xbf16>
    %85 = arith.truncf %83 : vector<57x1xf32> to vector<57x1xbf16>
    %cst_67 = arith.constant dense<0.000000e+00> : vector<57x1xf32>
    %86 = tpu.matmul %84, %85, %cst_67 {dimension_numbers = #tpu.dot_dimension_numbers<[1], [0], [0], [1], [0, 0, 1, 1], [], []>} : vector<57x57xbf16>, vector<57x1xbf16>, vector<57x1xf32> -> vector<57x1xf32>
    %c0_68 = arith.constant 0 : index
    %c0_69 = arith.constant 0 : index
    %87 = vector.load %arg16[%c0_68, %c0_69] : memref<1x1xf32, #tpu.memory_space<vmem>>, vector<1x1xf32>
    %88 = vector.broadcast %87 : vector<1x1xf32> to vector<57x1xf32>
    %89 = arith.addf %86, %88 : vector<57x1xf32>
    %cst_70 = arith.constant 0.000000e+00 : f32
    %90 = vector.broadcast %cst_70 : f32 to vector<57x1xf32>
    %91 = arith.subf %90, %89 : vector<57x1xf32>
    %92 = math.exp %91 : vector<57x1xf32>
    %cst_71 = arith.constant 1.000000e+00 : f32
    %93 = vector.broadcast %cst_71 : f32 to vector<57x1xf32>
    %94 = arith.addf %93, %92 : vector<57x1xf32>
    %cst_72 = arith.constant 1.000000e+00 : f32
    %95 = vector.broadcast %cst_72 : f32 to vector<57x1xf32>
    %96 = arith.divf %95, %94 : vector<57x1xf32>
    %c0_73 = arith.constant 0 : index
    %c0_74 = arith.constant 0 : index
    %c0_75 = arith.constant 0 : index
    %97 = vector.load %arg29[%c0_73, %c0_74, %c0_75] : memref<1x57x1xf32, #tpu.memory_space<vmem>>, vector<1x57x1xf32>
    %98 = vector.shape_cast %97 : vector<1x57x1xf32> to vector<57x1xf32>
    %99 = vector.shape_cast %96 : vector<57x1xf32> to vector<1x57x1xf32>
    tpu.vector_store %arg29[%c0_73, %c0_74, %c0_75], %99 {strides = array<i32>} : memref<1x57x1xf32, #tpu.memory_space<vmem>>, vector<1x57x1xf32>,
    %100 = arith.truncf %41 : vector<57x128xf32> to vector<57x128xbf16>
    %c0_76 = arith.constant 0 : index
    %c0_77 = arith.constant 0 : index
    %101 = vector.load %arg5[%c0_76, %c0_77] : memref<128x128xbf16, #tpu.memory_space<vmem>>, vector<128x128xbf16>
    %cst_78 = arith.constant dense<0.000000e+00> : vector<57x128xf32>
    %102 = tpu.matmul %100, %101, %cst_78 {dimension_numbers = #tpu.dot_dimension_numbers<[1], [0], [0], [1], [0, 0, 1, 1], [], []>} : vector<57x128xbf16>, vector<128x128xbf16>, vector<57x128xf32> -> vector<57x128xf32>
    %c0_79 = arith.constant 0 : index
    %c0_80 = arith.constant 0 : index
    %103 = vector.load %arg6[%c0_79, %c0_80] : memref<57x57xbf16, #tpu.memory_space<vmem>>, vector<57x57xbf16>
    %104 = arith.truncf %102 : vector<57x128xf32> to vector<57x128xbf16>
    %cst_81 = arith.constant dense<0.000000e+00> : vector<57x128xf32>
    %105 = tpu.matmul %103, %104, %cst_81 {dimension_numbers = #tpu.dot_dimension_numbers<[1], [0], [0], [1], [0, 0, 1, 1], [], []>} : vector<57x57xbf16>, vector<57x128xbf16>, vector<57x128xf32> -> vector<57x128xf32>
    %c0_82 = arith.constant 0 : index
    %c0_83 = arith.constant 0 : index
    %106 = vector.load %arg7[%c0_82, %c0_83] : memref<1x128xf32, #tpu.memory_space<vmem>>, vector<1x128xf32>
    %107 = vector.broadcast %106 : vector<1x128xf32> to vector<57x128xf32>
    %108 = arith.addf %105, %107 : vector<57x128xf32>
    %cst_84 = arith.constant 0.999994993 : f32
    %109 = vector.broadcast %cst_84 : f32 to vector<57x128xf32>
    %110 = arith.mulf %108, %109 : vector<57x128xf32>
    %cst_85 = arith.constant 0.000000e+00 : f32
    %111 = vector.broadcast %cst_85 : f32 to vector<57x128xf32>
    %112 = arith.maximumf %110, %111 : vector<57x128xf32>
    %113 = arith.truncf %112 : vector<57x128xf32> to vector<57x128xbf16>
    %c0_86 = arith.constant 0 : index
    %c0_87 = arith.constant 0 : index
    %114 = vector.load %arg8[%c0_86, %c0_87] : memref<128x128xbf16, #tpu.memory_space<vmem>>, vector<128x128xbf16>
    %cst_88 = arith.constant dense<0.000000e+00> : vector<57x128xf32>
    %115 = tpu.matmul %113, %114, %cst_88 {dimension_numbers = #tpu.dot_dimension_numbers<[1], [0], [0], [1], [0, 0, 1, 1], [], []>} : vector<57x128xbf16>, vector<128x128xbf16>, vector<57x128xf32> -> vector<57x128xf32>
    %c0_89 = arith.constant 0 : index
    %c0_90 = arith.constant 0 : index
    %116 = vector.load %arg9[%c0_89, %c0_90] : memref<57x57xbf16, #tpu.memory_space<vmem>>, vector<57x57xbf16>
    %117 = arith.truncf %115 : vector<57x128xf32> to vector<57x128xbf16>
    %cst_91 = arith.constant dense<0.000000e+00> : vector<57x128xf32>
    %118 = tpu.matmul %116, %117, %cst_91 {dimension_numbers = #tpu.dot_dimension_numbers<[1], [0], [0], [1], [0, 0, 1, 1], [], []>} : vector<57x57xbf16>, vector<57x128xbf16>, vector<57x128xf32> -> vector<57x128xf32>
    %c0_92 = arith.constant 0 : index
    %c0_93 = arith.constant 0 : index
    %119 = vector.load %arg10[%c0_92, %c0_93] : memref<1x128xf32, #tpu.memory_space<vmem>>, vector<1x128xf32>
    %120 = vector.broadcast %119 : vector<1x128xf32> to vector<57x128xf32>
    %121 = arith.addf %118, %120 : vector<57x128xf32>
    %cst_94 = arith.constant 0.999994993 : f32
    %122 = vector.broadcast %cst_94 : f32 to vector<57x128xf32>
    %123 = arith.mulf %121, %122 : vector<57x128xf32>
    %cst_95 = arith.constant 0.000000e+00 : f32
    %124 = vector.broadcast %cst_95 : f32 to vector<57x128xf32>
    %125 = arith.maximumf %123, %124 : vector<57x128xf32>
    %126 = arith.addf %125, %41 : vector<57x128xf32>
    %127 = arith.truncf %126 : vector<57x128xf32> to vector<57x128xbf16>
    %c0_96 = arith.constant 0 : index
    %c0_97 = arith.constant 0 : index
    %128 = vector.load %arg17[%c0_96, %c0_97] : memref<128x64xbf16, #tpu.memory_space<vmem>>, vector<128x64xbf16>
    %cst_98 = arith.constant dense<0.000000e+00> : vector<57x64xf32>
    %129 = tpu.matmul %127, %128, %cst_98 {dimension_numbers = #tpu.dot_dimension_numbers<[1], [0], [0], [1], [0, 0, 1, 1], [], []>} : vector<57x128xbf16>, vector<128x64xbf16>, vector<57x64xf32> -> vector<57x64xf32>
    %c0_99 = arith.constant 0 : index
    %c0_100 = arith.constant 0 : index
    %130 = vector.load %arg18[%c0_99, %c0_100] : memref<128x64xbf16, #tpu.memory_space<vmem>>, vector<128x64xbf16>
    %cst_101 = arith.constant dense<0.000000e+00> : vector<57x64xf32>
    %131 = tpu.matmul %127, %130, %cst_101 {dimension_numbers = #tpu.dot_dimension_numbers<[1], [0], [0], [1], [0, 0, 1, 1], [], []>} : vector<57x128xbf16>, vector<128x64xbf16>, vector<57x64xf32> -> vector<57x64xf32>
    %c0_102 = arith.constant 0 : index
    %c0_103 = arith.constant 0 : index
    %132 = vector.load %arg19[%c0_102, %c0_103] : memref<128x64xbf16, #tpu.memory_space<vmem>>, vector<128x64xbf16>
    %cst_104 = arith.constant dense<0.000000e+00> : vector<57x64xf32>
    %133 = tpu.matmul %127, %132, %cst_104 {dimension_numbers = #tpu.dot_dimension_numbers<[1], [0], [0], [1], [0, 0, 1, 1], [], []>} : vector<57x128xbf16>, vector<128x64xbf16>, vector<57x64xf32> -> vector<57x64xf32>
    %c0_105 = arith.constant 0 : index
    %c0_106 = arith.constant 0 : index
    %134 = vector.load %arg20[%c0_105, %c0_106] : memref<57x57xbf16, #tpu.memory_space<vmem>>, vector<57x57xbf16>
    %135 = arith.truncf %129 : vector<57x64xf32> to vector<57x64xbf16>
    %cst_107 = arith.constant dense<0.000000e+00> : vector<57x64xf32>
    %136 = tpu.matmul %134, %135, %cst_107 {dimension_numbers = #tpu.dot_dimension_numbers<[1], [0], [0], [1], [0, 0, 1, 1], [], []>} : vector<57x57xbf16>, vector<57x64xbf16>, vector<57x64xf32> -> vector<57x64xf32>
    %c0_108 = arith.constant 0 : index
    %c0_109 = arith.constant 0 : index
    %137 = vector.load %arg21[%c0_108, %c0_109] : memref<57x57xbf16, #tpu.memory_space<vmem>>, vector<57x57xbf16>
    %138 = arith.truncf %131 : vector<57x64xf32> to vector<57x64xbf16>
    %cst_110 = arith.constant dense<0.000000e+00> : vector<57x64xf32>
    %139 = tpu.matmul %137, %138, %cst_110 {dimension_numbers = #tpu.dot_dimension_numbers<[1], [0], [0], [1], [0, 0, 1, 1], [], []>} : vector<57x57xbf16>, vector<57x64xbf16>, vector<57x64xf32> -> vector<57x64xf32>
    %140 = arith.addf %136, %139 : vector<57x64xf32>
    %c0_111 = arith.constant 0 : index
    %c0_112 = arith.constant 0 : index
    %141 = vector.load %arg22[%c0_111, %c0_112] : memref<57x57xbf16, #tpu.memory_space<vmem>>, vector<57x57xbf16>
    %142 = arith.truncf %133 : vector<57x64xf32> to vector<57x64xbf16>
    %cst_113 = arith.constant dense<0.000000e+00> : vector<57x64xf32>
    %143 = tpu.matmul %141, %142, %cst_113 {dimension_numbers = #tpu.dot_dimension_numbers<[1], [0], [0], [1], [0, 0, 1, 1], [], []>} : vector<57x57xbf16>, vector<57x64xbf16>, vector<57x64xf32> -> vector<57x64xf32>
    %144 = arith.addf %140, %143 : vector<57x64xf32>
    %145 = arith.truncf %144 : vector<57x64xf32> to vector<57x64xbf16>
    %c0_114 = arith.constant 0 : index
    %c0_115 = arith.constant 0 : index
    %146 = vector.load %arg23[%c0_114, %c0_115] : memref<64x25xbf16, #tpu.memory_space<vmem>>, vector<64x25xbf16>
    %cst_116 = arith.constant dense<0.000000e+00> : vector<57x25xf32>
    %147 = tpu.matmul %145, %146, %cst_116 {dimension_numbers = #tpu.dot_dimension_numbers<[1], [0], [0], [1], [0, 0, 1, 1], [], []>} : vector<57x64xbf16>, vector<64x25xbf16>, vector<57x25xf32> -> vector<57x25xf32>
    %c0_117 = arith.constant 0 : index
    %c0_118 = arith.constant 0 : index
    %148 = vector.load %arg24[%c0_117, %c0_118] : memref<57x57xbf16, #tpu.memory_space<vmem>>, vector<57x57xbf16>
    %149 = arith.truncf %147 : vector<57x25xf32> to vector<57x25xbf16>
    %cst_119 = arith.constant dense<0.000000e+00> : vector<57x25xf32>
    %150 = tpu.matmul %148, %149, %cst_119 {dimension_numbers = #tpu.dot_dimension_numbers<[1], [0], [0], [1], [0, 0, 1, 1], [], []>} : vector<57x57xbf16>, vector<57x25xbf16>, vector<57x25xf32> -> vector<57x25xf32>
    %c0_120 = arith.constant 0 : index
    %c0_121 = arith.constant 0 : index
    %151 = vector.load %arg25[%c0_120, %c0_121] : memref<1x25xf32, #tpu.memory_space<vmem>>, vector<1x25xf32>
    %152 = vector.broadcast %151 : vector<1x25xf32> to vector<57x25xf32>
    %153 = arith.addf %150, %152 : vector<57x25xf32>
    %cst_122 = arith.constant 0.999994993 : f32
    %154 = vector.broadcast %cst_122 : f32 to vector<57x25xf32>
    %155 = arith.mulf %153, %154 : vector<57x25xf32>
    %cst_123 = arith.constant 0.000000e+00 : f32
    %156 = vector.broadcast %cst_123 : f32 to vector<57x25xf32>
    %157 = arith.maximumf %155, %156 : vector<57x25xf32>
    %158 = vector.shape_cast %157 : vector<57x25xf32> to vector<1x57x25xf32>
    %c0_124 = arith.constant 0 : index
    %c0_125 = arith.constant 0 : index
    %c0_126 = arith.constant 0 : index
    %159 = vector.load %arg26[%c0_124, %c0_125, %c0_126] : memref<12x57x25xf32, #tpu.memory_space<vmem>>, vector<12x57x25xf32>
    %160 = vector.broadcast %158 : vector<1x57x25xf32> to vector<12x57x25xf32>
    %161 = arith.mulf %160, %159 : vector<12x57x25xf32>
    %cst_127 = arith.constant dense<0.000000e+00> : vector<12x57xf32>
    %162 = vector.multi_reduction <add>, %161, %cst_127 [2] : vector<12x57x25xf32> to vector<12x57xf32>
    %cst_128 = arith.constant dense<0.000000e+00> : vector<12xf32>
    %163 = vector.multi_reduction <add>, %162, %cst_128 [1] : vector<12x57xf32> to vector<12xf32>
    %164 = vector.shape_cast %163 : vector<12xf32> to vector<12x1xf32>
    %c0_129 = arith.constant 0 : index
    %c0_130 = arith.constant 0 : index
    %165 = vector.load %arg27[%c0_129, %c0_130] : memref<12x1xf32, #tpu.memory_space<vmem>>, vector<12x1xf32>
    %166 = arith.addf %164, %165 : vector<12x1xf32>
    %cst_131 = arith.constant dense<0xFF800000> : vector<1xf32>
    %167 = vector.multi_reduction <maximumf>, %166, %cst_131 [0] : vector<12x1xf32> to vector<1xf32>
    %168 = vector.shape_cast %167 : vector<1xf32> to vector<1x1xf32>
    %169 = vector.broadcast %168 : vector<1x1xf32> to vector<12x1xf32>
    %170 = arith.subf %166, %169 : vector<12x1xf32>
    %171 = math.exp %170 : vector<12x1xf32>
    %cst_132 = arith.constant dense<0.000000e+00> : vector<1xf32>
    %172 = vector.multi_reduction <add>, %171, %cst_132 [0] : vector<12x1xf32> to vector<1xf32>
    %173 = vector.shape_cast %172 : vector<1xf32> to vector<1x1xf32>
    %174 = math.log %173 : vector<1x1xf32>
    %175 = vector.broadcast %174 : vector<1x1xf32> to vector<12x1xf32>
    %176 = arith.subf %170, %175 : vector<12x1xf32>
    %c0_133 = arith.constant 0 : index
    %c0_134 = arith.constant 0 : index
    %c0_135 = arith.constant 0 : index
    %177 = vector.load %arg30[%c0_133, %c0_134, %c0_135] : memref<1x12x1xf32, #tpu.memory_space<vmem>>, vector<1x12x1xf32>
    %178 = vector.shape_cast %177 : vector<1x12x1xf32> to vector<12x1xf32>
    %179 = vector.shape_cast %176 : vector<12x1xf32> to vector<1x12x1xf32>
    tpu.vector_store %arg30[%c0_133, %c0_134, %c0_135], %179 {strides = array<i32>} : memref<1x12x1xf32, #tpu.memory_space<vmem>>, vector<1x12x1xf32>,
    return
  }
  func.func @transform_0(%arg0: i32) -> (i32, i32, i32) {
    %c0_i32 = arith.constant 0 : i32
    %c0_i32_0 = arith.constant 0 : i32
    %c0_i32_1 = arith.constant 0 : i32
    return %arg0, %c0_i32, %c0_i32_0 : i32, i32, i32
  }
  func.func @transform_1(%arg0: i32) -> (i32, i32) {
    %c0_i32 = arith.constant 0 : i32
    %c0_i32_0 = arith.constant 0 : i32
    %c0_i32_1 = arith.constant 0 : i32
    return %c0_i32, %c0_i32_0 : i32, i32
  }
  func.func @transform_2(%arg0: i32) -> (i32, i32) {
    %c0_i32 = arith.constant 0 : i32
    %c0_i32_0 = arith.constant 0 : i32
    %c0_i32_1 = arith.constant 0 : i32
    return %c0_i32, %c0_i32_0 : i32, i32
  }
  func.func @transform_3(%arg0: i32) -> (i32, i32) {
    %c0_i32 = arith.constant 0 : i32
    %c0_i32_0 = arith.constant 0 : i32
    %c0_i32_1 = arith.constant 0 : i32
    return %c0_i32, %c0_i32_0 : i32, i32
  }
  func.func @transform_4(%arg0: i32) -> (i32, i32) {
    %c0_i32 = arith.constant 0 : i32
    %c0_i32_0 = arith.constant 0 : i32
    %c0_i32_1 = arith.constant 0 : i32
    return %c0_i32, %c0_i32_0 : i32, i32
  }
  func.func @transform_5(%arg0: i32) -> (i32, i32) {
    %c0_i32 = arith.constant 0 : i32
    %c0_i32_0 = arith.constant 0 : i32
    %c0_i32_1 = arith.constant 0 : i32
    return %c0_i32, %c0_i32_0 : i32, i32
  }
  func.func @transform_6(%arg0: i32) -> (i32, i32) {
    %c0_i32 = arith.constant 0 : i32
    %c0_i32_0 = arith.constant 0 : i32
    %c0_i32_1 = arith.constant 0 : i32
    return %c0_i32, %c0_i32_0 : i32, i32
  }
  func.func @transform_7(%arg0: i32) -> (i32, i32) {
    %c0_i32 = arith.constant 0 : i32
    %c0_i32_0 = arith.constant 0 : i32
    %c0_i32_1 = arith.constant 0 : i32
    return %c0_i32, %c0_i32_0 : i32, i32
  }
  func.func @transform_8(%arg0: i32) -> (i32, i32) {
    %c0_i32 = arith.constant 0 : i32
    %c0_i32_0 = arith.constant 0 : i32
    %c0_i32_1 = arith.constant 0 : i32
    return %c0_i32, %c0_i32_0 : i32, i32
  }
  func.func @transform_9(%arg0: i32) -> (i32, i32) {
    %c0_i32 = arith.constant 0 : i32
    %c0_i32_0 = arith.constant 0 : i32
    %c0_i32_1 = arith.constant 0 : i32
    return %c0_i32, %c0_i32_0 : i32, i32
  }
  func.func @transform_10(%arg0: i32) -> (i32, i32) {
    %c0_i32 = arith.constant 0 : i32
    %c0_i32_0 = arith.constant 0 : i32
    %c0_i32_1 = arith.constant 0 : i32
    return %c0_i32, %c0_i32_0 : i32, i32
  }
  func.func @transform_11(%arg0: i32) -> (i32, i32) {
    %c0_i32 = arith.constant 0 : i32
    %c0_i32_0 = arith.constant 0 : i32
    %c0_i32_1 = arith.constant 0 : i32
    return %c0_i32, %c0_i32_0 : i32, i32
  }
  func.func @transform_12(%arg0: i32) -> (i32, i32) {
    %c0_i32 = arith.constant 0 : i32
    %c0_i32_0 = arith.constant 0 : i32
    %c0_i32_1 = arith.constant 0 : i32
    return %c0_i32, %c0_i32_0 : i32, i32
  }
  func.func @transform_13(%arg0: i32) -> (i32, i32) {
    %c0_i32 = arith.constant 0 : i32
    %c0_i32_0 = arith.constant 0 : i32
    %c0_i32_1 = arith.constant 0 : i32
    return %c0_i32, %c0_i32_0 : i32, i32
  }
  func.func @transform_14(%arg0: i32) -> (i32, i32) {
    %c0_i32 = arith.constant 0 : i32
    %c0_i32_0 = arith.constant 0 : i32
    %c0_i32_1 = arith.constant 0 : i32
    return %c0_i32, %c0_i32_0 : i32, i32
  }
  func.func @transform_15(%arg0: i32) -> (i32, i32) {
    %c0_i32 = arith.constant 0 : i32
    %c0_i32_0 = arith.constant 0 : i32
    %c0_i32_1 = arith.constant 0 : i32
    return %c0_i32, %c0_i32_0 : i32, i32
  }
  func.func @transform_16(%arg0: i32) -> (i32, i32) {
    %c0_i32 = arith.constant 0 : i32
    %c0_i32_0 = arith.constant 0 : i32
    %c0_i32_1 = arith.constant 0 : i32
    return %c0_i32, %c0_i32_0 : i32, i32
  }
  func.func @transform_17(%arg0: i32) -> (i32, i32) {
    %c0_i32 = arith.constant 0 : i32
    %c0_i32_0 = arith.constant 0 : i32
    %c0_i32_1 = arith.constant 0 : i32
    return %c0_i32, %c0_i32_0 : i32, i32
  }
  func.func @transform_18(%arg0: i32) -> (i32, i32) {
    %c0_i32 = arith.constant 0 : i32
    %c0_i32_0 = arith.constant 0 : i32
    %c0_i32_1 = arith.constant 0 : i32
    return %c0_i32, %c0_i32_0 : i32, i32
  }
  func.func @transform_19(%arg0: i32) -> (i32, i32) {
    %c0_i32 = arith.constant 0 : i32
    %c0_i32_0 = arith.constant 0 : i32
    %c0_i32_1 = arith.constant 0 : i32
    return %c0_i32, %c0_i32_0 : i32, i32
  }
  func.func @transform_20(%arg0: i32) -> (i32, i32) {
    %c0_i32 = arith.constant 0 : i32
    %c0_i32_0 = arith.constant 0 : i32
    %c0_i32_1 = arith.constant 0 : i32
    return %c0_i32, %c0_i32_0 : i32, i32
  }
  func.func @transform_21(%arg0: i32) -> (i32, i32) {
    %c0_i32 = arith.constant 0 : i32
    %c0_i32_0 = arith.constant 0 : i32
    %c0_i32_1 = arith.constant 0 : i32
    return %c0_i32, %c0_i32_0 : i32, i32
  }
  func.func @transform_22(%arg0: i32) -> (i32, i32) {
    %c0_i32 = arith.constant 0 : i32
    %c0_i32_0 = arith.constant 0 : i32
    %c0_i32_1 = arith.constant 0 : i32
    return %c0_i32, %c0_i32_0 : i32, i32
  }
  func.func @transform_23(%arg0: i32) -> (i32, i32) {
    %c0_i32 = arith.constant 0 : i32
    %c0_i32_0 = arith.constant 0 : i32
    %c0_i32_1 = arith.constant 0 : i32
    return %c0_i32, %c0_i32_0 : i32, i32
  }
  func.func @transform_24(%arg0: i32) -> (i32, i32) {
    %c0_i32 = arith.constant 0 : i32
    %c0_i32_0 = arith.constant 0 : i32
    %c0_i32_1 = arith.constant 0 : i32
    return %c0_i32, %c0_i32_0 : i32, i32
  }
  func.func @transform_25(%arg0: i32) -> (i32, i32, i32) {
    %c0_i32 = arith.constant 0 : i32
    %c0_i32_0 = arith.constant 0 : i32
    %c0_i32_1 = arith.constant 0 : i32
    %c0_i32_2 = arith.constant 0 : i32
    return %c0_i32, %c0_i32_0, %c0_i32_1 : i32, i32, i32
  }
  func.func @transform_26(%arg0: i32) -> (i32, i32) {
    %c0_i32 = arith.constant 0 : i32
    %c0_i32_0 = arith.constant 0 : i32
    %c0_i32_1 = arith.constant 0 : i32
    return %c0_i32, %c0_i32_0 : i32, i32
  }
  func.func @transform_27(%arg0: i32) -> (i32, i32, i32) {
    %c0_i32 = arith.constant 0 : i32
    %c0_i32_0 = arith.constant 0 : i32
    %c0_i32_1 = arith.constant 0 : i32
    return %arg0, %c0_i32, %c0_i32_0 : i32, i32, i32
  }
  func.func @transform_28(%arg0: i32) -> (i32, i32, i32) {
    %c0_i32 = arith.constant 0 : i32
    %c0_i32_0 = arith.constant 0 : i32
    %c0_i32_1 = arith.constant 0 : i32
    return %arg0, %c0_i32, %c0_i32_0 : i32, i32, i32
  }
  func.func @transform_29(%arg0: i32) -> (i32, i32, i32) {
    %c0_i32 = arith.constant 0 : i32
    %c0_i32_0 = arith.constant 0 : i32
    %c0_i32_1 = arith.constant 0 : i32
    return %arg0, %c0_i32, %c0_i32_0 : i32, i32, i32
  }
}

</mosaic_0001>

<bundles_post_ra>
// kernel: forward.1
= control target key start
LH: loop header
LB: loop body
LE: loop exit
PB: predicated region body
PF: predicated region fallthrough
CT: control target
= control target key end

     0   :  { %s6572_s6 = smov 1   ;;  %s6573_s10 = smov 2   ;;  %s8036_s0 = inlined_call_operand.smem [shape: u32[30], index: -1, kind: input, shape index: {}] }
   0x1   :  { %s6610_s5 = sld [smem:[%s8036_s0]]   ;;  %s6574_s14 = smov 3  }
   0x2   :  { %s6615_s9 = sld [smem:[%s8036_s0 + %s6572_s6]]   ;;  %s6575_s18 = smov 4  }
   0x3   :  { %s6620_s13 = sld [smem:[%s8036_s0 + %s6573_s10]]   ;;  %s6576_s22 = smov 5  }
   0x4   :  { %s6625_s17 = sld [smem:[%s8036_s0 + %s6574_s14]]   ;;  %s6577_s26 = smov 6  }
   0x5   :  { %s6630_s21 = sld [smem:[%s8036_s0 + %s6575_s18]]   ;;  %s6578_s30 = smov 7  }
   0x6   :  { %s6635_s25 = sld [smem:[%s8036_s0 + %s6576_s22]]   ;;  %s6579_s4 = smov 8  }
   0x7   :  { %s6640_s29 = sld [smem:[%s8036_s0 + %s6577_s26]]   ;;  %s6580_s10 = smov 9  }
   0x8   :  { %s6645_s3 = sld [smem:[%s8036_s0 + %s6578_s30]]   ;;  %s6581_s15 = smov 10  }
   0x9   :  { %s6650_s8 = sld [smem:[%s8036_s0 + %s6579_s4]]   ;;  %s6582_s20 = smov 11  }
   0xa   :  { %s6655_s14 = sld [smem:[%s8036_s0 + %s6580_s10]]   ;;  %s6583_s26 = smov 12  }
   0xb   :  { %s6660_s19 = sld [smem:[%s8036_s0 + %s6581_s15]]   ;;  %s6584_s1 = smov 13  }
   0xc   :  { %s6665_s24 = sld [smem:[%s8036_s0 + %s6582_s20]]   ;;  %s6585_s7 = smov 14  }
   0xd   :  { %s6670_s30 = sld [smem:[%s8036_s0 + %s6583_s26]]   ;;  %s6586_s15 = smov 15  }
   0xe   :  { %s6675_s6 = sld [smem:[%s8036_s0 + %s6584_s1]]   ;;  %s6587_s22 = smov 16  }
   0xf   :  { %s6680_s12 = sld [smem:[%s8036_s0 + %s6585_s7]]   ;;  %s6588_s28 = smov 17  }
  0x10   :  { %s5392_s20 = sld [smem:[%s8036_s0 + %s6586_s15]]   ;;  %s6589_s10 = smov 18  }
  0x11   :  { %s6688_s27 = sld [smem:[%s8036_s0 + %s6587_s22]]   ;;  %s6590_s16 = smov 19  }
  0x12   :  { %s6693_s4 = sld [smem:[%s8036_s0 + %s6588_s28]]   ;;  %s6591_s22 = smov 20  }
  0x13   :  { %8046 = sst [smem:[#allocation3_spill]] %s6670_s30  ;;  %s6592_s28 = smov 21  }
  0x14   :  { %s6698_s30 = sld [smem:[%s8036_s0 + %s6589_s10]]   ;;  %s6593_s10 = smov 22  }
  0x15   :  { %8047 = sst [smem:[#allocation4_spill]] %s6680_s12  ;;  %s6595_s23 = smov 24  }
  0x16   :  { %s6703_s12 = sld [smem:[%s8036_s0 + %s6590_s16]]   ;;  %v65_v0 = vstv %s5392_s20  ;;  %s6594_s16 = smov 23  }
  0x17   :  { %8048 = sst [smem:[#allocation5_spill]] %s6688_s27  ;;  %66 = vst [vmem:[#allocation2] sm:$0x1] %v65_v0  ;;  %s6596_s20 = smov 25  }
  0x18   :  { %8049 = sst [smem:[#allocation6_spill]] %s6693_s4 }
  0x19   :  { %s6708_s27 = sld [smem:[%s8036_s0 + %s6591_s22]]  }
  0x1a   :  { %s6713_s4 = sld [smem:[%s8036_s0 + %s6592_s28]]  }
  0x1b   :  { %s6718_s15 = sld [smem:[%s8036_s0 + %s6593_s10]]   ;;  %s6597_s10 = smov 26  }
  0x1c   :  { %8050 = sst [smem:[#allocation7_spill]] %s6703_s12  ;;  %s6598_s12 = smov 27  }
  0x1d   :  { %s6723_s22 = sld [smem:[%s8036_s0 + %s6594_s16]]  }
  0x1e   :  { %s6728_s28 = sld [smem:[%s8036_s0 + %s6595_s23]]  }
  0x1f   :  { %8051 = sst [smem:[#allocation8_spill]] %s6708_s27  ;;  %s6599_s27 = smov 28  }
  0x20   :  { %8052 = sst [smem:[#allocation9_spill]] %s6713_s4 }
  0x21   :  { %8053 = sst [smem:[#allocation10_spill]] %s6718_s15  ;;  %s6755_s15 = smov 0  }
  0x22   :  { %s6733_s7 = sld [smem:[%s8036_s0 + %s6596_s20]]   ;;  %s6600_s20 = smov 29  }
  0x23   :  { %8054 = sst [smem:[#allocation11_spill]] %s6723_s22 }
  0x24   :  { %8055 = sst [smem:[#allocation12_spill]] %s6728_s28 }
  0x25   :  { %s6738_s4 = sld [smem:[%s8036_s0 + %s6597_s10]]  }
  0x26   :  { %s6743_s22 = sld [smem:[%s8036_s0 + %s6598_s12]]  }
  0x27   :  { %s6748_s28 = sld [smem:[%s8036_s0 + %s6599_s27]]  }
  0x28   :  { %8056 = sst [smem:[#allocation13_spill]] %s6733_s7 }
  0x29   :  { %s6753_s7 = sld [smem:[%s8036_s0 + %s6600_s20]]  }
  0x2a LB: > { %s5407_s10 = sadd.s32 4294967295, %s6570_s15   ;;  %p5411_p0 = scmp.ge.s32.totalorder %s6570_s15, 1  ;;  %s6570_s15 = sphi %s6755_s15, %s72_s15  }
  0x2b   : > { %p824_p1 = scmp.lt.s32.totalorder %s6570_s15, 3 }
  0x2d   : > { %p825_p2 = pnand %p5411_p0, %p824_p1 }
  0x2e   : > { %p910_p3 = scmp.lt.s32.totalorder (!%p825_p2), %s5407_s10, 1  ;;  %s8057_s12 = sld [smem:[#allocation4_spill]] (!%p825_p2) }
  0x2f   : > { %828 = sbr.rel (%p825_p2) target bundleno = 5044 (0x13b4), region = 128  ;;  %s8058_s16 = sld [smem:[#allocation3_spill]] (!%p825_p2) }
  0x30   : > { %s8059_s23 = sld [smem:[#allocation6_spill]] (!%p825_p2) }
  0x31   : > { %s8060_s26 = sld [smem:[#allocation5_spill]] (!%p825_p2) }
  0x32   : > { %s8061_s20 = sld [smem:[#allocation8_spill]] (!%p825_p2) }
  0x33   : > { %s8062_s1 = sld [smem:[#allocation9_spill]] (!%p825_p2) }
  0x34   : > { %v6404_v1 = vld [vmem:[%s6615_s9 + $0x8] sm:$0x1f]   ;;  %vm971_vm0 = vcmask 1043456   ;;  %vm972_vm1 = vcmask 1044480   ;;  %v6601_v2 = vmov 65535   ;;  %v6405_v6 = vld [vmem:[%s6615_s9] sm:$0xff]  }
  0x35   : > { %v973_v3 = vsel %vm971_vm0, 4294967295, %v6601_v2  ;;  %s8069_s10 = smov (!%p910_p3, %s5407_s10), 1  ;;  %vm958_vm2 = vcmask 203776   ;;  %v6406_v19 = vld [vmem:[%s6620_s13] sm:$0xff]   ;;  %vm1082_vm3 = vcmask 465920   ;;  %v6782_v20 = vld [vmem:[%s6630_s21 + $0x38] sm:$0xff]  }
  0x36   : > { %v6764_v4 = vsel %vm972_vm1, %v973_v3, 0  ;;  %s6771_s0 = sshll.u32 %s8069_s10, 6  ;;  %5886 = vmatprep.mubr.msk.bf16.mxu1 %vm1082_vm3, %v6406_v19  ;;  %v6785_v21 = vld [vmem:[%s6630_s21 + $0x30] sm:$0xff]   ;;  %v6791_v22 = vld [vmem:[%s6630_s21 + $0x28] sm:$0xff]   ;;  %v6796_v23 = vld [vmem:[%s6630_s21 + $0x20] sm:$0xff]   ;;  %vm2304_vm4 = vcmask 196608  }
  0x37   : > { %v976_v5 = vand.u32 %v6404_v1, %v6764_v4  ;;  %s914_s11 = scalar_lea.vmem %s6610_s5, %s6771_s0  ;;  %v6407_v37 = vld [vmem:[%s6620_s13 + $0x8] sm:$0xff]   ;;  %v6408_v38 = vld [vmem:[%s6620_s13 + $0x10] sm:$0xff]   ;;  %v6409_v39 = vld [vmem:[%s6620_s13 + $0x18] sm:$0x1f]   ;;  %s919_s18 = scalar_lea.vmem %s6743_s22, %s6771_s0  ;;  %vm2602_vm5 = vcmask 7168   ;;  %vm2610_vm6 = vcmask 0  }
  0x38   : > { %v931_v7 = vld [vmem:[%s914_s11] sm:$0xff]  ;;  %v932_v8 = vld [vmem:[%s914_s11 + $0x8] sm:$0xff]  ;;  %v933_v9 = vld [vmem:[%s914_s11 + $0x10] sm:$0xff]  ;;  %s7164_s27 = scalar_lea.vmem %s6748_s28, %s6771_s0  ;;  %s8063_s2 = sld [smem:[#allocation7_spill]]  ;;  %vm3923_vm7 = vcmask 523264   ;;  %vm4723_vm8 = vcmask 130112  }
  0x39   : > { %5866 = vmatprep.subr.bf16.mxu0 %v976_v5  ;;  %v939_v10 = vpack.c.bf16 %v932_v8, %v931_v7  ;;  %v934_v11 = vld [vmem:[%s914_s11 + $0x18] sm:$0xff]  ;;  %v935_v12 = vld [vmem:[%s914_s11 + $0x20] sm:$0xff]  ;;  %v936_v13 = vld [vmem:[%s914_s11 + $0x28] sm:$0xff]  ;;  %s8064_s0 = sld [smem:[#allocation10_spill]]  ;;  %vm4730_vm9 = vcmask 195712   ;;  %vm4737_vm10 = vcmask 261312  }
  0x3a   : > { %5867 = vmatpush3.bf16.msra.mxu0 %v976_v5  ;;  %v940_v14 = vpack.c.bf16 %v934_v11, %v933_v9  ;;  %v941_v15 = vpack.c.bf16 %v936_v13, %v935_v12  ;;  %v937_v16 = vld [vmem:[%s914_s11 + $0x30] sm:$0xff]  ;;  %v938_v17 = vld [vmem:[%s914_s11 + $0x38] sm:$0x1]  ;;  %v6819_v42 = vld [vmem:[%s6630_s21 + $0x8] sm:$0xff]   ;;  %s8065_s11 = sld [smem:[#allocation11_spill]]  ;;  %vm4744_vm11 = vcmask 326912  }
  0x3b   : > { %5868 = vmatprep.subr.bf16.mxu0 %v6405_v6  ;;  %5870 = vmatprep.mubr.msk.bf16.mxu0 %vm958_vm2, %v939_v10  ;;  %v942_v18 = vpack.c.bf16 %v938_v17, %v937_v16  ;;  %v6809_v40 = vld [vmem:[%s6630_s21 + $0x18] sm:$0xff]   ;;  %v6814_v41 = vld [vmem:[%s6630_s21 + $0x10] sm:$0xff]   ;;  %v6824_v43 = vld [vmem:[%s6630_s21] sm:$0xff]   ;;  %vm4751_vm12 = vcmask 392512   ;;  %vm4758_vm13 = vcmask 458112   ;;  %vm4765_vm14 = vcmask 523712  }
  0x3c   : > { %v5426_v45 = vld [vmem:[%s6625_s17] ss:$0 sm:$0xff]  ;;  %vm5196_vm15 = vcmask 1041409   ;;  %vm5198_vm0 = vcmask 1042434   ;;  %vm5200_vm1 = vcmask 1043459  }
  0x3e   : > { %5869 = vmatpush3.bf16.msra.mxu0 %v6405_v6 }
  0x3f   : > { %5894 = vmatprep.subr.bf16.mxu0 %v6782_v20 }
  0x41   : > { %5871 = vmatmul.mubr.msk.bf16.vlgmr.msra.gmra.mxu0 %vm958_vm2, %v940_v14 }
  0x42   : > { %5874 = vmatprep.mubr.msk.bf16.mxu0 %vm958_vm2, %v941_v15  ;;  %5895 = vmatpush3.bf16.msra.mxu0 %v6782_v20 }
  0x43   : > { %5896 = vmatprep.subr.bf16.mxu0 %v6785_v21 }
  0x46   : > { %5897 = vmatpush3.bf16.msra.mxu0 %v6785_v21 }
  0x47   : > { %5898 = vmatprep.subr.bf16.mxu0 %v6791_v22 }
  0x49   : > { %5875 = vmatmul.mubr.msk.bf16.gmra.mxu0 %vm958_vm2, %v942_v18  ;;  %v6870_v18 = vld [vmem:[%s6635_s25] sm:$0xff]  }
  0x4a   : > { %5899 = vmatpush3.bf16.msra.mxu0 %v6791_v22 }
  0x4b   : > { %5900 = vmatprep.subr.bf16.mxu0 %v6796_v23 }
  0x4e   : > { %5901 = vmatpush3.bf16.msra.mxu0 %v6796_v23 }
  0x4f   : > { %5902 = vmatprep.subr.bf16.mxu0 %v6809_v40 }
  0x52   : > { %5903 = vmatpush3.bf16.msra.mxu0 %v6809_v40 }
  0x53   : > { %5904 = vmatprep.subr.bf16.mxu0 %v6814_v41 }
  0x56   : > { %5905 = vmatpush3.bf16.msra.mxu0 %v6814_v41 }
  0x57   : > { %5906 = vmatprep.subr.bf16.mxu0 %v6819_v42 }
  0x5a   : > { %5907 = vmatpush3.bf16.msra.mxu0 %v6819_v42 }
  0x5b   : > { %5908 = vmatprep.subr.bf16.mxu0 %v6824_v43 }
  0x5e   : > { %5909 = vmatpush3.bf16.msra.mxu0 %v6824_v43 }
 0x101   : > { %v5872_v24 = vpop.f32.mrf.mxu0 }
 0x103   : > { %v1012_v25 = vpop.f32.mrf.mxu0 }
 0x105   : > { %v5873_v26 = vpop.f32.mrf.mxu0 }
 0x106   : > { %v1052_v35 = vpack.c.bf16 %v5873_v26, %v5872_v24 }
 0x107   : > { %v1015_v27 = vpop.f32.mrf.mxu0 }
 0x108   : > { %v1051_v36 = vpack.c.bf16 %v1015_v27, %v1012_v25 }
 0x109   : > { %v5876_v28 = vpop.f32.mrf.mxu0 }
 0x10b   : > { %v1028_v29 = vpop.f32.mrf.mxu0 }
 0x10d   : > { %v5877_v30 = vpop.f32.mrf.mxu0 }
 0x10e   : > { %v1054_v31 = vpack.c.bf16 %v5877_v30, %v5876_v28 }
 0x10f   : > { %v1031_v32 = vpop.f32.mrf.mxu0 }
 0x110   : > { %v1096_v33 = vand.u32 %v1054_v31, %v6764_v4  ;;  %v1053_v34 = vpack.c.bf16 %v1031_v32, %v1028_v29 }
 0x112   : > { %5878 = vmatprep.subr.bf16.mxu1 %v1096_v33 }
 0x113   : > { %5879 = vmatpush3.bf16.msra.mxu1 %v1096_v33 }
 0x114   : > { %5880 = vmatprep.subr.bf16.mxu1 %v1053_v34 }
 0x117   : > { %5881 = vmatpush3.bf16.msra.mxu1 %v1053_v34 }
 0x118   : > { %5882 = vmatprep.subr.bf16.mxu1 %v1052_v35 }
 0x11b   : > { %5883 = vmatpush3.bf16.msra.mxu1 %v1052_v35 }
 0x11c   : > { %5884 = vmatprep.subr.bf16.mxu1 %v1051_v36 }
 0x11f   : > { %5885 = vmatpush3.bf16.msra.mxu1 %v1051_v36  ;;  %v6876_v36 = vld [vmem:[%s6645_s3 + $0x38] sm:$0xff]  }
 0x122   : > { %5887 = vmatmul.mubr.msk.bf16.vlgmr.msra.gmra.mxu1 %vm1082_vm3, %v6407_v37  ;;  %v6879_v37 = vld [vmem:[%s6635_s25 + $0x8] sm:$0xff]  }
 0x123   : > { %5890 = vmatprep.mubr.msk.bf16.mxu1 %vm1082_vm3, %v6408_v38  ;;  %v6882_v38 = vld [vmem:[%s6635_s25 + $0x10] sm:$0xff]  }
 0x12a   : > { %5891 = vmatmul.mubr.msk.bf16.gmra.mxu1 %vm1082_vm3, %v6409_v39  ;;  %v6886_v39 = vld [vmem:[%s6645_s3 + $0x30] sm:$0xff]  }
 0x12b   : > { %5926 = vmatprep.mubr.msk.bf16.mxu1 %vm1082_vm3, %v6870_v18 }
 0x1e2   : > { %v5888_v44 = vpop.f32.mrf.mxu1 }
 0x1e3   : > { %v1141_v48 = vadd.f32 %v5888_v44, %v5426_v45  ;;  %v6895_v44 = vld [vmem:[%s6645_s3 + $0x28] sm:$0xff]  }
 0x1e4   : > { %v1132_v46 = vpop.f32.mrf.mxu1 }
 0x1e5   : > { %v1133_v47 = vadd.f32 %v5426_v45, %v1132_v46  ;;  %v6833_v55 = vmul.f32 0.999995, %v1141_v48  ;;  %v6903_v46 = vld [vmem:[%s6645_s3 + $0x20] sm:$0xff]   ;;  %v6916_v48 = vld [vmem:[%s6645_s3 + $0x10] sm:$0xff]  }
 0x1e6   : > { %v5889_v49 = vpop.f32.mrf.mxu1 }
 0x1e7   : > { %v1144_v50 = vadd.f32 %v5889_v49, %v5426_v45  ;;  %v6829_v52 = vmul.f32 0.999995, %v1133_v47  ;;  %v1173_v63 = vmax.f32 %v6833_v55, 0.0  ;;  %v6911_v47 = vld [vmem:[%s6645_s3 + $0x18] sm:$0xff]   ;;  %v6921_v49 = vld [vmem:[%s6645_s3 + $0x8] sm:$0xff]  }
 0x1e8   : > { %v1135_v51 = vpop.f32.mrf.mxu1 }
 0x1e9   : > { %v6831_v53 = vmul.f32 0.999995, %v1144_v50  ;;  %v1136_v54 = vadd.f32 %v5426_v45, %v1135_v51  ;;  %v1171_v60 = vmax.f32 %v6829_v52, 0.0  ;;  %v6926_v50 = vld [vmem:[%s6645_s3] sm:$0xff]  }
 0x1ea   : > { %v5892_v56 = vpop.f32.mrf.mxu1 }
 0x1eb   : > { %v6835_v57 = vmul.f32 0.999995, %v1136_v54  ;;  %v1174_v58 = vmax.f32 %v6831_v53, 0.0  ;;  %v1157_v0 = vadd.f32 %v5892_v56, %v5426_v45  ;;  %v6931_v54 = vld [vmem:[%s6640_s29] ss:$0 sm:$0xff] }
 0x1ec   : > { %v1148_v59 = vpop.f32.mrf.mxu1 }
 0x1ed   : > { %v1172_v61 = vmax.f32 %v6835_v57, 0.0  ;;  %v1149_v62 = vadd.f32 %v5426_v45, %v1148_v59  ;;  %v1180_v5 = vpack.c.bf16 %v1174_v58, %v1173_v63  ;;  %v6853_v10 = vmul.f32 0.999995, %v1157_v0 }
 0x1ee   : > { %v5893_v1 = vpop.f32.mrf.mxu1 }
 0x1ef   : > { %v1179_v2 = vpack.c.bf16 %v1172_v61, %v1171_v60  ;;  %v1160_v3 = vadd.f32 %v5893_v1, %v5426_v45  ;;  %v6849_v7 = vmul.f32 0.999995, %v1149_v62  ;;  %v1177_v15 = vmax.f32 %v6853_v10, 0.0 }
 0x1f0   : > { %v1151_v6 = vpop.f32.mrf.mxu1 }
 0x1f1   : > { %v6851_v8 = vmul.f32 0.999995, %v1160_v3  ;;  %v1152_v9 = vadd.f32 %v5426_v45, %v1151_v6  ;;  %5910 = vmatprep.mubr.bf16.mxu0 %v1179_v2  ;;  %v1175_v13 = vmax.f32 %v6849_v7, 0.0  ;;  %v6898_v45 = vld [vmem:[%s6635_s25 + $0x18] sm:$0x1f]  }
 0x1f2   : > { %5911 = vmatmul.mubr.bf16.vlgmr.msra.gmra.mxu0 %v1180_v5 }
 0x1f3   : > { %v6855_v11 = vmul.f32 0.999995, %v1152_v9  ;;  %v1178_v12 = vmax.f32 %v6851_v8, 0.0 }
 0x1f5   : > { %v1176_v14 = vmax.f32 %v6855_v11, 0.0  ;;  %v1182_v17 = vpack.c.bf16 %v1178_v12, %v1177_v15 }
 0x1f7   : > { %v1181_v16 = vpack.c.bf16 %v1176_v14, %v1175_v13 }
 0x1f9   : > { %5914 = vmatprep.mubr.bf16.mxu0 %v1181_v16 }
 0x1fa   : > { %5915 = vmatmul.mubr.bf16.gmra.mxu0 %v1182_v17 }
 0x2b2   : > { %v5912_v19 = vpop.f32.mrf.mxu0 }
 0x2b4   : > { %v1281_v24 = vpop.f32.mrf.mxu0 }
 0x2b6   : > { %v5913_v25 = vpop.f32.mrf.mxu0 }
 0x2b7   : > { %v1321_v34 = vpack.c.bf16 %v5913_v25, %v5912_v19 }
 0x2b8   : > { %v1284_v26 = vpop.f32.mrf.mxu0 }
 0x2b9   : > { %v1320_v35 = vpack.c.bf16 %v1284_v26, %v1281_v24 }
 0x2ba   : > { %v5916_v27 = vpop.f32.mrf.mxu0 }
 0x2bc   : > { %v1297_v28 = vpop.f32.mrf.mxu0 }
 0x2be   : > { %v5917_v29 = vpop.f32.mrf.mxu0 }
 0x2bf   : > { %v1323_v30 = vpack.c.bf16 %v5917_v29, %v5916_v27 }
 0x2c0   : > { %v1300_v31 = vpop.f32.mrf.mxu0 }
 0x2c1   : > { %v1364_v32 = vand.u32 %v1323_v30, %v6764_v4  ;;  %v1322_v33 = vpack.c.bf16 %v1300_v31, %v1297_v28 }
 0x2c3   : > { %5918 = vmatprep.subr.bf16.mxu1 %v1364_v32 }
 0x2c4   : > { %5919 = vmatpush3.bf16.msra.mxu1 %v1364_v32 }
 0x2c5   : > { %5920 = vmatprep.subr.bf16.mxu1 %v1322_v33 }
 0x2c8   : > { %5921 = vmatpush3.bf16.msra.mxu1 %v1322_v33 }
 0x2c9   : > { %5922 = vmatprep.subr.bf16.mxu1 %v1321_v34 }
 0x2cc   : > { %5923 = vmatpush3.bf16.msra.mxu1 %v1321_v34 }
 0x2cd   : > { %5924 = vmatprep.subr.bf16.mxu1 %v1320_v35 }
 0x2d0   : > { %5925 = vmatpush3.bf16.msra.mxu1 %v1320_v35 }
 0x2d1   : > { %5934 = vmatprep.subr.bf16.mxu1 %v6876_v36 }
 0x2d3   : > { %5927 = vmatmul.mubr.msk.bf16.vlgmr.msra.gmra.mxu1 %vm1082_vm3, %v6879_v37 }
 0x2d4   : > { %5930 = vmatprep.mubr.msk.bf16.mxu1 %vm1082_vm3, %v6882_v38  ;;  %5935 = vmatpush3.bf16.msra.mxu1 %v6876_v36 }
 0x2d5   : > { %5936 = vmatprep.subr.bf16.mxu1 %v6886_v39 }
 0x2d8   : > { %5937 = vmatpush3.bf16.msra.mxu1 %v6886_v39 }
 0x2d9   : > { %5938 = vmatprep.subr.bf16.mxu1 %v6895_v44 }
 0x2db   : > { %5931 = vmatmul.mubr.msk.bf16.gmra.mxu1 %vm1082_vm3, %v6898_v45 }
 0x2dc   : > { %5939 = vmatpush3.bf16.msra.mxu1 %v6895_v44 }
 0x2dd   : > { %5940 = vmatprep.subr.bf16.mxu1 %v6903_v46 }
 0x2e0   : > { %5941 = vmatpush3.bf16.msra.mxu1 %v6903_v46 }
 0x2e1   : > { %5942 = vmatprep.subr.bf16.mxu1 %v6911_v47 }
 0x2e4   : > { %5943 = vmatpush3.bf16.msra.mxu1 %v6911_v47 }
 0x2e5   : > { %5944 = vmatprep.subr.bf16.mxu1 %v6916_v48 }
 0x2e8   : > { %5945 = vmatpush3.bf16.msra.mxu1 %v6916_v48 }
 0x2e9   : > { %5946 = vmatprep.subr.bf16.mxu1 %v6921_v49 }
 0x2ec   : > { %5947 = vmatpush3.bf16.msra.mxu1 %v6921_v49 }
 0x2ed   : > { %5948 = vmatprep.subr.bf16.mxu1 %v6926_v50 }
 0x2f0   : > { %5949 = vmatpush3.bf16.msra.mxu1 %v6926_v50 }
 0x393   : > { %v5928_v51 = vpop.f32.mrf.mxu1 }
 0x394   : > { %v1409_v62 = vadd.f32 %v5928_v51, %v6931_v54 }
 0x395   : > { %v1400_v56 = vpop.f32.mrf.mxu1 }
 0x396   : > { %v1401_v59 = vadd.f32 %v6931_v54, %v1400_v56  ;;  %v1433_v9 = vmul.f32 0.999995, %v1409_v62 }
 0x397   : > { %v5929_v0 = vpop.f32.mrf.mxu1 }
 0x398   : > { %v1412_v1 = vadd.f32 %v5929_v0, %v6931_v54  ;;  %v1431_v3 = vmul.f32 0.999995, %v1401_v59  ;;  %v1441_v28 = vmax.f32 %v1433_v9, 0.0  ;;  %v6944_v9 = vld [vmem:[%s6650_s8] sm:$0xff]  }
 0x399   : > { %v1403_v2 = vpop.f32.mrf.mxu1  ;;  %5966 = vmatprep.mubr.msk.bf16.mxu0 %vm1082_vm3, %v6944_v9 }
 0x39a   : > { %v1434_v5 = vmul.f32 0.999995, %v1412_v1  ;;  %v1404_v6 = vadd.f32 %v6931_v54, %v1403_v2  ;;  %v1439_v25 = vmax.f32 %v1431_v3, 0.0 }
 0x39b   : > { %v5932_v16 = vpop.f32.mrf.mxu1 }
 0x39c   : > { %v1432_v17 = vmul.f32 0.999995, %v1404_v6  ;;  %v1442_v19 = vmax.f32 %v1434_v5, 0.0  ;;  %v1425_v29 = vadd.f32 %v5932_v16, %v6931_v54 }
 0x39d   : > { %v1416_v24 = vpop.f32.mrf.mxu1 }
 0x39e   : > { %v1440_v26 = vmax.f32 %v1432_v17, 0.0  ;;  %v1417_v27 = vadd.f32 %v6931_v54, %v1416_v24  ;;  %v1448_v33 = vpack.c.bf16 %v1442_v19, %v1441_v28  ;;  %v1437_v59 = vmul.f32 0.999995, %v1425_v29 }
 0x39f   : > { %v5933_v30 = vpop.f32.mrf.mxu1 }
 0x3a0   : > { %v1447_v31 = vpack.c.bf16 %v1440_v26, %v1439_v25  ;;  %v1428_v32 = vadd.f32 %v5933_v30, %v6931_v54  ;;  %v1435_v35 = vmul.f32 0.999995, %v1417_v27  ;;  %v1445_v3 = vmax.f32 %v1437_v59, 0.0 }
 0x3a1   : > { %v1419_v34 = vpop.f32.mrf.mxu1 }
 0x3a2   : > { %v1438_v51 = vmul.f32 0.999995, %v1428_v32  ;;  %v1420_v56 = vadd.f32 %v6931_v54, %v1419_v34  ;;  %5950 = vmatprep.mubr.bf16.mxu1 %v1447_v31  ;;  %v1443_v1 = vmax.f32 %v1435_v35, 0.0  ;;  %v6953_v34 = vld [vmem:[%s6650_s8 + $0x10] sm:$0xff]   ;;  %v6963_v35 = vld [vmem:[%s6650_s8 + $0x18] sm:$0x1f]  }
 0x3a3   : > { %5951 = vmatmul.mubr.bf16.vlgmr.msra.gmra.mxu1 %v1448_v33  ;;  %v6950_v33 = vld [vmem:[%s6650_s8 + $0x8] sm:$0xff]  }
 0x3a4   : > { %v1436_v62 = vmul.f32 0.999995, %v1420_v56  ;;  %v1446_v0 = vmax.f32 %v1438_v51, 0.0 }
 0x3a6   : > { %v1444_v2 = vmax.f32 %v1436_v62, 0.0  ;;  %v1450_v6 = vpack.c.bf16 %v1446_v0, %v1445_v3 }
 0x3a8   : > { %v1449_v5 = vpack.c.bf16 %v1444_v2, %v1443_v1 }
 0x3aa   : > { %5954 = vmatprep.mubr.bf16.mxu1 %v1449_v5 }
 0x3ab   : > { %5955 = vmatmul.mubr.bf16.gmra.mxu1 %v1450_v6 }
 0x3ac   : > { %6006 = vmatprep.mubr.msk.bf16.mxu1 %vm1082_vm3, %v6870_v18 }
 0x463   : > { %v5952_v16 = vpop.f32.mrf.mxu1 }
 0x465   : > { %v1549_v17 = vpop.f32.mrf.mxu1 }
 0x467   : > { %v5953_v19 = vpop.f32.mrf.mxu1 }
 0x468   : > { %v1589_v18 = vpack.c.bf16 %v5953_v19, %v5952_v16 }
 0x469   : > { %v1552_v24 = vpop.f32.mrf.mxu1 }
 0x46a   : > { %v1588_v32 = vpack.c.bf16 %v1552_v24, %v1549_v17 }
 0x46b   : > { %v5956_v25 = vpop.f32.mrf.mxu1 }
 0x46d   : > { %v1565_v26 = vpop.f32.mrf.mxu1 }
 0x46f   : > { %v5957_v27 = vpop.f32.mrf.mxu1 }
 0x470   : > { %v1591_v28 = vpack.c.bf16 %v5957_v27, %v5956_v25 }
 0x471   : > { %v1568_v29 = vpop.f32.mrf.mxu1 }
 0x472   : > { %v1632_v30 = vand.u32 %v1591_v28, %v6764_v4  ;;  %v1590_v31 = vpack.c.bf16 %v1568_v29, %v1565_v26 }
 0x474   : > { %5958 = vmatprep.subr.bf16.mxu0 %v1632_v30 }
 0x475   : > { %5959 = vmatpush3.bf16.msra.mxu0 %v1632_v30 }
 0x476   : > { %5960 = vmatprep.subr.bf16.mxu0 %v1590_v31 }
 0x479   : > { %5961 = vmatpush3.bf16.msra.mxu0 %v1590_v31 }
 0x47a   : > { %5962 = vmatprep.subr.bf16.mxu0 %v1589_v18 }
 0x47d   : > { %5963 = vmatpush3.bf16.msra.mxu0 %v1589_v18 }
 0x47e   : > { %5964 = vmatprep.subr.bf16.mxu0 %v1588_v32 }
 0x481   : > { %5965 = vmatpush3.bf16.msra.mxu0 %v1588_v32 }
 0x482   : > { %5974 = vmatprep.subr.bf16.mxu0 %v6782_v20 }
 0x484   : > { %5967 = vmatmul.mubr.msk.bf16.vlgmr.msra.gmra.mxu0 %vm1082_vm3, %v6950_v33 }
 0x485   : > { %5970 = vmatprep.mubr.msk.bf16.mxu0 %vm1082_vm3, %v6953_v34  ;;  %5975 = vmatpush3.bf16.msra.mxu0 %v6782_v20  ;;  %v6981_v20 = vld [vmem:[%s6655_s14] ss:$0 sm:$0xff] }
 0x486   : > { %5976 = vmatprep.subr.bf16.mxu0 %v6785_v21 }
 0x489   : > { %5977 = vmatpush3.bf16.msra.mxu0 %v6785_v21 }
 0x48a   : > { %5978 = vmatprep.subr.bf16.mxu0 %v6791_v22 }
 0x48c   : > { %5971 = vmatmul.mubr.msk.bf16.gmra.mxu0 %vm1082_vm3, %v6963_v35 }
 0x48d   : > { %5979 = vmatpush3.bf16.msra.mxu0 %v6791_v22 }
 0x48e   : > { %5980 = vmatprep.subr.bf16.mxu0 %v6796_v23 }
 0x491   : > { %5981 = vmatpush3.bf16.msra.mxu0 %v6796_v23 }
 0x492   : > { %5982 = vmatprep.subr.bf16.mxu0 %v6809_v40 }
 0x495   : > { %5983 = vmatpush3.bf16.msra.mxu0 %v6809_v40 }
 0x496   : > { %5984 = vmatprep.subr.bf16.mxu0 %v6814_v41 }
 0x499   : > { %5985 = vmatpush3.bf16.msra.mxu0 %v6814_v41 }
 0x49a   : > { %5986 = vmatprep.subr.bf16.mxu0 %v6819_v42 }
 0x49d   : > { %5987 = vmatpush3.bf16.msra.mxu0 %v6819_v42 }
 0x49e   : > { %5988 = vmatprep.subr.bf16.mxu0 %v6824_v43 }
 0x4a1   : > { %5989 = vmatpush3.bf16.msra.mxu0 %v6824_v43 }
 0x544   : > { %v5968_v21 = vpop.f32.mrf.mxu0 }
 0x545   : > { %v1677_v22 = vadd.f32 %v5968_v21, %v6981_v20 }
 0x546   : > { %v1668_v23 = vpop.f32.mrf.mxu0 }
 0x547   : > { %v1669_v40 = vadd.f32 %v6981_v20, %v1668_v23  ;;  %v1701_v59 = vmul.f32 0.999995, %v1677_v22 }
 0x548   : > { %v5969_v51 = vpop.f32.mrf.mxu0 }
 0x549   : > { %v1699_v56 = vmul.f32 0.999995, %v1669_v40  ;;  %v1680_v41 = vadd.f32 %v5969_v51, %v6981_v20  ;;  %v1709_v5 = vmax.f32 %v1701_v59, 0.0 }
 0x54a   : > { %v1671_v62 = vpop.f32.mrf.mxu0 }
 0x54b   : > { %v1702_v0 = vmul.f32 0.999995, %v1680_v41  ;;  %v1672_v42 = vadd.f32 %v6981_v20, %v1671_v62  ;;  %v1707_v2 = vmax.f32 %v1699_v56, 0.0  ;;  %v7003_v29 = vadd.f32 %v1709_v5, %v1173_v63 }
 0x54c   : > { %v5972_v1 = vpop.f32.mrf.mxu0 }
 0x54d   : > { %v1710_v43 = vmax.f32 %v1702_v0, 0.0  ;;  %v1700_v3 = vmul.f32 0.999995, %v1672_v42  ;;  %v1693_v6 = vadd.f32 %v5972_v1, %v6981_v20  ;;  %v6995_v26 = vadd.f32 %v1707_v2, %v1171_v60 }
 0x54e   : > { %v1684_v16 = vpop.f32.mrf.mxu0 }
 0x54f   : > { %v1708_v17 = vmax.f32 %v1700_v3, 0.0  ;;  %v1685_v19 = vadd.f32 %v6981_v20, %v1684_v16  ;;  %v6991_v24 = vadd.f32 %v1710_v43, %v1174_v58  ;;  %v1705_v30 = vmul.f32 0.999995, %v1693_v6 }
 0x550   : > { %v5973_v25 = vpop.f32.mrf.mxu0 }
 0x551   : > { %v6999_v27 = vadd.f32 %v1708_v17, %v1172_v61  ;;  %v1703_v28 = vmul.f32 0.999995, %v1685_v19  ;;  %v1696_v31 = vadd.f32 %v5973_v25, %v6981_v20  ;;  %v7013_v57 = vpack.c.bf16 %v6991_v24, %v7003_v29 }
 0x552   : > { %v1687_v53 = vpop.f32.mrf.mxu0  ;;  %v1713_v55 = vmax.f32 %v1705_v30, 0.0 }
 0x553   : > { %v1688_v58 = vadd.f32 %v6981_v20, %v1687_v53  ;;  %v7009_v52 = vpack.c.bf16 %v6999_v27, %v6995_v26  ;;  %v1706_v60 = vmul.f32 0.999995, %v1696_v31  ;;  %v1711_v61 = vmax.f32 %v1703_v28, 0.0 }
 0x554   : > { %v7031_v40 = vadd.f32 %v1713_v55, %v1177_v15 }
 0x555   : > { %v1704_v18 = vmul.f32 0.999995, %v1688_v58  ;;  %5990 = vmatprep.mubr.bf16.mxu0 %v7009_v52  ;;  %v1714_v63 = vmax.f32 %v1706_v60, 0.0  ;;  %v7023_v22 = vadd.f32 %v1711_v61, %v1175_v13 }
 0x556   : > { %5991 = vmatmul.mubr.bf16.vlgmr.msra.gmra.mxu0 %v7013_v57 }
 0x557   : > { %v1712_v32 = vmax.f32 %v1704_v18, 0.0  ;;  %v7019_v21 = vadd.f32 %v1714_v63, %v1178_v12 }
 0x559   : > { %v7027_v23 = vadd.f32 %v1712_v32, %v1176_v14  ;;  %v7039_v8 = vpack.c.bf16 %v7019_v21, %v7031_v40 }
 0x55b   : > { %v7035_v51 = vpack.c.bf16 %v7027_v23, %v7023_v22 }
 0x55d   : > { %5994 = vmatprep.mubr.bf16.mxu0 %v7035_v51 }
 0x55e   : > { %5995 = vmatmul.mubr.bf16.gmra.mxu0 %v7039_v8 }
 0x55f   : > { %6046 = vmatprep.mubr.msk.bf16.mxu0 %vm1082_vm3, %v6944_v9 }
 0x616   : > { %v5992_v7 = vpop.f32.mrf.mxu0 }
 0x618   : > { %v1761_v11 = vpop.f32.mrf.mxu0 }
 0x61a   : > { %v5993_v10 = vpop.f32.mrf.mxu0 }
 0x61b   : > { %v1793_v0 = vpack.c.bf16 %v5993_v10, %v5992_v7 }
 0x61c   : > { %v1764_v12 = vpop.f32.mrf.mxu0 }
 0x61d   : > { %v1792_v42 = vpack.c.bf16 %v1764_v12, %v1761_v11 }
 0x61e   : > { %v5996_v13 = vpop.f32.mrf.mxu0 }
 0x620   : > { %v1777_v14 = vpop.f32.mrf.mxu0 }
 0x622   : > { %v5997_v15 = vpop.f32.mrf.mxu0 }
 0x623   : > { %v1795_v56 = vpack.c.bf16 %v5997_v15, %v5996_v13 }
 0x624   : > { %v1780_v41 = vpop.f32.mrf.mxu0 }
 0x625   : > { %v1797_v59 = vand.u32 %v1795_v56, %v6764_v4  ;;  %v1794_v62 = vpack.c.bf16 %v1780_v41, %v1777_v14 }
 0x627   : > { %5998 = vmatprep.subr.bf16.mxu1 %v1797_v59 }
 0x628   : > { %5999 = vmatpush3.bf16.msra.mxu1 %v1797_v59 }
 0x629   : > { %6000 = vmatprep.subr.bf16.mxu1 %v1794_v62 }
 0x62c   : > { %6001 = vmatpush3.bf16.msra.mxu1 %v1794_v62 }
 0x62d   : > { %6002 = vmatprep.subr.bf16.mxu1 %v1793_v0 }
 0x630   : > { %6003 = vmatpush3.bf16.msra.mxu1 %v1793_v0 }
 0x631   : > { %6004 = vmatprep.subr.bf16.mxu1 %v1792_v42 }
 0x634   : > { %6005 = vmatpush3.bf16.msra.mxu1 %v1792_v42 }
 0x635   : > { %6014 = vmatprep.subr.bf16.mxu1 %v6876_v36 }
 0x637   : > { %6007 = vmatmul.mubr.msk.bf16.vlgmr.msra.gmra.mxu1 %vm1082_vm3, %v6879_v37 }
 0x638   : > { %6010 = vmatprep.mubr.msk.bf16.mxu1 %vm1082_vm3, %v6882_v38  ;;  %6015 = vmatpush3.bf16.msra.mxu1 %v6876_v36 }
 0x639   : > { %6016 = vmatprep.subr.bf16.mxu1 %v6886_v39 }
 0x63c   : > { %6017 = vmatpush3.bf16.msra.mxu1 %v6886_v39 }
 0x63d   : > { %6018 = vmatprep.subr.bf16.mxu1 %v6895_v44 }
 0x63f   : > { %6011 = vmatmul.mubr.msk.bf16.gmra.mxu1 %vm1082_vm3, %v6898_v45 }
 0x640   : > { %6019 = vmatpush3.bf16.msra.mxu1 %v6895_v44 }
 0x641   : > { %6020 = vmatprep.subr.bf16.mxu1 %v6903_v46 }
 0x644   : > { %6021 = vmatpush3.bf16.msra.mxu1 %v6903_v46 }
 0x645   : > { %6022 = vmatprep.subr.bf16.mxu1 %v6911_v47 }
 0x648   : > { %6023 = vmatpush3.bf16.msra.mxu1 %v6911_v47 }
 0x649   : > { %6024 = vmatprep.subr.bf16.mxu1 %v6916_v48 }
 0x64c   : > { %6025 = vmatpush3.bf16.msra.mxu1 %v6916_v48 }
 0x64d   : > { %6026 = vmatprep.subr.bf16.mxu1 %v6921_v49 }
 0x650   : > { %6027 = vmatpush3.bf16.msra.mxu1 %v6921_v49 }
 0x651   : > { %6028 = vmatprep.subr.bf16.mxu1 %v6926_v50 }
 0x654   : > { %6029 = vmatpush3.bf16.msra.mxu1 %v6926_v50 }
 0x6f7   : > { %v6008_v36 = vpop.f32.mrf.mxu1 }
 0x6f8   : > { %v1842_v39 = vadd.f32 %v6008_v36, %v6931_v54 }
 0x6f9   : > { %v1833_v37 = vpop.f32.mrf.mxu1 }
 0x6fa   : > { %v1834_v38 = vadd.f32 %v6931_v54, %v1833_v37  ;;  %v1866_v1 = vmul.f32 0.999995, %v1842_v39  ;;  %v6435_v39 = vld [vmem:[%s6660_s19 + $0x30] sm:$0xff]  }
 0x6fb   : > { %v6009_v44 = vpop.f32.mrf.mxu1 }
 0x6fc   : > { %v1845_v45 = vadd.f32 %v6009_v44, %v6931_v54  ;;  %v1864_v47 = vmul.f32 0.999995, %v1834_v38  ;;  %v1874_v16 = vmax.f32 %v1866_v1, 0.0  ;;  %v6434_v38 = vld [vmem:[%s6660_s19 + $0x38] sm:$0xff]   ;;  %v6436_v44 = vld [vmem:[%s6660_s19 + $0x28] sm:$0xff]  }
 0x6fd   : > { %v1836_v46 = vpop.f32.mrf.mxu1 }
 0x6fe   : > { %v1867_v48 = vmul.f32 0.999995, %v1845_v45  ;;  %v1837_v9 = vadd.f32 %v6931_v54, %v1836_v46  ;;  %v1872_v50 = vmax.f32 %v1864_v47, 0.0  ;;  %v6437_v45 = vld [vmem:[%s6660_s19 + $0x20] sm:$0xff]   ;;  %v6438_v46 = vld [vmem:[%s6660_s19 + $0x18] sm:$0xff]  }
 0x6ff   : > { %v6012_v49 = vpop.f32.mrf.mxu1  ;;  %v6441_v47 = vld [vmem:[%s6660_s19] sm:$0xff]  }
 0x700   : > { %v1865_v2 = vmul.f32 0.999995, %v1837_v9  ;;  %v1875_v43 = vmax.f32 %v1867_v48, 0.0  ;;  %v1858_v17 = vadd.f32 %v6012_v49, %v6931_v54 }
 0x701   : > { %v1849_v3 = vpop.f32.mrf.mxu1 }
 0x702   : > { %v1873_v5 = vmax.f32 %v1865_v2, 0.0  ;;  %v1850_v6 = vadd.f32 %v6931_v54, %v1849_v3  ;;  %v1881_v30 = vpack.c.bf16 %v1875_v43, %v1874_v16  ;;  %v1870_v61 = vmul.f32 0.999995, %v1858_v17 }
 0x703   : > { %v6013_v19 = vpop.f32.mrf.mxu1 }
 0x704   : > { %v1880_v25 = vpack.c.bf16 %v1873_v5, %v1872_v50  ;;  %v1861_v28 = vadd.f32 %v6013_v19, %v6931_v54  ;;  %v1868_v53 = vmul.f32 0.999995, %v1850_v6  ;;  %v1878_v7 = vmax.f32 %v1870_v61, 0.0 }
 0x705   : > { %v1852_v31 = vpop.f32.mrf.mxu1 }
 0x706   : > { %v1871_v58 = vmul.f32 0.999995, %v1861_v28  ;;  %v1853_v60 = vadd.f32 %v6931_v54, %v1852_v31  ;;  %6030 = vmatprep.mubr.bf16.mxu1 %v1880_v25  ;;  %v1876_v63 = vmax.f32 %v1868_v53, 0.0 }
 0x707   : > { %6031 = vmatmul.mubr.bf16.vlgmr.msra.gmra.mxu1 %v1881_v30 }
 0x708   : > { %v1869_v18 = vmul.f32 0.999995, %v1853_v60  ;;  %v1879_v55 = vmax.f32 %v1871_v58, 0.0 }
 0x70a   : > { %v1877_v32 = vmax.f32 %v1869_v18, 0.0  ;;  %v1883_v10 = vpack.c.bf16 %v1879_v55, %v1878_v7 }
 0x70c   : > { %v1882_v11 = vpack.c.bf16 %v1877_v32, %v1876_v63 }
 0x70e   : > { %6034 = vmatprep.mubr.bf16.mxu1 %v1882_v11 }
 0x70f   : > { %6035 = vmatmul.mubr.bf16.gmra.mxu1 %v1883_v10 }
 0x7c7   : > { %v6032_v12 = vpop.f32.mrf.mxu1 }
 0x7c9   : > { %v1918_v13 = vpop.f32.mrf.mxu1 }
 0x7cb   : > { %v6033_v14 = vpop.f32.mrf.mxu1 }
 0x7cc   : > { %v1950_v36 = vpack.c.bf16 %v6033_v14, %v6032_v12 }
 0x7cd   : > { %v1921_v15 = vpop.f32.mrf.mxu1 }
 0x7ce   : > { %v1949_v37 = vpack.c.bf16 %v1921_v15, %v1918_v13 }
 0x7cf   : > { %v6036_v56 = vpop.f32.mrf.mxu1 }
 0x7d1   : > { %v1934_v41 = vpop.f32.mrf.mxu1 }
 0x7d3   : > { %v6037_v54 = vpop.f32.mrf.mxu1 }
 0x7d4   : > { %v1952_v59 = vpack.c.bf16 %v6037_v54, %v6036_v56 }
 0x7d5   : > { %v1937_v62 = vpop.f32.mrf.mxu1 }
 0x7d6   : > { %v1954_v0 = vand.u32 %v1952_v59, %v6764_v4  ;;  %v1951_v42 = vpack.c.bf16 %v1937_v62, %v1934_v41 }
 0x7d8   : > { %6038 = vmatprep.subr.bf16.mxu0 %v1954_v0 }
 0x7d9   : > { %6039 = vmatpush3.bf16.msra.mxu0 %v1954_v0 }
 0x7da   : > { %6040 = vmatprep.subr.bf16.mxu0 %v1951_v42 }
 0x7dd   : > { %6041 = vmatpush3.bf16.msra.mxu0 %v1951_v42 }
 0x7de   : > { %6042 = vmatprep.subr.bf16.mxu0 %v1950_v36 }
 0x7e1   : > { %6043 = vmatpush3.bf16.msra.mxu0 %v1950_v36 }
 0x7e2   : > { %6044 = vmatprep.subr.bf16.mxu0 %v1949_v37 }
 0x7e5   : > { %6045 = vmatpush3.bf16.msra.mxu0 %v1949_v37 }
 0x7e6   : > { %6054 = vmatprep.subr.bf16.mxu0 %v6434_v38 }
 0x7e8   : > { %6047 = vmatmul.mubr.msk.bf16.vlgmr.msra.gmra.mxu0 %vm1082_vm3, %v6950_v33  ;;  %v6439_v33 = vld [vmem:[%s6660_s19 + $0x10] sm:$0xff]  }
 0x7e9   : > { %6050 = vmatprep.mubr.msk.bf16.mxu0 %vm1082_vm3, %v6953_v34  ;;  %6055 = vmatpush3.bf16.msra.mxu0 %v6434_v38  ;;  %v6440_v34 = vld [vmem:[%s6660_s19 + $0x8] sm:$0xff]  }
 0x7ea   : > { %6056 = vmatprep.subr.bf16.mxu0 %v6435_v39 }
 0x7ed   : > { %6057 = vmatpush3.bf16.msra.mxu0 %v6435_v39  ;;  %v6442_v39 = vld [vmem:[%s6665_s24] sm:$0xff]  }
 0x7ee   : > { %6058 = vmatprep.subr.bf16.mxu0 %v6436_v44  ;;  %6086 = vmatprep.mubr.msk.bf16.mxu1 %vm1082_vm3, %v6442_v39 }
 0x7f0   : > { %6051 = vmatmul.mubr.msk.bf16.gmra.mxu0 %vm1082_vm3, %v6963_v35 }
 0x7f1   : > { %6059 = vmatpush3.bf16.msra.mxu0 %v6436_v44 }
 0x7f2   : > { %6060 = vmatprep.subr.bf16.mxu0 %v6437_v45 }
 0x7f5   : > { %6061 = vmatpush3.bf16.msra.mxu0 %v6437_v45 }
 0x7f6   : > { %6062 = vmatprep.subr.bf16.mxu0 %v6438_v46 }
 0x7f9   : > { %6063 = vmatpush3.bf16.msra.mxu0 %v6438_v46 }
 0x7fa   : > { %6064 = vmatprep.subr.bf16.mxu0 %v6439_v33 }
 0x7fd   : > { %6065 = vmatpush3.bf16.msra.mxu0 %v6439_v33 }
 0x7fe   : > { %6066 = vmatprep.subr.bf16.mxu0 %v6440_v34 }
 0x801   : > { %6067 = vmatpush3.bf16.msra.mxu0 %v6440_v34 }
 0x802   : > { %6068 = vmatprep.subr.bf16.mxu0 %v6441_v47 }
 0x805   : > { %6069 = vmatpush3.bf16.msra.mxu0 %v6441_v47 }
 0x8a8   : > { %v6048_v48 = vpop.f32.mrf.mxu0 }
 0x8a9   : > { %v1999_v9 = vadd.f32 %v6048_v48, %v6981_v20 }
 0x8aa   : > { %v1990_v1 = vpop.f32.mrf.mxu0 }
 0x8ab   : > { %v1991_v35 = vadd.f32 %v6981_v20, %v1990_v1  ;;  %v2023_v3 = vmul.f32 0.999995, %v1999_v9 }
 0x8ac   : > { %v6049_v49 = vpop.f32.mrf.mxu0 }
 0x8ad   : > { %v2021_v2 = vmul.f32 0.999995, %v1991_v35  ;;  %v2002_v43 = vadd.f32 %v6049_v49, %v6981_v20  ;;  %v2031_v28 = vmax.f32 %v2023_v3, 0.0  ;;  %v6444_v3 = vld [vmem:[%s6675_s6 + $0x38] sm:$0xff]  }
 0x8ae   : > { %v1993_v50 = vpop.f32.mrf.mxu0 }
 0x8af   : > { %v2024_v5 = vmul.f32 0.999995, %v2002_v43  ;;  %v1994_v6 = vadd.f32 %v6981_v20, %v1993_v50  ;;  %v2029_v17 = vmax.f32 %v2021_v2, 0.0  ;;  %v2039_v32 = vadd.f32 %v2031_v28, %v7003_v29  ;;  %v6443_v50 = vld [vmem:[%s6665_s24 + $0x8] sm:$0xff]   ;;  %v6451_v28 = vld [vmem:[%s6675_s6 + $0x10] sm:$0xff]  }
 0x8b0   : > { %v6052_v16 = vpop.f32.mrf.mxu0 }
 0x8b1   : > { %v2032_v19 = vmax.f32 %v2024_v5, 0.0  ;;  %v2022_v25 = vmul.f32 0.999995, %v1994_v6  ;;  %v2015_v30 = vadd.f32 %v6052_v16, %v6981_v20  ;;  %v2037_v18 = vadd.f32 %v2029_v17, %v6995_v26  ;;  %v6446_v5 = vld [vmem:[%s6665_s24 + $0x10] sm:$0xff]   ;;  %v6448_v16 = vld [vmem:[%s6675_s6 + $0x28] sm:$0xff]  }
 0x8b2   : > { %v2006_v31 = vpop.f32.mrf.mxu0  ;;  %v6445_v6 = vld [vmem:[%s6675_s6 + $0x30] sm:$0xff]   ;;  %v6447_v17 = vld [vmem:[%s6665_s24 + $0x18] sm:$0x1f]  }
 0x8b3   : > { %v2030_v53 = vmax.f32 %v2022_v25, 0.0  ;;  %v2007_v58 = vadd.f32 %v6981_v20, %v2006_v31  ;;  %v2040_v60 = vadd.f32 %v2032_v19, %v6991_v24  ;;  %v2027_v7 = vmul.f32 0.999995, %v2015_v30  ;;  %v6449_v19 = vld [vmem:[%s6675_s6 + $0x20] sm:$0xff]   ;;  %v6450_v25 = vld [vmem:[%s6675_s6 + $0x18] sm:$0xff]   ;;  %v6452_v30 = vld [vmem:[%s6675_s6 + $0x8] sm:$0xff]  }
 0x8b4   : > { %v6053_v61 = vpop.f32.mrf.mxu0  ;;  %v6453_v31 = vld [vmem:[%s6675_s6] sm:$0xff]  }
 0x8b5   : > { %v2038_v55 = vadd.f32 %v2030_v53, %v6999_v27  ;;  %v2025_v63 = vmul.f32 0.999995, %v2007_v58  ;;  %v2018_v11 = vadd.f32 %v6053_v61, %v6981_v20  ;;  %v7103_v14 = vpack.c.bf16 %v2040_v60, %v2039_v32  ;;  %v6454_v53 = vld [vmem:[%s8057_s12] sm:$0xff]  }
 0x8b6   : > { %v2009_v10 = vpop.f32.mrf.mxu0  ;;  %v2035_v54 = vmax.f32 %v2027_v7, 0.0  ;;  %v5485_v58 = vld [vmem:[%s8058_s16] ss:$0 sm:$0xff]  ;;  %s8066_s16 = sld [smem:[#allocation12_spill]] }
 0x8b7   : > { %v2010_v12 = vadd.f32 %v6981_v20, %v2009_v10  ;;  %v2045_v13 = vpack.c.bf16 %v2038_v55, %v2037_v18  ;;  %v2028_v15 = vmul.f32 0.999995, %v2018_v11  ;;  %v2033_v56 = vmax.f32 %v2025_v63, 0.0 }
 0x8b8   : > { %v2043_v20 = vadd.f32 %v2035_v54, %v7031_v40 }
 0x8b9   : > { %v2026_v41 = vmul.f32 0.999995, %v2010_v12  ;;  %6070 = vmatprep.mubr.bf16.mxu0 %v2045_v13  ;;  %v2036_v59 = vmax.f32 %v2028_v15, 0.0  ;;  %v2041_v42 = vadd.f32 %v2033_v56, %v7023_v22 }
 0x8ba   : > { %6071 = vmatmul.mubr.bf16.vlgmr.msra.gmra.mxu0 %v7103_v14 }
 0x8bb   : > { %v2034_v62 = vmax.f32 %v2026_v41, 0.0  ;;  %v2044_v0 = vadd.f32 %v2036_v59, %v7019_v21 }
 0x8bd   : > { %v2042_v36 = vadd.f32 %v2034_v62, %v7027_v23  ;;  %v2048_v38 = vpack.c.bf16 %v2044_v0, %v2043_v20 }
 0x8bf   : > { %v2047_v37 = vpack.c.bf16 %v2042_v36, %v2041_v42 }
 0x8c1   : > { %6074 = vmatprep.mubr.bf16.mxu0 %v2047_v37 }
 0x8c2   : > { %6075 = vmatmul.mubr.bf16.gmra.mxu0 %v2048_v38 }
 0x8c3   : > { %6126 = vmatprep.mubr.msk.bf16.mxu0 %vm1082_vm3, %v6454_v53 }
 0x97a   : > { %v6072_v44 = vpop.f32.mrf.mxu0 }
 0x97c   : > { %v2147_v45 = vpop.f32.mrf.mxu0 }
 0x97e   : > { %v6073_v46 = vpop.f32.mrf.mxu0 }
 0x97f   : > { %v2187_v2 = vpack.c.bf16 %v6073_v46, %v6072_v44 }
 0x980   : > { %v2150_v33 = vpop.f32.mrf.mxu0 }
 0x981   : > { %v2186_v43 = vpack.c.bf16 %v2150_v33, %v2147_v45 }
 0x982   : > { %v6076_v34 = vpop.f32.mrf.mxu0 }
 0x984   : > { %v2163_v47 = vpop.f32.mrf.mxu0 }
 0x986   : > { %v6077_v48 = vpop.f32.mrf.mxu0 }
 0x987   : > { %v2189_v9 = vpack.c.bf16 %v6077_v48, %v6076_v34  ;;  %v6456_v34 = vld [vmem:[%s6630_s21 + $0x38] sm:$0xff]   ;;  %v6458_v48 = vld [vmem:[%s8057_s12 + $0x10] sm:$0xff]  }
 0x988   : > { %v2166_v1 = vpop.f32.mrf.mxu0 }
 0x989   : > { %v2230_v35 = vand.u32 %v2189_v9, %v6764_v4  ;;  %v2188_v49 = vpack.c.bf16 %v2166_v1, %v2163_v47  ;;  %v6455_v47 = vld [vmem:[%s8057_s12 + $0x8] sm:$0xff]   ;;  %v6457_v9 = vld [vmem:[%s6630_s21 + $0x30] sm:$0xff]  }
 0x98a   : > { %v6460_v1 = vld [vmem:[%s6630_s21 + $0x28] sm:$0xff]  }
 0x98b   : > { %6078 = vmatprep.subr.bf16.mxu1 %v2230_v35 }
 0x98c   : > { %6079 = vmatpush3.bf16.msra.mxu1 %v2230_v35  ;;  %v6459_v35 = vld [vmem:[%s8057_s12 + $0x18] sm:$0x1f]  }
 0x98d   : > { %6080 = vmatprep.subr.bf16.mxu1 %v2188_v49 }
 0x990   : > { %6081 = vmatpush3.bf16.msra.mxu1 %v2188_v49  ;;  %v6461_v49 = vld [vmem:[%s6630_s21 + $0x20] sm:$0xff]  }
 0x991   : > { %6082 = vmatprep.subr.bf16.mxu1 %v2187_v2 }
 0x994   : > { %6083 = vmatpush3.bf16.msra.mxu1 %v2187_v2  ;;  %v6462_v2 = vld [vmem:[%s6630_s21 + $0x18] sm:$0xff]  }
 0x995   : > { %6084 = vmatprep.subr.bf16.mxu1 %v2186_v43 }
 0x998   : > { %6085 = vmatpush3.bf16.msra.mxu1 %v2186_v43  ;;  %v6463_v43 = vld [vmem:[%s6630_s21 + $0x10] sm:$0xff]  }
 0x999   : > { %6094 = vmatprep.subr.bf16.mxu1 %v6444_v3 }
 0x99b   : > { %6087 = vmatmul.mubr.msk.bf16.vlgmr.msra.gmra.mxu1 %vm1082_vm3, %v6443_v50  ;;  %v6465_v50 = vld [vmem:[%s6630_s21] sm:$0xff]  }
 0x99c   : > { %6095 = vmatpush3.bf16.msra.mxu1 %v6444_v3  ;;  %6090 = vmatprep.mubr.msk.bf16.mxu1 %vm1082_vm3, %v6446_v5  ;;  %v6464_v3 = vld [vmem:[%s6630_s21 + $0x8] sm:$0xff]   ;;  %v5502_v5 = vld [vmem:[#allocation2] ss:$0 sm:$0xff] }
 0x99d   : > { %6096 = vmatprep.subr.bf16.mxu1 %v6445_v6 }
 0x9a0   : > { %6097 = vmatpush3.bf16.msra.mxu1 %v6445_v6 }
 0x9a1   : > { %6098 = vmatprep.subr.bf16.mxu1 %v6448_v16 }
 0x9a3   : > { %6091 = vmatmul.mubr.msk.bf16.gmra.mxu1 %vm1082_vm3, %v6447_v17 }
 0x9a4   : > { %6099 = vmatpush3.bf16.msra.mxu1 %v6448_v16  ;;  %6110 = vmatprep.mubr.bf16.mxu1 %v2045_v13 }
 0x9a5   : > { %6100 = vmatprep.subr.bf16.mxu1 %v6449_v19 }
 0x9a8   : > { %6101 = vmatpush3.bf16.msra.mxu1 %v6449_v19 }
 0x9a9   : > { %6102 = vmatprep.subr.bf16.mxu1 %v6450_v25 }
 0x9ac   : > { %6103 = vmatpush3.bf16.msra.mxu1 %v6450_v25 }
 0x9ad   : > { %6104 = vmatprep.subr.bf16.mxu1 %v6451_v28 }
 0x9b0   : > { %6105 = vmatpush3.bf16.msra.mxu1 %v6451_v28 }
 0x9b1   : > { %6106 = vmatprep.subr.bf16.mxu1 %v6452_v30 }
 0x9b4   : > { %6107 = vmatpush3.bf16.msra.mxu1 %v6452_v30 }
 0x9b5   : > { %6108 = vmatprep.subr.bf16.mxu1 %v6453_v31 }
 0x9b8   : > { %6109 = vmatpush3.bf16.msra.mxu1 %v6453_v31 }
 0x9bb   : > { %6111 = vmatmul.mubr.bf16.vlgmr.msra.gmra.mxu1 %v7103_v14 }
 0x9bc   : > { %6114 = vmatprep.mubr.bf16.mxu1 %v2047_v37 }
 0x9c3   : > { %6115 = vmatmul.mubr.bf16.gmra.mxu1 %v2048_v38 }
 0xa5b   : > { %v6088_v60 = vpop.f32.mrf.mxu1 }
 0xa5c   : > { %v2275_v61 = vadd.f32 %v6088_v60, %v5485_v58 }
 0xa5d   : > { %v2266_v18 = vpop.f32.mrf.mxu1 }
 0xa5e   : > { %2299 = vst.msk [vmem:[%s919_s18 + $0x10] sm:$0xff] %vm958_vm2, %v2275_v61  ;;  %v2267_v55 = vadd.f32 %v5485_v58, %v2266_v18 }
 0xa5f   : > { %v6089_v63 = vpop.f32.mrf.mxu1 }
 0xa60   : > { %2297 = vst.msk [vmem:[%s919_s18] sm:$0xff] %vm958_vm2, %v2267_v55  ;;  %v2278_v32 = vadd.f32 %v6089_v63, %v5485_v58 }
 0xa61   : > { %v2269_v7 = vpop.f32.mrf.mxu1 }
 0xa62   : > { %2300 = vst.msk [vmem:[%s919_s18 + $0x18] sm:$0xff] %vm958_vm2, %v2278_v32  ;;  %v2270_v11 = vadd.f32 %v5485_v58, %v2269_v7 }
 0xa63   : > { %v6092_v10 = vpop.f32.mrf.mxu1 }
 0xa64   : > { %2298 = vst.msk [vmem:[%s919_s18 + $0x8] sm:$0xff] %vm958_vm2, %v2270_v11  ;;  %v2291_v12 = vadd.f32 %v6092_v10, %v5485_v58 }
 0xa65   : > { %v2282_v13 = vpop.f32.mrf.mxu1 }
 0xa66   : > { %2303 = vst.msk [vmem:[%s919_s18 + $0x30] sm:$0xff] %vm958_vm2, %v2291_v12  ;;  %v2283_v14 = vadd.f32 %v5485_v58, %v2282_v13 }
 0xa67   : > { %v6093_v15 = vpop.f32.mrf.mxu1 }
 0xa68   : > { %2301 = vst.msk [vmem:[%s919_s18 + $0x20] sm:$0xff] %vm958_vm2, %v2283_v14  ;;  %v2294_v56 = vadd.f32 %v6093_v15, %v5485_v58 }
 0xa69   : > { %v2285_v41 = vpop.f32.mrf.mxu1 }
 0xa6a   : > { %2305 = vst.msk [vmem:[%s919_s18 + $0x38] sm:$0x1] %vm2304_vm4, %v2294_v56  ;;  %v2286_v54 = vadd.f32 %v5485_v58, %v2285_v41 }
 0xa6c   : > { %2302 = vst.msk [vmem:[%s919_s18 + $0x28] sm:$0xff] %vm958_vm2, %v2286_v54  ;;  %s8067_s18 = sld [smem:[#allocation13_spill]] }
 0xa7b   : > { %v6112_v59 = vpop.f32.mrf.mxu1 }
 0xa7d   : > { %v2404_v62 = vpop.f32.mrf.mxu1 }
 0xa7f   : > { %v6113_v0 = vpop.f32.mrf.mxu1 }
 0xa80   : > { %v2444_v46 = vpack.c.bf16 %v6113_v0, %v6112_v59 }
 0xa81   : > { %v2407_v42 = vpop.f32.mrf.mxu1 }
 0xa82   : > { %v2443_v33 = vpack.c.bf16 %v2407_v42, %v2404_v62 }
 0xa83   : > { %v6116_v36 = vpop.f32.mrf.mxu1 }
 0xa85   : > { %v2420_v20 = vpop.f32.mrf.mxu1 }
 0xa87   : > { %v6117_v37 = vpop.f32.mrf.mxu1 }
 0xa88   : > { %v2446_v38 = vpack.c.bf16 %v6117_v37, %v6116_v36 }
 0xa89   : > { %v2423_v39 = vpop.f32.mrf.mxu1 }
 0xa8a   : > { %v2487_v44 = vand.u32 %v2446_v38, %v6764_v4  ;;  %v2445_v45 = vpack.c.bf16 %v2423_v39, %v2420_v20 }
 0xa8c   : > { %6118 = vmatprep.subr.bf16.mxu0 %v2487_v44 }
 0xa8d   : > { %6119 = vmatpush3.bf16.msra.mxu0 %v2487_v44 }
 0xa8e   : > { %6120 = vmatprep.subr.bf16.mxu0 %v2445_v45 }
 0xa91   : > { %6121 = vmatpush3.bf16.msra.mxu0 %v2445_v45 }
 0xa92   : > { %6122 = vmatprep.subr.bf16.mxu0 %v2444_v46 }
 0xa95   : > { %6123 = vmatpush3.bf16.msra.mxu0 %v2444_v46 }
 0xa96   : > { %6124 = vmatprep.subr.bf16.mxu0 %v2443_v33 }
 0xa99   : > { %6125 = vmatpush3.bf16.msra.mxu0 %v2443_v33 }
 0xa9a   : > { %6134 = vmatprep.subr.bf16.mxu0 %v6456_v34 }
 0xa9c   : > { %6127 = vmatmul.mubr.msk.bf16.vlgmr.msra.gmra.mxu0 %vm1082_vm3, %v6455_v47 }
 0xa9d   : > { %6135 = vmatpush3.bf16.msra.mxu0 %v6456_v34  ;;  %6130 = vmatprep.mubr.msk.bf16.mxu0 %vm1082_vm3, %v6458_v48 }
 0xa9e   : > { %6136 = vmatprep.subr.bf16.mxu0 %v6457_v9 }
 0xaa1   : > { %6137 = vmatpush3.bf16.msra.mxu0 %v6457_v9 }
 0xaa2   : > { %6138 = vmatprep.subr.bf16.mxu0 %v6460_v1 }
 0xaa4   : > { %6131 = vmatmul.mubr.msk.bf16.gmra.mxu0 %vm1082_vm3, %v6459_v35 }
 0xaa5   : > { %6139 = vmatpush3.bf16.msra.mxu0 %v6460_v1  ;;  %6150 = vmatprep.mubr.bf16.mxu0 %v7009_v52  ;;  %v6466_v52 = vld [vmem:[%s6635_s25] sm:$0xff]  }
 0xaa6   : > { %6140 = vmatprep.subr.bf16.mxu0 %v6461_v49  ;;  %6166 = vmatprep.mubr.msk.bf16.mxu1 %vm1082_vm3, %v6466_v52 }
 0xaa9   : > { %6141 = vmatpush3.bf16.msra.mxu0 %v6461_v49 }
 0xaaa   : > { %6142 = vmatprep.subr.bf16.mxu0 %v6462_v2 }
 0xaad   : > { %6143 = vmatpush3.bf16.msra.mxu0 %v6462_v2 }
 0xaae   : > { %6144 = vmatprep.subr.bf16.mxu0 %v6463_v43 }
 0xab1   : > { %6145 = vmatpush3.bf16.msra.mxu0 %v6463_v43 }
 0xab2   : > { %6146 = vmatprep.subr.bf16.mxu0 %v6464_v3 }
 0xab5   : > { %6147 = vmatpush3.bf16.msra.mxu0 %v6464_v3 }
 0xab6   : > { %6148 = vmatprep.subr.bf16.mxu0 %v6465_v50 }
 0xab9   : > { %6149 = vmatpush3.bf16.msra.mxu0 %v6465_v50 }
 0xabc   : > { %6151 = vmatmul.mubr.bf16.vlgmr.msra.gmra.mxu0 %v7013_v57 }
 0xabd   : > { %6154 = vmatprep.mubr.bf16.mxu0 %v7035_v51 }
 0xac4   : > { %6155 = vmatmul.mubr.bf16.gmra.mxu0 %v7039_v8 }
 0xb5c   : > { %v6128_v6 = vpop.f32.mrf.mxu0 }
 0xb5d   : > { %v2532_v16 = vadd.f32 %v6128_v6, %v5502_v5 }
 0xb5e   : > { %v2523_v17 = vpop.f32.mrf.mxu0 }
 0xb5f   : > { %v2556_v19 = vsub.f32 0.0, %v2532_v16  ;;  %v2524_v25 = vadd.f32 %v5502_v5, %v2523_v17 }
 0xb60   : > { %v6129_v28 = vpop.f32.mrf.mxu0 }
 0xb61   : > { %v2566_v30 = vmul.f32 1.442695, %v2556_v19  ;;  %v2554_v31 = vsub.f32 0.0, %v2524_v25  ;;  %v2535_v53 = vadd.f32 %v6129_v28, %v5502_v5 }
 0xb62   : > { %v2526_v58 = vpop.f32.mrf.mxu0 }
 0xb63   : > { %6526 = vpow2.f32 %v2566_v30  ;;  %v2562_v57 = vmul.f32 1.442695, %v2554_v31  ;;  %v2557_v60 = vsub.f32 0.0, %v2535_v53  ;;  %v2527_v51 = vadd.f32 %v5502_v5, %v2526_v58 }
 0xb64   : > { %v6132_v61 = vpop.f32.mrf.mxu0 }
 0xb65   : > { %6528 = vpow2.f32 %v2562_v57  ;;  %v2568_v8 = vmul.f32 1.442695, %v2557_v60  ;;  %v2555_v18 = vsub.f32 0.0, %v2527_v51  ;;  %v2548_v55 = vadd.f32 %v6132_v61, %v5502_v5 }
 0xb66   : > { %v2539_v63 = vpop.f32.mrf.mxu0 }
 0xb67   : > { %6530 = vpow2.f32 %v2568_v8  ;;  %v2564_v32 = vmul.f32 1.442695, %v2555_v18  ;;  %v2560_v7 = vsub.f32 0.0, %v2548_v55  ;;  %v2540_v11 = vadd.f32 %v5502_v5, %v2539_v63  ;;  %v6470_v8 = vld [vmem:[%s6645_s3 + $0x38] sm:$0xff]   ;;  %v6467_v18 = vld [vmem:[%s6635_s25 + $0x8] sm:$0xff]   ;;  %v6468_v55 = vld [vmem:[%s6635_s25 + $0x10] sm:$0xff]  }
 0xb68   : > { %v6133_v10 = vpop.f32.mrf.mxu0  ;;  %v6471_v63 = vld [vmem:[%s6645_s3 + $0x30] sm:$0xff]  }
 0xb69   : > { %6532 = vpow2.f32 %v2564_v32  ;;  %v2574_v12 = vmul.f32 1.442695, %v2560_v7  ;;  %v2558_v13 = vsub.f32 0.0, %v2540_v11  ;;  %v2551_v14 = vadd.f32 %v6133_v10, %v5502_v5  ;;  %v6472_v32 = vld [vmem:[%s6645_s3 + $0x28] sm:$0xff]   ;;  %v6469_v7 = vld [vmem:[%s6635_s25 + $0x18] sm:$0x1f]  }
 0xb6a   : > { %v2542_v15 = vpop.f32.mrf.mxu0  ;;  %v6473_v11 = vld [vmem:[%s6645_s3 + $0x20] sm:$0xff]   ;;  %v6474_v10 = vld [vmem:[%s6645_s3 + $0x18] sm:$0xff]  }
 0xb6b   : > { %6534 = vpow2.f32 %v2574_v12  ;;  %v2570_v56 = vmul.f32 1.442695, %v2558_v13  ;;  %v2561_v41 = vsub.f32 0.0, %v2551_v14  ;;  %v2543_v54 = vadd.f32 %v5502_v5, %v2542_v15  ;;  %v6475_v12 = vld [vmem:[%s6645_s3 + $0x10] sm:$0xff]   ;;  %v6476_v13 = vld [vmem:[%s6645_s3 + $0x8] sm:$0xff]   ;;  %v6477_v14 = vld [vmem:[%s6645_s3] sm:$0xff]  }
 0xb6d   : > { %6536 = vpow2.f32 %v2570_v56  ;;  %v2576_v59 = vmul.f32 1.442695, %v2561_v41  ;;  %v2559_v62 = vsub.f32 0.0, %v2543_v54  ;;  %v5519_v56 = vld [vmem:[%s6640_s29] ss:$0 sm:$0xff] }
 0xb6f   : > { %6538 = vpow2.f32 %v2576_v59  ;;  %v2572_v0 = vmul.f32 1.442695, %v2559_v62 }
 0xb70   : > { %v6527_v42 = vpop.eup %6526 }
 0xb71   : > { %v2580_v36 = vadd.f32 1.0, %v6527_v42  ;;  %6540 = vpow2.f32 %v2572_v0 }
 0xb72   : > { %v6529_v20 = vpop.eup %6528 }
 0xb73   : > { %6542 = vrcp.f32 %v2580_v36  ;;  %v2578_v37 = vadd.f32 1.0, %v6529_v20 }
 0xb74   : > { %v6531_v38 = vpop.eup %6530 }
 0xb75   : > { %6544 = vrcp.f32 %v2578_v37  ;;  %v2581_v39 = vadd.f32 1.0, %v6531_v38 }
 0xb76   : > { %v6533_v44 = vpop.eup %6532 }
 0xb77   : > { %6546 = vrcp.f32 %v2581_v39  ;;  %v2579_v45 = vadd.f32 1.0, %v6533_v44 }
 0xb78   : > { %v6535_v46 = vpop.eup %6534 }
 0xb79   : > { %6548 = vrcp.f32 %v2579_v45  ;;  %v2584_v33 = vadd.f32 1.0, %v6535_v46 }
 0xb7a   : > { %v6537_v34 = vpop.eup %6536 }
 0xb7b   : > { %6550 = vrcp.f32 %v2584_v33  ;;  %v2582_v47 = vadd.f32 1.0, %v6537_v34 }
 0xb7c   : > { %v6539_v48 = vpop.eup %6538  ;;  %v6152_v9 = vpop.f32.mrf.mxu0 }
 0xb7d   : > { %6552 = vrcp.f32 %v2582_v47  ;;  %v2585_v1 = vadd.f32 1.0, %v6539_v48 }
 0xb7e   : > { %v6541_v35 = vpop.eup %6540  ;;  %v2710_v49 = vpop.f32.mrf.mxu0 }
 0xb7f   : > { %6554 = vrcp.f32 %v2585_v1  ;;  %v2583_v2 = vadd.f32 1.0, %v6541_v35 }
 0xb80   : > { %v6543_v43 = vpop.eup %6542  ;;  %v6153_v3 = vpop.f32.mrf.mxu0 }
 0xb81   : > { %6556 = vrcp.f32 %v2583_v2  ;;  %2605 = vst.msk [vmem:[%s7164_s27 + $0x10] sm:$0xff] %vm2602_vm5, %v6543_v43  ;;  %v2750_v51 = vpack.c.bf16 %v6153_v3, %v6152_v9 }
 0xb82   : > { %v6545_v50 = vpop.eup %6544  ;;  %v2713_v52 = vpop.f32.mrf.mxu0 }
 0xb83   : > { %2603 = vst.msk [vmem:[%s7164_s27] sm:$0xff] %vm2602_vm5, %v6545_v50  ;;  %v2749_v61 = vpack.c.bf16 %v2713_v52, %v2710_v49 }
 0xb84   : > { %v6547_v5 = vpop.eup %6546  ;;  %v6156_v6 = vpop.f32.mrf.mxu0 }
 0xb85   : > { %2606 = vst.msk [vmem:[%s7164_s27 + $0x18] sm:$0xff] %vm2602_vm5, %v6547_v5 }
 0xb86   : > { %v6549_v16 = vpop.eup %6548  ;;  %v2726_v17 = vpop.f32.mrf.mxu0 }
 0xb87   : > { %2604 = vst.msk [vmem:[%s7164_s27 + $0x8] sm:$0xff] %vm2602_vm5, %v6549_v16 }
 0xb88   : > { %v6551_v19 = vpop.eup %6550  ;;  %v6157_v25 = vpop.f32.mrf.mxu0 }
 0xb89   : > { %v2752_v28 = vpack.c.bf16 %v6157_v25, %v6156_v6  ;;  %2609 = vst.msk [vmem:[%s7164_s27 + $0x30] sm:$0xff] %vm2602_vm5, %v6551_v19 }
 0xb8a   : > { %v6553_v30 = vpop.eup %6552  ;;  %v2729_v31 = vpop.f32.mrf.mxu0 }
 0xb8b   : > { %v2793_v53 = vand.u32 %v2752_v28, %v6764_v4  ;;  %2607 = vst.msk [vmem:[%s7164_s27 + $0x20] sm:$0xff] %vm2602_vm5, %v6553_v30  ;;  %v2751_v57 = vpack.c.bf16 %v2729_v31, %v2726_v17  ;;  %v6478_v31 = vld [vmem:[%s6650_s8] sm:$0xff]  }
 0xb8c   : > { %v6555_v58 = vpop.eup %6554  ;;  %6206 = vmatprep.mubr.msk.bf16.mxu0 %vm1082_vm3, %v6478_v31 }
 0xb8d   : > { %2611 = vst.msk [vmem:[%s7164_s27 + $0x38] sm:$0x1] %vm2610_vm6, %v6555_v58  ;;  %6158 = vmatprep.subr.bf16.mxu1 %v2793_v53  ;;  %v6485_v58 = vld [vmem:[%s8059_s23 + $0x30] sm:$0xff]   ;;  %vm5206_vm6 = vcmask 1046534  }
 0xb8e   : > { %v6557_v60 = vpop.eup %6556  ;;  %6159 = vmatpush3.bf16.msra.mxu1 %v2793_v53  ;;  %v6483_v53 = vld [vmem:[%s8059_s23 + $0x38] sm:$0xff]  }
 0xb8f   : > { %6160 = vmatprep.subr.bf16.mxu1 %v2751_v57  ;;  %2608 = vst.msk [vmem:[%s7164_s27 + $0x28] sm:$0xff] %vm2602_vm5, %v6557_v60  ;;  %v6489_v60 = vld [vmem:[%s8059_s23 + $0x20] sm:$0xff]   ;;  %s5615_s27 = sshll.u32 %s8069_s10, 4 }
 0xb92   : > { %6161 = vmatpush3.bf16.msra.mxu1 %v2751_v57  ;;  %v6487_v57 = vld [vmem:[%s8059_s23 + $0x28] sm:$0xff]  }
 0xb93   : > { %6162 = vmatprep.subr.bf16.mxu1 %v2750_v51 }
 0xb96   : > { %6163 = vmatpush3.bf16.msra.mxu1 %v2750_v51 }
 0xb97   : > { %6164 = vmatprep.subr.bf16.mxu1 %v2749_v61 }
 0xb9a   : > { %6165 = vmatpush3.bf16.msra.mxu1 %v2749_v61 }
 0xb9b   : > { %6174 = vmatprep.subr.bf16.mxu1 %v6470_v8 }
 0xb9d   : > { %6167 = vmatmul.mubr.msk.bf16.vlgmr.msra.gmra.mxu1 %vm1082_vm3, %v6467_v18 }
 0xb9e   : > { %6170 = vmatprep.mubr.msk.bf16.mxu1 %vm1082_vm3, %v6468_v55  ;;  %6175 = vmatpush3.bf16.msra.mxu1 %v6470_v8 }
 0xb9f   : > { %6176 = vmatprep.subr.bf16.mxu1 %v6471_v63 }
 0xba2   : > { %6177 = vmatpush3.bf16.msra.mxu1 %v6471_v63 }
 0xba3   : > { %6178 = vmatprep.subr.bf16.mxu1 %v6472_v32 }
 0xba5   : > { %6171 = vmatmul.mubr.msk.bf16.gmra.mxu1 %vm1082_vm3, %v6469_v7 }
 0xba6   : > { %6179 = vmatpush3.bf16.msra.mxu1 %v6472_v32 }
 0xba7   : > { %6180 = vmatprep.subr.bf16.mxu1 %v6473_v11 }
 0xbaa   : > { %6181 = vmatpush3.bf16.msra.mxu1 %v6473_v11 }
 0xbab   : > { %6182 = vmatprep.subr.bf16.mxu1 %v6474_v10 }
 0xbae   : > { %6183 = vmatpush3.bf16.msra.mxu1 %v6474_v10 }
 0xbaf   : > { %6184 = vmatprep.subr.bf16.mxu1 %v6475_v12 }
 0xbb2   : > { %6185 = vmatpush3.bf16.msra.mxu1 %v6475_v12 }
 0xbb3   : > { %6186 = vmatprep.subr.bf16.mxu1 %v6476_v13 }
 0xbb6   : > { %6187 = vmatpush3.bf16.msra.mxu1 %v6476_v13 }
 0xbb7   : > { %6188 = vmatprep.subr.bf16.mxu1 %v6477_v14 }
 0xbba   : > { %6189 = vmatpush3.bf16.msra.mxu1 %v6477_v14 }
 0xbbb   : > { %6238 = vmatprep.subr.bf16.mxu1 %v6483_v53 }
 0xc5d   : > { %v6168_v15 = vpop.f32.mrf.mxu1 }
 0xc5e   : > { %v2838_v59 = vadd.f32 %v6168_v15, %v5519_v56  ;;  %v6482_v15 = vld [vmem:[%s8060_s26 + $0x38] sm:$0xff]  }
 0xc5f   : > { %v2829_v41 = vpop.f32.mrf.mxu1 }
 0xc60   : > { %v2830_v54 = vadd.f32 %v5519_v56, %v2829_v41  ;;  %v2862_v38 = vmul.f32 0.999995, %v2838_v59  ;;  %v6480_v41 = vld [vmem:[%s6650_s8 + $0x10] sm:$0xff]   ;;  %v6486_v59 = vld [vmem:[%s8060_s26 + $0x28] sm:$0xff]  }
 0xc61   : > { %v6169_v62 = vpop.f32.mrf.mxu1 }
 0xc62   : > { %v2841_v0 = vadd.f32 %v6169_v62, %v5519_v56  ;;  %v2860_v36 = vmul.f32 0.999995, %v2830_v54  ;;  %v2870_v48 = vmax.f32 %v2862_v38, 0.0  ;;  %v6484_v54 = vld [vmem:[%s8060_s26 + $0x30] sm:$0xff]   ;;  %v6481_v62 = vld [vmem:[%s6650_s8 + $0x18] sm:$0x1f]  }
 0xc63   : > { %v2832_v42 = vpop.f32.mrf.mxu1  ;;  %v6494_v38 = vld [vmem:[%s8060_s26 + $0x8] sm:$0xff]  }
 0xc64   : > { %v2863_v20 = vmul.f32 0.999995, %v2841_v0  ;;  %v2833_v37 = vadd.f32 %v5519_v56, %v2832_v42  ;;  %v2868_v33 = vmax.f32 %v2860_v36, 0.0  ;;  %v6488_v0 = vld [vmem:[%s8060_s26 + $0x20] sm:$0xff]   ;;  %v6490_v42 = vld [vmem:[%s8060_s26 + $0x18] sm:$0xff]  }
 0xc65   : > { %v6172_v39 = vpop.f32.mrf.mxu1  ;;  %v6491_v36 = vld [vmem:[%s8059_s23 + $0x18] sm:$0xff]  }
 0xc66   : > { %v2861_v44 = vmul.f32 0.999995, %v2833_v37  ;;  %v2871_v45 = vmax.f32 %v2863_v20, 0.0  ;;  %v2854_v9 = vadd.f32 %v6172_v39, %v5519_v56  ;;  %v6492_v20 = vld [vmem:[%s8060_s26 + $0x10] sm:$0xff]   ;;  %v6495_v39 = vld [vmem:[%s8059_s23 + $0x8] sm:$0xff]  }
 0xc67   : > { %v2845_v46 = vpop.f32.mrf.mxu1  ;;  %v6493_v37 = vld [vmem:[%s8059_s23 + $0x10] sm:$0xff]  }
 0xc68   : > { %v2869_v34 = vmax.f32 %v2861_v44, 0.0  ;;  %v2846_v47 = vadd.f32 %v5519_v56, %v2845_v46  ;;  %v2877_v2 = vpack.c.bf16 %v2871_v45, %v2870_v48  ;;  %v2866_v5 = vmul.f32 0.999995, %v2854_v9  ;;  %v6496_v44 = vld [vmem:[%s8060_s26] sm:$0xff]   ;;  %v6498_v46 = vld [vmem:[%s6698_s30 + $0x38] sm:$0xff]  }
 0xc69   : > { %v6173_v1 = vpop.f32.mrf.mxu1  ;;  %v6497_v45 = vld [vmem:[%s8059_s23] sm:$0xff]  }
 0xc6a   : > { %v2876_v35 = vpack.c.bf16 %v2869_v34, %v2868_v33  ;;  %v2857_v49 = vadd.f32 %v6173_v1, %v5519_v56  ;;  %v2864_v3 = vmul.f32 0.999995, %v2846_v47  ;;  %v2874_v25 = vmax.f32 %v2866_v5, 0.0  ;;  %v5536_v33 = vld [vmem:[%s6655_s14] ss:$0 sm:$0xff] }
 0xc6b   : > { %v2848_v43 = vpop.f32.mrf.mxu1 }
 0xc6c   : > { %v2867_v50 = vmul.f32 0.999995, %v2857_v49  ;;  %v2849_v52 = vadd.f32 %v5519_v56, %v2848_v43  ;;  %6190 = vmatprep.mubr.bf16.mxu1 %v2876_v35  ;;  %v2872_v17 = vmax.f32 %v2864_v3, 0.0  ;;  %v6479_v56 = vld [vmem:[%s6650_s8 + $0x8] sm:$0xff]  }
 0xc6d   : > { %6191 = vmatmul.mubr.bf16.vlgmr.msra.gmra.mxu1 %v2877_v2 }
 0xc6e   : > { %v2865_v6 = vmul.f32 0.999995, %v2849_v52  ;;  %v2875_v16 = vmax.f32 %v2867_v50, 0.0  ;;  %6239 = vmatpush3.bf16.msra.mxu1 %v6483_v53 }
 0xc6f   : > { %6240 = vmatprep.subr.bf16.mxu1 %v6485_v58 }
 0xc70   : > { %v2873_v19 = vmax.f32 %v2865_v6, 0.0  ;;  %v2879_v30 = vpack.c.bf16 %v2875_v16, %v2874_v25 }
 0xc72   : > { %v2878_v28 = vpack.c.bf16 %v2873_v19, %v2872_v17  ;;  %6241 = vmatpush3.bf16.msra.mxu1 %v6485_v58 }
 0xc73   : > { %6242 = vmatprep.subr.bf16.mxu1 %v6487_v57 }
 0xc74   : > { %6194 = vmatprep.mubr.bf16.mxu1 %v2878_v28 }
 0xc75   : > { %6195 = vmatmul.mubr.bf16.gmra.mxu1 %v2879_v30 }
 0xc76   : > { %6243 = vmatpush3.bf16.msra.mxu1 %v6487_v57 }
 0xc77   : > { %6244 = vmatprep.subr.bf16.mxu1 %v6489_v60 }
 0xc7a   : > { %6245 = vmatpush3.bf16.msra.mxu1 %v6489_v60 }
 0xc7b   : > { %6246 = vmatprep.subr.bf16.mxu1 %v6491_v36 }
 0xc7e   : > { %6247 = vmatpush3.bf16.msra.mxu1 %v6491_v36 }
 0xc7f   : > { %6248 = vmatprep.subr.bf16.mxu1 %v6493_v37 }
 0xc82   : > { %6249 = vmatpush3.bf16.msra.mxu1 %v6493_v37 }
 0xc83   : > { %6250 = vmatprep.subr.bf16.mxu1 %v6495_v39 }
 0xc86   : > { %6251 = vmatpush3.bf16.msra.mxu1 %v6495_v39 }
 0xc87   : > { %6252 = vmatprep.subr.bf16.mxu1 %v6497_v45 }
 0xc8a   : > { %6253 = vmatpush3.bf16.msra.mxu1 %v6497_v45 }
 0xd2d   : > { %v6192_v51 = vpop.f32.mrf.mxu1 }
 0xd2f   : > { %v2978_v61 = vpop.f32.mrf.mxu1 }
 0xd31   : > { %v6193_v8 = vpop.f32.mrf.mxu1 }
 0xd32   : > { %v3018_v13 = vpack.c.bf16 %v6193_v8, %v6192_v51 }
 0xd33   : > { %v2981_v18 = vpop.f32.mrf.mxu1 }
 0xd34   : > { %v3017_v14 = vpack.c.bf16 %v2981_v18, %v2978_v61 }
 0xd35   : > { %v6196_v55 = vpop.f32.mrf.mxu1 }
 0xd37   : > { %v2994_v63 = vpop.f32.mrf.mxu1 }
 0xd39   : > { %v6197_v32 = vpop.f32.mrf.mxu1 }
 0xd3a   : > { %v3020_v7 = vpack.c.bf16 %v6197_v32, %v6196_v55 }
 0xd3b   : > { %v2997_v11 = vpop.f32.mrf.mxu1 }
 0xd3c   : > { %v3061_v10 = vand.u32 %v3020_v7, %v6764_v4  ;;  %v3019_v12 = vpack.c.bf16 %v2997_v11, %v2994_v63  ;;  %v6499_v11 = vld [vmem:[%s6698_s30 + $0x30] sm:$0xff]  }
 0xd3e   : > { %6198 = vmatprep.subr.bf16.mxu0 %v3061_v10 }
 0xd3f   : > { %6199 = vmatpush3.bf16.msra.mxu0 %v3061_v10 }
 0xd40   : > { %6200 = vmatprep.subr.bf16.mxu0 %v3019_v12 }
 0xd43   : > { %6201 = vmatpush3.bf16.msra.mxu0 %v3019_v12 }
 0xd44   : > { %6202 = vmatprep.subr.bf16.mxu0 %v3018_v13 }
 0xd47   : > { %6203 = vmatpush3.bf16.msra.mxu0 %v3018_v13  ;;  %v6500_v13 = vld [vmem:[%s6698_s30 + $0x28] sm:$0xff]  }
 0xd48   : > { %6204 = vmatprep.subr.bf16.mxu0 %v3017_v14 }
 0xd4b   : > { %6205 = vmatpush3.bf16.msra.mxu0 %v3017_v14 }
 0xd4c   : > { %6214 = vmatprep.subr.bf16.mxu0 %v6482_v15 }
 0xd4e   : > { %6207 = vmatmul.mubr.msk.bf16.vlgmr.msra.gmra.mxu0 %vm1082_vm3, %v6479_v56 }
 0xd4f   : > { %6210 = vmatprep.mubr.msk.bf16.mxu0 %vm1082_vm3, %v6480_v41  ;;  %6215 = vmatpush3.bf16.msra.mxu0 %v6482_v15 }
 0xd50   : > { %6216 = vmatprep.subr.bf16.mxu0 %v6484_v54 }
 0xd53   : > { %6217 = vmatpush3.bf16.msra.mxu0 %v6484_v54 }
 0xd54   : > { %6218 = vmatprep.subr.bf16.mxu0 %v6486_v59 }
 0xd56   : > { %6211 = vmatmul.mubr.msk.bf16.gmra.mxu0 %vm1082_vm3, %v6481_v62  ;;  %v6506_v62 = vld [vmem:[%s8061_s20] sm:$0xff]  }
 0xd57   : > { %6219 = vmatpush3.bf16.msra.mxu0 %v6486_v59  ;;  %v6501_v59 = vld [vmem:[%s6698_s30 + $0x20] sm:$0xff]  }
 0xd58   : > { %6220 = vmatprep.subr.bf16.mxu0 %v6488_v0 }
 0xd5b   : > { %6221 = vmatpush3.bf16.msra.mxu0 %v6488_v0  ;;  %v6514_v0 = vld [vmem:[%s8062_s1] sm:$0xff]  }
 0xd5c   : > { %6222 = vmatprep.subr.bf16.mxu0 %v6490_v42 }
 0xd5f   : > { %6223 = vmatpush3.bf16.msra.mxu0 %v6490_v42 }
 0xd60   : > { %6224 = vmatprep.subr.bf16.mxu0 %v6492_v20 }
 0xd63   : > { %6225 = vmatpush3.bf16.msra.mxu0 %v6492_v20 }
 0xd64   : > { %6226 = vmatprep.subr.bf16.mxu0 %v6494_v38 }
 0xd67   : > { %6227 = vmatpush3.bf16.msra.mxu0 %v6494_v38 }
 0xd68   : > { %6228 = vmatprep.subr.bf16.mxu0 %v6496_v44 }
 0xd6b   : > { %6229 = vmatpush3.bf16.msra.mxu0 %v6496_v44 }
 0xd6c   : > { %6262 = vmatprep.subr.bf16.mxu0 %v6498_v46 }
 0xe0e   : > { %v6208_v34 = vpop.f32.mrf.mxu0 }
 0xe0f   : > { %v3106_v47 = vadd.f32 %v6208_v34, %v5536_v33 }
 0xe10   : > { %v3097_v48 = vpop.f32.mrf.mxu0 }
 0xe11   : > { %v3098_v9 = vadd.f32 %v5536_v33, %v3097_v48  ;;  %v3130_v2 = vmul.f32 0.999995, %v3106_v47 }
 0xe12   : > { %v6209_v1 = vpop.f32.mrf.mxu0 }
 0xe13   : > { %v3128_v35 = vmul.f32 0.999995, %v3098_v9  ;;  %v3109_v49 = vadd.f32 %v6209_v1, %v5536_v33  ;;  %v3138_v17 = vmax.f32 %v3130_v2, 0.0 }
 0xe14   : > { %v3100_v43 = vpop.f32.mrf.mxu0 }
 0xe15   : > { %v3131_v3 = vmul.f32 0.999995, %v3109_v49  ;;  %v3101_v50 = vadd.f32 %v5536_v33, %v3100_v43  ;;  %v3136_v5 = vmax.f32 %v3128_v35, 0.0  ;;  %v3146_v51 = vadd.f32 %v3138_v17, %v7003_v29 }
 0xe16   : > { %v6212_v52 = vpop.f32.mrf.mxu0 }
 0xe17   : > { %v3139_v6 = vmax.f32 %v3131_v3, 0.0  ;;  %v3129_v16 = vmul.f32 0.999995, %v3101_v50  ;;  %v3122_v19 = vadd.f32 %v6212_v52, %v5536_v33  ;;  %v3144_v58 = vadd.f32 %v3136_v5, %v6995_v26  ;;  %v6507_v5 = vld [vmem:[%s8061_s20 + $0x8] sm:$0xff]  }
 0xe18   : > { %v3113_v25 = vpop.f32.mrf.mxu0 }
 0xe19   : > { %v3137_v28 = vmax.f32 %v3129_v16, 0.0  ;;  %v3114_v30 = vadd.f32 %v5536_v33, %v3113_v25  ;;  %v3147_v31 = vadd.f32 %v3139_v6, %v6991_v24  ;;  %v3134_v61 = vmul.f32 0.999995, %v3122_v19  ;;  %v6508_v16 = vld [vmem:[%s8061_s20 + $0x10] sm:$0xff]  }
 0xe1a   : > { %v6213_v53 = vpop.f32.mrf.mxu0 }
 0xe1b   : > { %v3145_v57 = vadd.f32 %v3137_v28, %v6999_v27  ;;  %v3132_v60 = vmul.f32 0.999995, %v3114_v30  ;;  %v3125_v8 = vadd.f32 %v6213_v53, %v5536_v33  ;;  %v3153_v32 = vpack.c.bf16 %v3147_v31, %v3146_v51  ;;  %v6509_v31 = vld [vmem:[%s8061_s20 + $0x18] sm:$0x1f]  }
 0xe1c   : > { %v3116_v18 = vpop.f32.mrf.mxu0  ;;  %v3142_v24 = vmax.f32 %v3134_v61, 0.0 }
 0xe1d   : > { %v3117_v55 = vadd.f32 %v5536_v33, %v3116_v18  ;;  %v3152_v63 = vpack.c.bf16 %v3145_v57, %v3144_v58  ;;  %v3135_v7 = vmul.f32 0.999995, %v3125_v8  ;;  %v3140_v10 = vmax.f32 %v3132_v60, 0.0  ;;  %v6510_v58 = vld [vmem:[%s8063_s2] sm:$0xff]   ;;  %v6511_v18 = vld [vmem:[%s8063_s2 + $0x8] sm:$0xff]  }
 0xe1e   : > { %v3150_v56 = vadd.f32 %v3142_v24, %v7031_v40  ;;  %v6505_v40 = vld [vmem:[%s6698_s30] sm:$0xff]   ;;  %v6515_v24 = vld [vmem:[%s8062_s1 + $0x8] sm:$0xff]  }
 0xe1f   : > { %v3133_v12 = vmul.f32 0.999995, %v3117_v55  ;;  %6230 = vmatprep.mubr.bf16.mxu0 %v3152_v63  ;;  %6254 = vmatprep.mubr.bf16.mxu1 %v3152_v63  ;;  %v3143_v26 = vmax.f32 %v3135_v7, 0.0  ;;  %v3148_v14 = vadd.f32 %v3140_v10, %v7023_v22  ;;  %v6503_v22 = vld [vmem:[%s6698_s30 + $0x10] sm:$0xff]   ;;  %v6513_v10 = vld [vmem:[%s8063_s2 + $0x18] sm:$0x1f]  }
 0xe20   : > { %6231 = vmatmul.mubr.bf16.vlgmr.msra.gmra.mxu0 %v3153_v32  ;;  %6255 = vmatmul.mubr.bf16.vlgmr.msra.gmra.mxu1 %v3153_v32 }
 0xe21   : > { %v3141_v27 = vmax.f32 %v3133_v12, 0.0  ;;  %6263 = vmatpush3.bf16.msra.mxu0 %v6498_v46  ;;  %v3151_v29 = vadd.f32 %v3143_v26, %v7019_v21  ;;  %v6502_v21 = vld [vmem:[%s6698_s30 + $0x18] sm:$0xff]   ;;  %v6516_v26 = vld [vmem:[%s8062_s1 + $0x10] sm:$0xff]  }
 0xe22   : > { %6264 = vmatprep.subr.bf16.mxu0 %v6499_v11 }
 0xe23   : > { %v3149_v15 = vadd.f32 %v3141_v27, %v7027_v23  ;;  %v3155_v54 = vpack.c.bf16 %v3151_v29, %v3150_v56  ;;  %v6504_v23 = vld [vmem:[%s6698_s30 + $0x8] sm:$0xff]   ;;  %v6517_v27 = vld [vmem:[%s8062_s1 + $0x18] sm:$0x1f]  }
 0xe24   : > { %v6518_v29 = vld [vmem:[%s8064_s0 + $0x18] sm:$0xff]  }
 0xe25   : > { %6265 = vmatpush3.bf16.msra.mxu0 %v6499_v11  ;;  %v3154_v41 = vpack.c.bf16 %v3149_v15, %v3148_v14  ;;  %v6520_v14 = vld [vmem:[%s8064_s0 + $0x8] sm:$0xff]   ;;  %v6521_v15 = vld [vmem:[%s8064_s0] sm:$0xff]  }
 0xe26   : > { %6266 = vmatprep.subr.bf16.mxu0 %v6500_v13 }
 0xe27   : > { %6234 = vmatprep.mubr.bf16.mxu0 %v3154_v41  ;;  %6258 = vmatprep.mubr.bf16.mxu1 %v3154_v41 }
 0xe28   : > { %6235 = vmatmul.mubr.bf16.gmra.mxu0 %v3155_v54  ;;  %6259 = vmatmul.mubr.bf16.gmra.mxu1 %v3155_v54 }
 0xe29   : > { %6267 = vmatpush3.bf16.msra.mxu0 %v6500_v13  ;;  %6278 = vmatprep.mubr.bf16.mxu0 %v3152_v63  ;;  %v6512_v63 = vld [vmem:[%s8063_s2 + $0x10] sm:$0xff]  }
 0xe2a   : > { %6268 = vmatprep.subr.bf16.mxu0 %v6501_v59  ;;  %6294 = vmatprep.mubr.msk.bf16.mxu1 %vm1082_vm3, %v6506_v62  ;;  %v6519_v13 = vld [vmem:[%s8064_s0 + $0x10] sm:$0xff]  }
 0xe2d   : > { %6269 = vmatpush3.bf16.msra.mxu0 %v6501_v59 }
 0xe2e   : > { %6270 = vmatprep.subr.bf16.mxu0 %v6502_v21 }
 0xe31   : > { %6271 = vmatpush3.bf16.msra.mxu0 %v6502_v21 }
 0xe32   : > { %6272 = vmatprep.subr.bf16.mxu0 %v6503_v22 }
 0xe35   : > { %6273 = vmatpush3.bf16.msra.mxu0 %v6503_v22 }
 0xe36   : > { %6274 = vmatprep.subr.bf16.mxu0 %v6504_v23 }
 0xe39   : > { %6275 = vmatpush3.bf16.msra.mxu0 %v6504_v23 }
 0xe3a   : > { %6276 = vmatprep.subr.bf16.mxu0 %v6505_v40 }
 0xe3d   : > { %6277 = vmatpush3.bf16.msra.mxu0 %v6505_v40 }
 0xe40   : > { %6279 = vmatmul.mubr.bf16.vlgmr.msra.gmra.mxu0 %v3153_v32 }
 0xe41   : > { %6282 = vmatprep.mubr.bf16.mxu0 %v3154_v41 }
 0xe48   : > { %6283 = vmatmul.mubr.bf16.gmra.mxu0 %v3155_v54 }
 0xe49   : > { %6326 = vmatprep.mubr.msk.bf16.mxu0 %vm1082_vm3, %v6514_v0 }
 0xee0   : > { %v6232_v42 = vpop.f32.mrf.mxu0  ;;  %v6256_v36 = vpop.f32.mrf.mxu1 }
 0xee2   : > { %v3254_v20 = vpop.f32.mrf.mxu0  ;;  %v3383_v37 = vpop.f32.mrf.mxu1 }
 0xee4   : > { %v6257_v38 = vpop.f32.mrf.mxu1  ;;  %v6233_v39 = vpop.f32.mrf.mxu0 }
 0xee5   : > { %v3564_v2 = vpack.c.bf16 %v6257_v38, %v6256_v36  ;;  %v3552_v30 = vpack.c.bf16 %v6233_v39, %v6232_v42 }
 0xee6   : > { %v3386_v44 = vpop.f32.mrf.mxu1  ;;  %v3257_v46 = vpop.f32.mrf.mxu0 }
 0xee7   : > { %v3563_v3 = vpack.c.bf16 %v3386_v44, %v3383_v37  ;;  %v3551_v60 = vpack.c.bf16 %v3257_v46, %v3254_v20 }
 0xee8   : > { %v6260_v45 = vpop.f32.mrf.mxu1  ;;  %v6236_v48 = vpop.f32.mrf.mxu0 }
 0xeea   : > { %v3399_v33 = vpop.f32.mrf.mxu1  ;;  %v3270_v49 = vpop.f32.mrf.mxu0 }
 0xeec   : > { %v6261_v34 = vpop.f32.mrf.mxu1  ;;  %v6237_v43 = vpop.f32.mrf.mxu0 }
 0xeed   : > { %v3566_v47 = vpack.c.bf16 %v6261_v34, %v6260_v45  ;;  %v3554_v50 = vpack.c.bf16 %v6237_v43, %v6236_v48 }
 0xeee   : > { %v3402_v9 = vpop.f32.mrf.mxu1  ;;  %v3273_v6 = vpop.f32.mrf.mxu0 }
 0xeef   : > { %v3600_v1 = vand.u32 %v3566_v47, %v6764_v4  ;;  %v3565_v35 = vpack.c.bf16 %v3402_v9, %v3399_v33  ;;  %v3700_v52 = vand.u32 %v3554_v50, %v6764_v4  ;;  %v3553_v19 = vpack.c.bf16 %v3273_v6, %v3270_v49 }
 0xef1   : > { %6286 = vmatprep.subr.bf16.mxu1 %v3600_v1 }
 0xef2   : > { %6287 = vmatpush3.bf16.msra.mxu1 %v3600_v1 }
 0xef3   : > { %6288 = vmatprep.subr.bf16.mxu1 %v3565_v35 }
 0xef6   : > { %6289 = vmatpush3.bf16.msra.mxu1 %v3565_v35 }
 0xef7   : > { %6290 = vmatprep.subr.bf16.mxu1 %v3564_v2 }
 0xefa   : > { %6291 = vmatpush3.bf16.msra.mxu1 %v3564_v2 }
 0xefb   : > { %6292 = vmatprep.subr.bf16.mxu1 %v3563_v3 }
 0xefe   : > { %6293 = vmatpush3.bf16.msra.mxu1 %v3563_v3 }
 0xeff   : > { %6302 = vmatprep.subr.bf16.mxu1 %v3700_v52 }
 0xf00   : > { %v6280_v17 = vpop.f32.mrf.mxu0 }
 0xf01   : > { %6295 = vmatmul.mubr.msk.bf16.vlgmr.msra.gmra.mxu1 %vm1082_vm3, %v6507_v5 }
 0xf02   : > { %v3512_v25 = vpop.f32.mrf.mxu0  ;;  %6303 = vmatpush3.bf16.msra.mxu1 %v3700_v52  ;;  %6298 = vmatprep.mubr.msk.bf16.mxu1 %vm1082_vm3, %v6508_v16 }
 0xf03   : > { %6304 = vmatprep.subr.bf16.mxu1 %v3553_v19 }
 0xf04   : > { %v6281_v28 = vpop.f32.mrf.mxu0 }
 0xf05   : > { %v3776_v11 = vpack.c.bf16 %v6281_v28, %v6280_v17 }
 0xf06   : > { %v3515_v53 = vpop.f32.mrf.mxu0  ;;  %6305 = vmatpush3.bf16.msra.mxu1 %v3553_v19 }
 0xf07   : > { %6306 = vmatprep.subr.bf16.mxu1 %v3552_v30  ;;  %v3775_v12 = vpack.c.bf16 %v3515_v53, %v3512_v25 }
 0xf08   : > { %v6284_v57 = vpop.f32.mrf.mxu0 }
 0xf09   : > { %6299 = vmatmul.mubr.msk.bf16.gmra.mxu1 %vm1082_vm3, %v6509_v31 }
 0xf0a   : > { %v3528_v51 = vpop.f32.mrf.mxu0  ;;  %6307 = vmatpush3.bf16.msra.mxu1 %v3552_v30  ;;  %6310 = vmatprep.mubr.msk.bf16.mxu1 %vm1082_vm3, %v6510_v58 }
 0xf0b   : > { %6308 = vmatprep.subr.bf16.mxu1 %v3551_v60 }
 0xf0c   : > { %v6285_v61 = vpop.f32.mrf.mxu0 }
 0xf0d   : > { %v3778_v8 = vpack.c.bf16 %v6285_v61, %v6284_v57 }
 0xf0e   : > { %v3531_v55 = vpop.f32.mrf.mxu0  ;;  %6309 = vmatpush3.bf16.msra.mxu1 %v3551_v60  ;;  %v6522_v60 = vld [vmem:[%s8065_s11] sm:$0xff]  }
 0xf0f   : > { %v3812_v32 = vand.u32 %v3778_v8, %v6764_v4  ;;  %v3777_v7 = vpack.c.bf16 %v3531_v55, %v3528_v51  ;;  %6334 = vmatprep.subr.bf16.mxu1 %v6518_v29 }
 0xf11   : > { %6318 = vmatprep.subr.bf16.mxu0 %v3812_v32  ;;  %6311 = vmatmul.mubr.msk.bf16.vlgmr.msra.gmra.mxu1 %vm1082_vm3, %v6511_v18 }
 0xf12   : > { %6319 = vmatpush3.bf16.msra.mxu0 %v3812_v32  ;;  %6314 = vmatprep.mubr.msk.bf16.mxu1 %vm1082_vm3, %v6512_v63 }
 0xf13   : > { %6320 = vmatprep.subr.bf16.mxu0 %v3777_v7  ;;  %6335 = vmatpush3.bf16.msra.mxu1 %v6518_v29  ;;  %v6524_v29 = vld [vmem:[%s8065_s11 + $0x10] sm:$0xff]  }
 0xf14   : > { %6336 = vmatprep.subr.bf16.mxu1 %v6519_v13 }
 0xf16   : > { %6321 = vmatpush3.bf16.msra.mxu0 %v3777_v7 }
 0xf17   : > { %6322 = vmatprep.subr.bf16.mxu0 %v3776_v11  ;;  %6337 = vmatpush3.bf16.msra.mxu1 %v6519_v13  ;;  %v7284_v13 = vld [vmem:[%s8066_s16] ss:$0 sm:$0xff]  ;;  %s929_s16 = scalar_lea.vmem %s6753_s7, %s5615_s27 }
 0xf18   : > { %6338 = vmatprep.subr.bf16.mxu1 %v6520_v14 }
 0xf19   : > { %6315 = vmatmul.mubr.msk.bf16.gmra.mxu1 %vm1082_vm3, %v6513_v10 }
 0xf1a   : > { %6323 = vmatpush3.bf16.msra.mxu0 %v3776_v11 }
 0xf1b   : > { %6324 = vmatprep.subr.bf16.mxu0 %v3775_v12  ;;  %6339 = vmatpush3.bf16.msra.mxu1 %v6520_v14 }
 0xf1c   : > { %6340 = vmatprep.subr.bf16.mxu1 %v6521_v15 }
 0xf1e   : > { %6325 = vmatpush3.bf16.msra.mxu0 %v3775_v12 }
 0xf1f   : > { %6341 = vmatpush3.bf16.msra.mxu1 %v6521_v15 }
 0xf21   : > { %6327 = vmatmul.mubr.msk.bf16.vlgmr.msra.gmra.mxu0 %vm1082_vm3, %v6515_v24 }
 0xf22   : > { %6330 = vmatprep.mubr.msk.bf16.mxu0 %vm1082_vm3, %v6516_v26 }
 0xf29   : > { %6331 = vmatmul.mubr.msk.bf16.gmra.mxu0 %vm1082_vm3, %v6517_v27  ;;  %v6523_v27 = vld [vmem:[%s8065_s11 + $0x8] sm:$0xff]  }
 0xf2a   : > { %6358 = vmatprep.mubr.msk.bf16.mxu0 %vm1082_vm3, %v6522_v60 }
 0xfc1   : > { %v6296_v56 = vpop.f32.mrf.mxu1 }
 0xfc3   : > { %v3636_v41 = vpop.f32.mrf.mxu1 }
 0xfc5   : > { %v6297_v54 = vpop.f32.mrf.mxu1 }
 0xfc7   : > { %v3639_v59 = vpop.f32.mrf.mxu1 }
 0xfc9   : > { %v6300_v21 = vpop.f32.mrf.mxu1 }
 0xfcb   : > { %v3652_v22 = vpop.f32.mrf.mxu1 }
 0xfcd   : > { %v6301_v23 = vpop.f32.mrf.mxu1 }
 0xfcf   : > { %v3655_v40 = vpop.f32.mrf.mxu1 }
 0xfd1   : > { %v6312_v62 = vpop.f32.mrf.mxu1 }
 0xfd2   : > { %v3745_v34 = vadd.f32 %v6312_v62, %v6296_v56 }
 0xfd3   : > { %v3736_v0 = vpop.f32.mrf.mxu1 }
 0xfd4   : > { %v3737_v46 = vadd.f32 %v3736_v0, %v3636_v41  ;;  %v4146_v41 = vld [vmem:[%s8067_s18 + $0x50] sm:$0xff] }
 0xfd5   : > { %v6313_v42 = vpop.f32.mrf.mxu1 }
 0xfd6   : > { %v3748_v44 = vadd.f32 %v6313_v42, %v6297_v54 }
 0xfd7   : > { %v3739_v36 = vpop.f32.mrf.mxu1 }
 0xfd8   : > { %v3740_v33 = vadd.f32 %v3739_v36, %v3639_v59  ;;  %v4138_v59 = vld [vmem:[%s8067_s18 + $0x10] sm:$0xff] }
 0xfd9   : > { %v6316_v20 = vpop.f32.mrf.mxu1 }
 0xfda   : > { %v3761_v19 = vadd.f32 %v6316_v20, %v6300_v21  ;;  %v4170_v21 = vld [vmem:[%s8067_s18 + $0x110] sm:$0xff] }
 0xfdb   : > { %v3752_v38 = vpop.f32.mrf.mxu1  ;;  %v4178_v20 = vld [vmem:[%s8067_s18 + $0x150] sm:$0xff] }
 0xfdc   : > { %v3753_v16 = vadd.f32 %v3752_v38, %v3652_v22  ;;  %v4162_v38 = vld [vmem:[%s8067_s18 + $0xd0] sm:$0xff] }
 0xfdd   : > { %v6317_v47 = vpop.f32.mrf.mxu1 }
 0xfde   : > { %v3764_v5 = vadd.f32 %v6317_v47, %v6301_v23  ;;  %v4154_v23 = vld [vmem:[%s8067_s18 + $0x90] sm:$0xff] }
 0xfdf   : > { %v3755_v3 = vpop.f32.mrf.mxu1  ;;  %v4202_v47 = vld [vmem:[%s8067_s18 + $0x210] sm:$0xff] }
 0xfe0   : > { %v3756_v17 = vadd.f32 %v3755_v3, %v3655_v40 }
 0xfe1   : > { %v6328_v37 = vpop.f32.mrf.mxu0 }
 0xfe2   : > { %v3881_v49 = vadd.f32 %v6328_v37, %v3745_v34  ;;  %v4210_v34 = vld [vmem:[%s8067_s18 + $0x250] sm:$0xff] }
 0xfe3   : > { %v3848_v39 = vpop.f32.mrf.mxu0 }
 0xfe4   : > { %v3879_v1 = vadd.f32 %v3848_v39, %v3737_v46 }
 0xfe5   : > { %v6329_v45 = vpop.f32.mrf.mxu0 }
 0xfe6   : > { %v3882_v48 = vadd.f32 %v6329_v45, %v3748_v44 }
 0xfe7   : > { %v3851_v9 = vpop.f32.mrf.mxu0 }
 0xfe8   : > { %v3880_v35 = vadd.f32 %v3851_v9, %v3740_v33  ;;  %v3888_v50 = vpack.c.bf16 %v3882_v48, %v3881_v49 }
 0xfe9   : > { %v6332_v2 = vpop.f32.mrf.mxu0 }
 0xfea   : > { %v3887_v43 = vpack.c.bf16 %v3880_v35, %v3879_v1  ;;  %v3885_v53 = vadd.f32 %v6332_v2, %v3761_v19  ;;  %v4218_v2 = vld [vmem:[%s8067_s18 + $0x290] sm:$0xff] }
 0xfeb   : > { %v3864_v52 = vpop.f32.mrf.mxu0 }
 0xfec   : > { %6342 = vmatprep.mubr.msk.bf16.mxu1 %vm3923_vm7, %v3887_v43  ;;  %v3883_v30 = vadd.f32 %v3864_v52, %v3753_v16  ;;  %v4186_v43 = vld [vmem:[%s8067_s18 + $0x190] sm:$0xff] }
 0xfed   : > { %v6333_v6 = vpop.f32.mrf.mxu0  ;;  %6343 = vmatmul.mubr.msk.bf16.vlgmr.msra.gmra.mxu1 %vm3923_vm7, %v3888_v50  ;;  %v4194_v16 = vld [vmem:[%s8067_s18 + $0x1d0] sm:$0xff] }
 0xfee   : > { %v3886_v25 = vadd.f32 %v6333_v6, %v3764_v5 }
 0xfef   : > { %v3867_v28 = vpop.f32.mrf.mxu0 }
 0xff0   : > { %v3884_v31 = vadd.f32 %v3867_v28, %v3756_v17  ;;  %v3890_v57 = vpack.c.bf16 %v3886_v25, %v3885_v53  ;;  %v4136_v17 = vld [vmem:[%s8067_s18] sm:$0xff] }
 0xff1   : > { %v4152_v53 = vld [vmem:[%s8067_s18 + $0x80] sm:$0xff] }
 0xff2   : > { %v3889_v58 = vpack.c.bf16 %v3884_v31, %v3883_v30  ;;  %v4226_v31 = vld [vmem:[%s8067_s18 + $0x2d0] sm:$0xff] }
 0xff4   : > { %6346 = vmatprep.mubr.msk.bf16.mxu1 %vm3923_vm7, %v3889_v58 }
 0xff5   : > { %6347 = vmatmul.mubr.msk.bf16.gmra.mxu1 %vm3923_vm7, %v3890_v57  ;;  %vm5208_vm7 = vcmask 1047559  }
0x10ad   : > { %v6344_v51 = vpop.f32.mrf.mxu1 }
0x10af   : > { %v3970_v61 = vpop.f32.mrf.mxu1 }
0x10b1   : > { %v6345_v8 = vpop.f32.mrf.mxu1 }
0x10b2   : > { %v4010_v24 = vpack.c.bf16 %v6345_v8, %v6344_v51  ;;  %v4176_v8 = vld [vmem:[%s8067_s18 + $0x140] sm:$0xff] }
0x10b3   : > { %v3973_v18 = vpop.f32.mrf.mxu1 }
0x10b4   : > { %v4009_v26 = vpack.c.bf16 %v3973_v18, %v3970_v61  ;;  %v4144_v61 = vld [vmem:[%s8067_s18 + $0x40] sm:$0xff] }
0x10b5   : > { %v6348_v55 = vpop.f32.mrf.mxu1 }
0x10b7   : > { %v3986_v63 = vpop.f32.mrf.mxu1 }
0x10b9   : > { %v6349_v32 = vpop.f32.mrf.mxu1 }
0x10ba   : > { %v4012_v7 = vpack.c.bf16 %v6349_v32, %v6348_v55 }
0x10bb   : > { %v3989_v11 = vpop.f32.mrf.mxu1 }
0x10bc   : > { %v4053_v10 = vand.u32 %v4012_v7, %v6764_v4  ;;  %v4011_v12 = vpack.c.bf16 %v3989_v11, %v3986_v63  ;;  %v6525_v4 = vld [vmem:[%s8065_s11 + $0x18] sm:$0x1f]   ;;  %v4160_v11 = vld [vmem:[%s8067_s18 + $0xc0] sm:$0xff] }
0x10be   : > { %6350 = vmatprep.subr.bf16.mxu0 %v4053_v10 }
0x10bf   : > { %6351 = vmatpush3.bf16.msra.mxu0 %v4053_v10  ;;  %v4200_v10 = vld [vmem:[%s8067_s18 + $0x200] sm:$0xff] }
0x10c0   : > { %6352 = vmatprep.subr.bf16.mxu0 %v4011_v12 }
0x10c3   : > { %6353 = vmatpush3.bf16.msra.mxu0 %v4011_v12 }
0x10c4   : > { %6354 = vmatprep.subr.bf16.mxu0 %v4010_v24 }
0x10c7   : > { %6355 = vmatpush3.bf16.msra.mxu0 %v4010_v24 }
0x10c8   : > { %6356 = vmatprep.subr.bf16.mxu0 %v4009_v26 }
0x10cb   : > { %6357 = vmatpush3.bf16.msra.mxu0 %v4009_v26 }
0x10ce   : > { %6359 = vmatmul.mubr.msk.bf16.vlgmr.msra.gmra.mxu0 %vm1082_vm3, %v6523_v27 }
0x10cf   : > { %6362 = vmatprep.mubr.msk.bf16.mxu0 %vm1082_vm3, %v6524_v29 }
0x10d6   : > { %6363 = vmatmul.mubr.msk.bf16.gmra.mxu0 %vm1082_vm3, %v6525_v4  ;;  %v4168_v4 = vld [vmem:[%s8067_s18 + $0x100] sm:$0xff] }
0x118e   : > { %v6360_v14 = vpop.f32.mrf.mxu0 }
0x118f   : > { %v4098_v15 = vadd.f32 %v6360_v14, %v7284_v13  ;;  %v4208_v14 = vld [vmem:[%s8067_s18 + $0x240] sm:$0xff] }
0x1190   : > { %v4089_v37 = vpop.f32.mrf.mxu0 }
0x1191   : > { %v4122_v56 = vmul.f32 0.999995, %v4098_v15  ;;  %v4090_v45 = vadd.f32 %v7284_v13, %v4089_v37 }
0x1192   : > { %v6361_v63 = vpop.f32.mrf.mxu0 }
0x1193   : > { %v4130_v54 = vmax.f32 %v4122_v56, 0.0  ;;  %v4120_v1 = vmul.f32 0.999995, %v4090_v45  ;;  %v4101_v12 = vadd.f32 %v6361_v63, %v7284_v13 }
0x1195   : > { %v4242_v22 = vmul.f32 %v4146_v41, %v4130_v54  ;;  %v4234_v40 = vmul.f32 %v4138_v59, %v4130_v54  ;;  %v4266_v0 = vmul.f32 %v4170_v21, %v4130_v54  ;;  %v4250_v36 = vmul.f32 %v4154_v23, %v4130_v54  ;;  %v4192_v21 = vld [vmem:[%s8067_s18 + $0x1c0] sm:$0xff] }
0x1196   : > { %v4274_v44 = vmul.f32 %v4178_v20, %v4130_v54  ;;  %v4258_v33 = vmul.f32 %v4162_v38, %v4130_v54  ;;  %v4306_v9 = vmul.f32 %v4210_v34, %v4130_v54  ;;  %v4298_v49 = vmul.f32 %v4202_v47, %v4130_v54  ;;  %v4216_v20 = vld [vmem:[%s8067_s18 + $0x280] sm:$0xff] }
0x1197   : > { %v4358_v62 = vsel %vm958_vm2, %v4242_v22, 0.0  ;;  %v4334_v42 = vsel %vm958_vm2, %v4234_v40, 0.0  ;;  %v4430_v39 = vsel %vm958_vm2, %v4266_v0, 0.0  ;;  %v4382_v46 = vsel %vm958_vm2, %v4250_v36, 0.0  ;;  %v4184_v22 = vld [vmem:[%s8067_s18 + $0x180] sm:$0xff]  ;;  %v4147_v36 = vld [vmem:[%s8067_s18 + $0x58] sm:$0xff] }
0x1198   : > { %4359 = vadd.xlane.f32.xlu1 %v4358_v62  ;;  %4335 = vadd.xlane.f32.xlu0 %v4334_v42  ;;  %v4454_v48 = vsel %vm958_vm2, %v4274_v44, 0.0  ;;  %v4406_v35 = vsel %vm958_vm2, %v4258_v33, 0.0  ;;  %v4550_v3 = vsel %vm958_vm2, %v4306_v9, 0.0  ;;  %v4314_v50 = vmul.f32 %v4218_v2, %v4130_v54  ;;  %v4224_v33 = vld [vmem:[%s8067_s18 + $0x2c0] sm:$0xff] }
0x1199   : > { %v7305_v52 = vmax.f32 %v4120_v1, 0.0  ;;  %v4526_v5 = vsel %vm958_vm2, %v4298_v49, 0.0  ;;  %v4282_v6 = vmul.f32 %v4186_v43, %v4130_v54  ;;  %v4290_v25 = vmul.f32 %v4194_v16, %v4130_v54  ;;  %v4139_v49 = vld [vmem:[%s8067_s18 + $0x18] sm:$0xff] }
0x119a   : > { %v4574_v19 = vsel %vm958_vm2, %v4314_v50, 0.0  ;;  %v4322_v57 = vmul.f32 %v4226_v31, %v4130_v54  ;;  %v4123_v15 = vmul.f32 0.999995, %v4101_v12  ;;  %v4163_v16 = vld [vmem:[%s8067_s18 + $0xd8] sm:$0xff] }
0x119b   : > { %v4478_v28 = vsel %vm958_vm2, %v4282_v6, 0.0  ;;  %v4232_v30 = vmul.f32 %v4136_v17, %v7305_v52  ;;  %v4502_v58 = vsel %vm958_vm2, %v4290_v25, 0.0  ;;  %v4248_v51 = vmul.f32 %v4152_v53, %v7305_v52  ;;  %v4203_v6 = vld [vmem:[%s8067_s18 + $0x218] sm:$0xff] }
0x119c   : > { %4431 = vadd.xlane.f32.xlu1 %v4430_v39  ;;  %4383 = vadd.xlane.f32.xlu0 %v4382_v46  ;;  %v4598_v18 = vsel %vm958_vm2, %v4322_v57, 0.0  ;;  %v4240_v55 = vmul.f32 %v4144_v61, %v7305_v52  ;;  %v4272_v7 = vmul.f32 %v4176_v8, %v7305_v52  ;;  %v4256_v26 = vmul.f32 %v4160_v11, %v7305_v52  ;;  %v4092_v39 = vpop.f32.mrf.mxu0  ;;  %v4155_v46 = vld [vmem:[%s8067_s18 + $0x98] sm:$0xff] }
0x119d   : > { %v4328_v60 = vsel %vm958_vm2, %v4232_v30, 0.0  ;;  %v4376_v32 = vsel %vm958_vm2, %v4248_v51, 0.0  ;;  %v4296_v29 = vmul.f32 %v4200_v10, %v7305_v52  ;;  %v4264_v41 = vmul.f32 %v4168_v4, %v7305_v52  ;;  %v4145_v30 = vld [vmem:[%s8067_s18 + $0x48] sm:$0xff]  ;;  %v4171_v31 = vld [vmem:[%s8067_s18 + $0x118] sm:$0xff] }
0x119e   : > { %v4352_v24 = vsel %vm958_vm2, %v4240_v55, 0.0  ;;  %v4448_v27 = vsel %vm958_vm2, %v4272_v7, 0.0  ;;  %v4400_v56 = vsel %vm958_vm2, %v4256_v26, 0.0  ;;  %v4304_v59 = vmul.f32 %v4208_v14, %v7305_v52  ;;  %v4153_v51 = vld [vmem:[%s8067_s18 + $0x88] sm:$0xff]  ;;  %v4211_v61 = vld [vmem:[%s8067_s18 + $0x258] sm:$0xff] }
0x119f   : > { %v4520_v54 = vsel %vm958_vm2, %v4296_v29, 0.0  ;;  %v7339_v23 = vmax.f32 %v4123_v15, 0.0  ;;  %v4424_v40 = vsel %vm958_vm2, %v4264_v41, 0.0  ;;  %v4288_v62 = vmul.f32 %v4192_v21, %v7305_v52  ;;  %v4187_v7 = vld [vmem:[%s8067_s18 + $0x198] sm:$0xff]  ;;  %v4201_v26 = vld [vmem:[%s8067_s18 + $0x208] sm:$0xff] }
0x11a0   : > { %4455 = vadd.xlane.f32.xlu1 %v4454_v48  ;;  %4407 = vadd.xlane.f32.xlu0 %v4406_v35  ;;  %v4544_v0 = vsel %vm958_vm2, %v4304_v59, 0.0  ;;  %v4280_v42 = vmul.f32 %v4184_v22, %v7305_v52  ;;  %v4312_v45 = vmul.f32 %v4216_v20, %v7305_v52  ;;  %v4093_v34 = vadd.f32 %v7284_v13, %v4092_v39  ;;  %v4179_v35 = vld [vmem:[%s8067_s18 + $0x158] sm:$0xff]  ;;  %v4217_v39 = vld [vmem:[%s8067_s18 + $0x288] sm:$0xff] }
0x11a1   : > { %v4496_v37 = vsel %vm958_vm2, %v4288_v62, 0.0  ;;  %v4243_v38 = vmul.f32 %v4147_v36, %v7339_v23  ;;  %v4251_v48 = vmul.f32 %v4155_v46, %v7339_v23  ;;  %v4320_v1 = vmul.f32 %v4224_v33, %v7305_v52  ;;  %v4195_v41 = vld [vmem:[%s8067_s18 + $0x1d8] sm:$0xff]  ;;  %v4185_v62 = vld [vmem:[%s8067_s18 + $0x188] sm:$0xff] }
0x11a2   : > { %v4472_v44 = vsel %vm958_vm2, %v4280_v42, 0.0  ;;  %v4568_v9 = vsel %vm958_vm2, %v4312_v45, 0.0  ;;  %v4121_v2 = vmul.f32 0.999995, %v4093_v34  ;;  %v4307_v63 = vmul.f32 %v4211_v61, %v7339_v23  ;;  %v4227_v42 = vld [vmem:[%s8067_s18 + $0x2d8] sm:$0xff]  ;;  %v4137_v45 = vld [vmem:[%s8067_s18 + $0x8] sm:$0xff] }
0x11a3   : > { %v4361_v47 = vsel %vm958_vm2, %v4243_v38, 0.0  ;;  %v4385_v43 = vsel %vm958_vm2, %v4251_v48, 0.0  ;;  %v4592_v50 = vsel %vm958_vm2, %v4320_v1, 0.0  ;;  %v4291_v22 = vmul.f32 %v4195_v41, %v7339_v23  ;;  %v4225_v48 = vld [vmem:[%s8067_s18 + $0x2c8] sm:$0xff]  ;;  %v4150_v1 = vld [vmem:[%s8067_s18 + $0x70] sm:$0xff] }
0x11a4   : > { %4551 = vadd.xlane.f32.xlu1 %v4550_v3  ;;  %4527 = vadd.xlane.f32.xlu0 %v4526_v5  ;;  %v4275_v3 = vmul.f32 %v4179_v35, %v7339_v23  ;;  %v4235_v5 = vmul.f32 %v4139_v49, %v7339_v23  ;;  %v7366_v52 = vmax.f32 %v4121_v2, 0.0  ;;  %v4553_v12 = vsel %vm958_vm2, %v4307_v63, 0.0 }
0x11a5   : > { %v4323_v38 = vmul.f32 %v4227_v42, %v7339_v23 }
0x11a6   : > { %v4457_v17 = vsel %vm958_vm2, %v4275_v3, 0.0  ;;  %v4337_v25 = vsel %vm958_vm2, %v4235_v5, 0.0  ;;  %v4297_v4 = vmul.f32 %v4201_v26, %v7366_v52  ;;  %v4281_v20 = vmul.f32 %v4185_v62, %v7366_v52 }
0x11a7   : > { %v4313_v33 = vmul.f32 %v4217_v39, %v7366_v52  ;;  %v4601_v34 = vsel %vm958_vm2, %v4323_v38, 0.0  ;;  %v4321_v49 = vmul.f32 %v4225_v48, %v7366_v52 }
0x11a8   : > { %4575 = vadd.xlane.f32.xlu1 %v4574_v19  ;;  %4479 = vadd.xlane.f32.xlu0 %v4478_v28  ;;  %v4299_v19 = vmul.f32 %v4203_v6, %v7339_v23  ;;  %v4259_v28 = vmul.f32 %v4163_v16, %v7339_v23  ;;  %v4475_v46 = vsel %vm958_vm2, %v4281_v20, 0.0  ;;  %v4156_v20 = vld [vmem:[%s8067_s18 + $0xa0] sm:$0xff] }
0x11a9   : > { %v4571_v35 = vsel %vm958_vm2, %v4313_v33, 0.0  ;;  %v4595_v5 = vsel %vm958_vm2, %v4321_v49, 0.0  ;;  %v4148_v33 = vld [vmem:[%s8067_s18 + $0x60] sm:$0xff] }
0x11aa   : > { %v4529_v53 = vsel %vm958_vm2, %v4299_v19, 0.0  ;;  %v4409_v57 = vsel %vm958_vm2, %v4259_v28, 0.0 }
0x11ac   : > { %4503 = vadd.xlane.f32.xlu1 %v4502_v58  ;;  %4329 = vadd.xlane.f32.xlu0 %v4328_v60  ;;  %v4241_v58 = vmul.f32 %v4145_v30, %v7366_v52  ;;  %v4267_v60 = vmul.f32 %v4171_v31, %v7339_v23 }
0x11ae   : > { %v4355_v8 = vsel %vm958_vm2, %v4241_v58, 0.0  ;;  %v4433_v55 = vsel %vm958_vm2, %v4267_v60, 0.0  ;;  %v4142_v58 = vld [vmem:[%s8067_s18 + $0x30] sm:$0xff] }
0x11b0   : > { %4599 = vadd.xlane.f32.xlu1 %v4598_v18  ;;  %4377 = vadd.xlane.f32.xlu0 %v4376_v32  ;;  %v4249_v18 = vmul.f32 %v4153_v51, %v7366_v52  ;;  %v4177_v32 = vld [vmem:[%s8067_s18 + $0x148] sm:$0xff] }
0x11b1   : > { %v4273_v10 = vmul.f32 %v4177_v32, %v7366_v52 }
0x11b2   : > { %v4379_v11 = vsel %vm958_vm2, %v4249_v18, 0.0  ;;  %v4158_v18 = vld [vmem:[%s8067_s18 + $0xb0] sm:$0xff] }
0x11b3   : > { %v4451_v29 = vsel %vm958_vm2, %v4273_v10, 0.0  ;;  %v4198_v10 = vld [vmem:[%s8067_s18 + $0x1f0] sm:$0xff] }
0x11b4   : > { %4353 = vadd.xlane.f32.xlu1 %v4352_v24  ;;  %4449 = vadd.xlane.f32.xlu0 %v4448_v27  ;;  %v4283_v24 = vmul.f32 %v4187_v7, %v7339_v23  ;;  %v4219_v27 = vld [vmem:[%s8067_s18 + $0x298] sm:$0xff] }
0x11b5   : > { %v4315_v15 = vmul.f32 %v4219_v27, %v7339_v23  ;;  %v4161_v23 = vld [vmem:[%s8067_s18 + $0xc8] sm:$0xff] }
0x11b6   : > { %v4481_v14 = vsel %vm958_vm2, %v4283_v24, 0.0 }
0x11b7   : > { %v4577_v21 = vsel %vm958_vm2, %v4315_v15, 0.0  ;;  %v4214_v15 = vld [vmem:[%s8067_s18 + $0x270] sm:$0xff] }
0x11b8   : > { %4401 = vadd.xlane.f32.xlu1 %v4400_v56  ;;  %4521 = vadd.xlane.f32.xlu0 %v4520_v54  ;;  %v4209_v56 = vld [vmem:[%s8067_s18 + $0x248] sm:$0xff]  ;;  %v4523_v54 = vsel %vm958_vm2, %v4297_v4, 0.0 }
0x11b9   : > { %v4305_v59 = vmul.f32 %v4209_v56, %v7366_v52 }
0x11bb   : > { %v4547_v36 = vsel %vm958_vm2, %v4305_v59, 0.0 }
0x11bc   : > { %4425 = vadd.xlane.f32.xlu1 %v4424_v40  ;;  %4545 = vadd.xlane.f32.xlu0 %v4544_v0  ;;  %v6364_v40 = vpop.f32.mrf.mxu0 }
0x11bd   : > { %v4114_v0 = vadd.f32 %v6364_v40, %v7284_v13  ;;  %v4190_v40 = vld [vmem:[%s8067_s18 + $0x1b0] sm:$0xff] }
0x11c0   : > { %4497 = vadd.xlane.f32.xlu1 %v4496_v37  ;;  %4473 = vadd.xlane.f32.xlu0 %v4472_v44  ;;  %v4505_v37 = vsel %vm958_vm2, %v4291_v22, 0.0  ;;  %v4126_v44 = vmul.f32 0.999995, %v4114_v0  ;;  %v4140_v22 = vld [vmem:[%s8067_s18 + $0x20] sm:$0xff] }
0x11c4   : > { %4362 = vadd.xlane.f32.xlu1 %v4361_v47  ;;  %4569 = vadd.xlane.f32.xlu0 %v4568_v9  ;;  %v4233_v47 = vmul.f32 %v4137_v45, %v7366_v52  ;;  %v7416_v9 = vmax.f32 %v4126_v44, 0.0 }
0x11c6   : > { %v4331_v2 = vsel %vm958_vm2, %v4233_v47, 0.0  ;;  %v4246_v3 = vmul.f32 %v4150_v1, %v7416_v9  ;;  %v4238_v61 = vmul.f32 %v4142_v58, %v7416_v9  ;;  %v4294_v27 = vmul.f32 %v4198_v10, %v7416_v9  ;;  %v4180_v1 = vld [vmem:[%s8067_s18 + $0x160] sm:$0xff] }
0x11c8   : > { %4386 = vadd.xlane.f32.xlu1 %v4385_v43  ;;  %4593 = vadd.xlane.f32.xlu0 %v4592_v50  ;;  %v4257_v43 = vmul.f32 %v4161_v23, %v7366_v52  ;;  %v4169_v50 = vld [vmem:[%s8067_s18 + $0x108] sm:$0xff]  ;;  %v4370_v19 = vsel %vm958_vm2, %v4246_v3, 0.0  ;;  %v4346_v7 = vsel %vm958_vm2, %v4238_v61, 0.0  ;;  %v4514_v41 = vsel %vm958_vm2, %v4294_v27, 0.0  ;;  %v4212_v3 = vld [vmem:[%s8067_s18 + $0x260] sm:$0xff] }
0x11c9   : > { %v4265_v16 = vmul.f32 %v4169_v50, %v7366_v52  ;;  %v4204_v50 = vld [vmem:[%s8067_s18 + $0x220] sm:$0xff] }
0x11ca   : > { %v4403_v6 = vsel %vm958_vm2, %v4257_v43, 0.0  ;;  %v4228_v61 = vld [vmem:[%s8067_s18 + $0x2e0] sm:$0xff] }
0x11cb   : > { %v4427_v30 = vsel %vm958_vm2, %v4265_v16, 0.0 }
0x11cc   : > { %4458 = vadd.xlane.f32.xlu1 %v4457_v17  ;;  %4338 = vadd.xlane.f32.xlu0 %v4337_v25  ;;  %v4166_v17 = vld [vmem:[%s8067_s18 + $0xf0] sm:$0xff]  ;;  %v4193_v25 = vld [vmem:[%s8067_s18 + $0x1c8] sm:$0xff] }
0x11cd   : > { %v4262_v28 = vmul.f32 %v4166_v17, %v7416_v9  ;;  %v4289_v31 = vmul.f32 %v4193_v25, %v7366_v52 }
0x11cf   : > { %v4499_v51 = vsel %vm958_vm2, %v4289_v31, 0.0 }
0x11d0   : > { %4530 = vadd.xlane.f32.xlu1 %v4529_v53  ;;  %4410 = vadd.xlane.f32.xlu0 %v4409_v57  ;;  %v4174_v53 = vld [vmem:[%s8067_s18 + $0x130] sm:$0xff]  ;;  %v4418_v57 = vsel %vm958_vm2, %v4262_v28, 0.0  ;;  %v4188_v28 = vld [vmem:[%s8067_s18 + $0x1a0] sm:$0xff] }
0x11d1   : > { %v4270_v60 = vmul.f32 %v4174_v53, %v7416_v9 }
0x11d3   : > { %v4442_v63 = vsel %vm958_vm2, %v4270_v60, 0.0 }
0x11d4   : > { %4356 = vadd.xlane.f32.xlu1 %v4355_v8  ;;  %4434 = vadd.xlane.f32.xlu0 %v4433_v55  ;;  %v4206_v8 = vld [vmem:[%s8067_s18 + $0x230] sm:$0xff]  ;;  %v4105_v55 = vpop.f32.mrf.mxu0 }
0x11d5   : > { %v4106_v52 = vadd.f32 %v7284_v13, %v4105_v55  ;;  %v4302_v32 = vmul.f32 %v4206_v8, %v7416_v9 }
0x11d7   : > { %v4124_v24 = vmul.f32 0.999995, %v4106_v52  ;;  %v4538_v26 = vsel %vm958_vm2, %v4302_v32, 0.0  ;;  %v4151_v32 = vld [vmem:[%s8067_s18 + $0x78] sm:$0x1] }
0x11d8   : > { %4380 = vadd.xlane.f32.xlu1 %v4379_v11  ;;  %4554 = vadd.xlane.f32.xlu0 %v4553_v12  ;;  %v4254_v11 = vmul.f32 %v4158_v18, %v7416_v9  ;;  %v4182_v12 = vld [vmem:[%s8067_s18 + $0x170] sm:$0xff] }
0x11d9   : > { %v4278_v4 = vmul.f32 %v4182_v12, %v7416_v9  ;;  %v7456_v56 = vmax.f32 %v4124_v24, 0.0 }
0x11db   : > { %v4466_v59 = vsel %vm958_vm2, %v4278_v4, 0.0  ;;  %v4236_v0 = vmul.f32 %v4140_v22, %v7456_v56  ;;  %v4252_v39 = vmul.f32 %v4156_v20, %v7456_v56  ;;  %v4244_v23 = vmul.f32 %v4148_v33, %v7456_v56  ;;  %v4175_v4 = vld [vmem:[%s8067_s18 + $0x138] sm:$0x1] }
0x11dc   : > { %4452 = vadd.xlane.f32.xlu1 %v4451_v29  ;;  %4482 = vadd.xlane.f32.xlu0 %v4481_v14  ;;  %v4394_v29 = vsel %vm958_vm2, %v4254_v11, 0.0  ;;  %v4230_v14 = vld [vmem:[%s8067_s18 + $0x2f0] sm:$0xff]  ;;  %v4276_v49 = vmul.f32 %v4180_v1, %v7456_v56  ;;  %v4308_v17 = vmul.f32 %v4212_v3, %v7456_v56  ;;  %v4300_v25 = vmul.f32 %v4204_v50, %v7456_v56  ;;  %v4143_v11 = vld [vmem:[%s8067_s18 + $0x38] sm:$0x1]  ;;  %v4141_v1 = vld [vmem:[%s8067_s18 + $0x28] sm:$0xff] }
0x11dd   : > { %v4340_v38 = vsel %vm958_vm2, %v4236_v0, 0.0  ;;  %v4284_v58 = vmul.f32 %v4188_v28, %v7456_v56  ;;  %v4167_v0 = vld [vmem:[%s8067_s18 + $0xf8] sm:$0x1] }
0x11de   : > { %v4460_v16 = vsel %vm958_vm2, %v4276_v49, 0.0  ;;  %v4556_v53 = vsel %vm958_vm2, %v4308_v17, 0.0 }
0x11df   : > { %v4484_v18 = vsel %vm958_vm2, %v4284_v58, 0.0  ;;  %v4149_v58 = vld [vmem:[%s8067_s18 + $0x68] sm:$0xff] }
0x11e0   : > { %4524 = vadd.xlane.f32.xlu1 %v4523_v54  ;;  %4578 = vadd.xlane.f32.xlu0 %v4577_v21  ;;  %v4326_v54 = vmul.f32 %v4230_v14, %v7416_v9  ;;  %v4310_v21 = vmul.f32 %v4214_v15, %v7416_v9  ;;  %v4159_v15 = vld [vmem:[%s8067_s18 + $0xb8] sm:$0x1] }
0x11e2   : > { %v4610_v62 = vsel %vm958_vm2, %v4326_v54, 0.0  ;;  %v4562_v42 = vsel %vm958_vm2, %v4310_v21, 0.0 }
0x11e4   : > { %4548 = vadd.xlane.f32.xlu1 %v4547_v36  ;;  %4506 = vadd.xlane.f32.xlu0 %v4505_v37  ;;  %v4286_v36 = vmul.f32 %v4190_v40, %v7416_v9  ;;  %v4222_v37 = vld [vmem:[%s8067_s18 + $0x2b0] sm:$0xff]  ;;  %v4183_v40 = vld [vmem:[%s8067_s18 + $0x178] sm:$0x1] }
0x11e5   : > { %v4318_v45 = vmul.f32 %v4222_v37, %v7416_v9 }
0x11e6   : > { %v4490_v44 = vsel %vm958_vm2, %v4286_v36, 0.0 }
0x11e7   : > { %v4586_v48 = vsel %vm958_vm2, %v4318_v45, 0.0  ;;  %v4207_v45 = vld [vmem:[%s8067_s18 + $0x238] sm:$0x1] }
0x11e8   : > { %4476 = vadd.xlane.f32.xlu1 %v4475_v46  ;;  %4602 = vadd.xlane.f32.xlu0 %v4601_v34  ;;  %v4164_v46 = vld [vmem:[%s8067_s18 + $0xe0] sm:$0xff]  ;;  %v4388_v34 = vsel %vm958_vm2, %v4252_v39, 0.0  ;;  %v4215_v39 = vld [vmem:[%s8067_s18 + $0x278] sm:$0x1] }
0x11e9   : > { %v4260_v47 = vmul.f32 %v4164_v46, %v7456_v56 }
0x11eb   : > { %v4412_v9 = vsel %vm958_vm2, %v4260_v47, 0.0 }
0x11ec   : > { %4572 = vadd.xlane.f32.xlu1 %v4571_v35  ;;  %4332 = vadd.xlane.f32.xlu0 %v4331_v2  ;;  %v4172_v35 = vld [vmem:[%s8067_s18 + $0x120] sm:$0xff]  ;;  %v4364_v2 = vsel %vm958_vm2, %v4244_v23, 0.0 }
0x11ed   : > { %v4268_v43 = vmul.f32 %v4172_v35, %v7456_v56 }
0x11f0   : > { %4596 = vadd.xlane.f32.xlu1 %v4595_v5  ;;  %4404 = vadd.xlane.f32.xlu0 %v4403_v6  ;;  %v6365_v5 = vpop.f32.mrf.mxu0 }
0x11f1   : > { %v4117_v6 = vadd.f32 %v6365_v5, %v7284_v13  ;;  %v4165_v5 = vld [vmem:[%s8067_s18 + $0xe8] sm:$0xff] }
0x11f3   : > { %v4127_v31 = vmul.f32 0.999995, %v4117_v6 }
0x11f4   : > { %4371 = vadd.xlane.f32.xlu1 %v4370_v19  ;;  %4428 = vadd.xlane.f32.xlu0 %v4427_v30  ;;  %v4436_v19 = vsel %vm958_vm2, %v4268_v43, 0.0  ;;  %v4196_v30 = vld [vmem:[%s8067_s18 + $0x1e0] sm:$0xff] }
0x11f5   : > { %v4292_v60 = vmul.f32 %v4196_v30, %v7456_v56  ;;  %v7501_v8 = vmax.f32 %v4127_v31, 0.0  ;;  %v4205_v31 = vld [vmem:[%s8067_s18 + $0x228] sm:$0xff] }
0x11f7   : > { %v4508_v52 = vsel %vm958_vm2, %v4292_v60, 0.0  ;;  %v4247_v24 = vmul.f32 %v4151_v32, %v7501_v8  ;;  %v4255_v22 = vmul.f32 %v4159_v15, %v7501_v8  ;;  %v4279_v20 = vmul.f32 %v4183_v40, %v7501_v8 }
0x11f8   : > { %4419 = vadd.xlane.f32.xlu1 %v4418_v57  ;;  %4500 = vadd.xlane.f32.xlu0 %v4499_v51  ;;  %v4532_v57 = vsel %vm958_vm2, %v4300_v25, 0.0  ;;  %v4220_v51 = vld [vmem:[%s8067_s18 + $0x2a0] sm:$0xff]  ;;  %v4311_v47 = vmul.f32 %v4215_v39, %v7501_v8  ;;  %v4303_v23 = vmul.f32 %v4207_v45, %v7501_v8  ;;  %v4229_v39 = vld [vmem:[%s8067_s18 + $0x2e8] sm:$0xff] }
0x11f9   : > { %v4316_v55 = vmul.f32 %v4220_v51, %v7456_v56  ;;  %v4373_v54 = vsel %vm2304_vm4, %v4247_v24, 0.0  ;;  %v4397_v37 = vsel %vm2304_vm4, %v4255_v22, 0.0  ;;  %v4197_v22 = vld [vmem:[%s8067_s18 + $0x1e8] sm:$0xff] }
0x11fa   : > { %v4541_v3 = vsel %vm2304_vm4, %v4303_v23, 0.0 }
0x11fb   : > { %v4580_v12 = vsel %vm958_vm2, %v4316_v55, 0.0  ;;  %v4189_v55 = vld [vmem:[%s8067_s18 + $0x1a8] sm:$0xff] }
0x11fc   : > { %4443 = vadd.xlane.f32.xlu1 %v4442_v63  ;;  %4347 = vadd.xlane.f32.xlu0 %v4346_v7  ;;  %v4324_v63 = vmul.f32 %v4228_v61, %v7456_v56 }
0x11fe   : > { %v4604_v27 = vsel %vm958_vm2, %v4324_v63, 0.0  ;;  %v4157_v63 = vld [vmem:[%s8067_s18 + $0xa8] sm:$0xff] }
0x1200   : > { %4539 = vadd.xlane.f32.xlu1 %v4538_v26  ;;  %4395 = vadd.xlane.f32.xlu0 %v4394_v29  ;;  %v4108_v26 = vpop.f32.mrf.mxu0  ;;  %v4239_v29 = vmul.f32 %v4143_v11, %v7501_v8 }
0x1202   : > { %v4349_v21 = vsel %vm2304_vm4, %v4239_v29, 0.0 }
0x1204   : > { %4515 = vadd.xlane.f32.xlu1 %v4514_v41  ;;  %4467 = vadd.xlane.f32.xlu0 %v4466_v59  ;;  %v4109_v41 = vadd.f32 %v7284_v13, %v4108_v26  ;;  %v4271_v59 = vmul.f32 %v4175_v4, %v7501_v8  ;;  %v4173_v4 = vld [vmem:[%s8067_s18 + $0x128] sm:$0xff] }
0x1206   : > { %v4125_v36 = vmul.f32 0.999995, %v4109_v41  ;;  %v4445_v13 = vsel %vm2304_vm4, %v4271_v59, 0.0 }
0x1208   : > { %4611 = vadd.xlane.f32.xlu1 %v4610_v62  ;;  %4563 = vadd.xlane.f32.xlu0 %v4562_v42  ;;  %v7544_v33 = vmax.f32 %v4125_v36, 0.0 }
0x120a   : > { %v4237_v43 = vmul.f32 %v4141_v1, %v7544_v33  ;;  %v4261_v25 = vmul.f32 %v4165_v5, %v7544_v33  ;;  %v4301_v51 = vmul.f32 %v4205_v31, %v7544_v33  ;;  %v4253_v26 = vmul.f32 %v4157_v63, %v7544_v33 }
0x120b   : > { %v4325_v23 = vmul.f32 %v4229_v39, %v7544_v33  ;;  %v4712_v5 = vlaneseq }
0x120c   : > { %4341 = vadd.xlane.f32.xlu1 %v4340_v38  ;;  %4491 = vadd.xlane.f32.xlu0 %v4490_v44  ;;  %v4263_v38 = vmul.f32 %v4167_v0, %v7501_v8  ;;  %v4415_v60 = vsel %vm958_vm2, %v4261_v25, 0.0  ;;  %v4535_v11 = vsel %vm958_vm2, %v4301_v51, 0.0  ;;  %v4391_v59 = vsel %vm958_vm2, %v4253_v26, 0.0  ;;  %v4181_v0 = vld [vmem:[%s8067_s18 + $0x168] sm:$0xff] }
0x1210   : > { %4389 = vadd.xlane.f32.xlu1 %v4388_v34  ;;  %4587 = vadd.xlane.f32.xlu0 %v4586_v48  ;;  %v4469_v34 = vsel %vm2304_vm4, %v4279_v20, 0.0  ;;  %v4421_v48 = vsel %vm2304_vm4, %v4263_v38, 0.0  ;;  %v4293_v20 = vmul.f32 %v4197_v22, %v7544_v33  ;;  %v4277_v38 = vmul.f32 %v4181_v0, %v7544_v33 }
0x1212   : > { %v4463_v1 = vsel %vm958_vm2, %v4277_v38, 0.0 }
0x1214   : > { %4413 = vadd.xlane.f32.xlu1 %v4412_v9  ;;  %4365 = vadd.xlane.f32.xlu0 %v4364_v2  ;;  %v4191_v9 = vld [vmem:[%s8067_s18 + $0x1b8] sm:$0x1]  ;;  %v4565_v2 = vsel %vm2304_vm4, %v4311_v47, 0.0 }
0x1215   : > { %v4287_v50 = vmul.f32 %v4191_v9, %v7501_v8 }
0x1217   : > { %v4493_v28 = vsel %vm2304_vm4, %v4287_v50, 0.0 }
0x1218   : > { %4461 = vadd.xlane.f32.xlu1 %v4460_v16  ;;  %4437 = vadd.xlane.f32.xlu0 %v4436_v19  ;;  %v4223_v16 = vld [vmem:[%s8067_s18 + $0x2b8] sm:$0x1]  ;;  %v4343_v19 = vsel %vm958_vm2, %v4237_v43, 0.0 }
0x1219   : > { %v4319_v30 = vmul.f32 %v4223_v16, %v7501_v8  ;;  %v4607_v16 = vsel %vm958_vm2, %v4325_v23, 0.0 }
0x121b   : > { %v4589_v61 = vsel %vm2304_vm4, %v4319_v30, 0.0 }
0x121c   : > { %4557 = vadd.xlane.f32.xlu1 %v4556_v53  ;;  %4533 = vadd.xlane.f32.xlu0 %v4532_v57 }
0x1220   : > { %4485 = vadd.xlane.f32.xlu1 %v4484_v18  ;;  %4509 = vadd.xlane.f32.xlu0 %v4508_v52  ;;  %v4245_v18 = vmul.f32 %v4149_v58, %v7544_v33 }
0x1221   : > { %v7508_v7 = vpop.xlane.xlu1 %4359  ;;  %v7511_v10 = vpop.xlane.xlu0 %4335 }
0x1222   : > { %v4367_v24 = vsel %vm958_vm2, %v4245_v18, 0.0 }
0x1224   : > { %4581 = vadd.xlane.f32.xlu1 %v4580_v12  ;;  %4605 = vadd.xlane.f32.xlu0 %v4604_v27  ;;  %v4285_v12 = vmul.f32 %v4189_v55, %v7544_v33  ;;  %v4221_v27 = vld [vmem:[%s8067_s18 + $0x2a8] sm:$0xff]  ;;  %v7637_v55 = vshrl.u32 %v4712_v5, 7 }
0x1225   : > { %v7518_v14 = vpop.xlane.xlu1 %4431  ;;  %v7521_v56 = vpop.xlane.xlu0 %4383 }
0x1226   : > { %v4487_v41 = vsel %vm958_vm2, %v4285_v12, 0.0 }
0x1228   : > { %4374 = vadd.xlane.f32.xlu1 %v4373_v54  ;;  %4350 = vadd.xlane.f32.xlu0 %v4349_v21  ;;  %v4317_v54 = vmul.f32 %v4221_v27, %v7544_v33  ;;  %v4269_v21 = vmul.f32 %v4173_v4, %v7544_v33 }
0x1229   : > { %v7529_v62 = vpop.xlane.xlu1 %4455  ;;  %v7532_v42 = vpop.xlane.xlu0 %4407 }
0x122c   : > { %4446 = vadd.xlane.f32.xlu1 %v4445_v13  ;;  %4398 = vadd.xlane.f32.xlu0 %v4397_v37  ;;  %v4583_v13 = vsel %vm958_vm2, %v4317_v54, 0.0  ;;  %v4439_v37 = vsel %vm958_vm2, %v4269_v21, 0.0 }
0x122d   : > { %v7539_v44 = vpop.xlane.xlu1 %4551  ;;  %v7542_v46 = vpop.xlane.xlu0 %4527 }
0x1230   : > { %4470 = vadd.xlane.f32.xlu1 %v4469_v34  ;;  %4422 = vadd.xlane.f32.xlu0 %v4421_v48  ;;  %v4213_v34 = vld [vmem:[%s8067_s18 + $0x268] sm:$0xff]  ;;  %v4511_v48 = vsel %vm958_vm2, %v4293_v20, 0.0 }
0x1231   : > { %v7551_v35 = vpop.xlane.xlu1 %4575  ;;  %v7554_v49 = vpop.xlane.xlu0 %4479  ;;  %v4309_v9 = vmul.f32 %v4213_v34, %v7544_v33  ;;  %v7630_v33 = vand.u32 127, %v4712_v5 }
0x1233   : > { %v4559_v25 = vsel %vm958_vm2, %v4309_v9, 0.0  ;;  %v4718_v18 = vadd.s32 4294967288, %v7630_v33  ;;  %v4732_v63 = vadd.s32 4294967272, %v7630_v33  ;;  %v7651_v27 = vsub.s32 %v7630_v33, %v7637_v55 }
0x1234   : > { %4566 = vadd.xlane.f32.xlu1 %v4565_v2  ;;  %4542 = vadd.xlane.f32.xlu0 %v4541_v3  ;;  %v4231_v2 = vld [vmem:[%s8067_s18 + $0x2f8] sm:$0x1]  ;;  %vm5202_vm2 = vcmask 1044484  }
0x1235   : > { %v7561_v6 = vpop.xlane.xlu1 %4503  ;;  %v7564_v17 = vpop.xlane.xlu0 %4329  ;;  %v4199_v3 = vld [vmem:[%s8067_s18 + $0x1f8] sm:$0x1]  ;;  %v7654_v4 = vsub.s32 %v4732_v63, %v7637_v55 }
0x1238   : > { %4344 = vadd.xlane.f32.xlu1 %v4343_v19  ;;  %4494 = vadd.xlane.f32.xlu0 %v4493_v28  ;;  %v4327_v19 = vmul.f32 %v4231_v2, %v7501_v8  ;;  %v4295_v28 = vmul.f32 %v4199_v3, %v7501_v8  ;;  %v4725_v8 = vadd.s32 4294967280, %v7630_v33 }
0x1239   : > { %v7571_v53 = vpop.xlane.xlu1 %4599  ;;  %v7574_v57 = vpop.xlane.xlu0 %4377 }
0x123a   : > { %v4613_v58 = vsel %vm2304_vm4, %v4327_v19, 0.0  ;;  %v7647_v26 = vsub.s32 %v4725_v8, %v7637_v55  ;;  %v4809_v38 = vrot.slane %v7574_v57, %v7651_v27 }
0x123c   : > { %4416 = vadd.xlane.f32.xlu1 %v4415_v60  ;;  %4590 = vadd.xlane.f32.xlu0 %v4589_v61  ;;  %v4517_v60 = vsel %vm2304_vm4, %v4295_v28, 0.0  ;;  %v4779_v22 = vrot.slane %v7508_v7, %v7647_v26  ;;  %v4818_v7 = vrot.slane %v7521_v56, %v7647_v26  ;;  %v4935_v5 = vrot.slane %v7529_v62, %v7647_v26 }
0x123d   : > { %v7581_v52 = vpop.xlane.xlu1 %4353  ;;  %v7584_v32 = vpop.xlane.xlu0 %4449  ;;  %vm5204_vm4 = vcmask 1045509  }
0x123e   : > { %v4770_v54 = vrot.slane %v7581_v52, %v7651_v27  ;;  %v4926_v2 = vrot.slane %v7584_v32, %v7651_v27 }
0x1240   : > { %4536 = vadd.xlane.f32.xlu1 %v4535_v11  ;;  %4368 = vadd.xlane.f32.xlu0 %v4367_v24  ;;  %v7644_v24 = vsub.s32 %v4718_v18, %v7637_v55 }
0x1241   : > { %v7591_v29 = vpop.xlane.xlu1 %4401  ;;  %v7594_v15 = vpop.xlane.xlu0 %4521 }
0x1242   : > { %v5043_v28 = vrot.slane %v7594_v15, %v7651_v27 }
0x1244   : > { %4488 = vadd.xlane.f32.xlu1 %v4487_v41  ;;  %4392 = vadd.xlane.f32.xlu0 %v4391_v59 }
0x1245   : > { %v7601_v40 = vpop.xlane.xlu1 %4425  ;;  %v7604_v36 = vpop.xlane.xlu0 %4545 }
0x1246   : > { %v5082_v63 = vrot.slane %v7604_v36, %v7651_v27 }
0x1248   : > { %4584 = vadd.xlane.f32.xlu1 %v4583_v13  ;;  %4440 = vadd.xlane.f32.xlu0 %v4439_v37 }
0x1249   : > { %v7611_v45 = vpop.xlane.xlu1 %4497  ;;  %v7614_v47 = vpop.xlane.xlu0 %4473 }
0x124a   : > { %v4965_v36 = vrot.slane %v7614_v47, %v7651_v27 }
0x124c   : > { %4512 = vadd.xlane.f32.xlu1 %v4511_v48  ;;  %4464 = vadd.xlane.f32.xlu0 %v4463_v1 }
0x124d   : > { %v4363_v43 = vpop.xlane.xlu1 %4362  ;;  %v7622_v50 = vpop.xlane.xlu0 %4569 }
0x124e   : > { %v4784_v0 = vrot.slane %v4363_v43, %v7654_v4 }
0x1250   : > { %4608 = vadd.xlane.f32.xlu1 %v4607_v16  ;;  %4560 = vadd.xlane.f32.xlu0 %v4559_v25 }
0x1251   : > { %v4387_v30 = vpop.xlane.xlu1 %4386  ;;  %v7628_v31 = vpop.xlane.xlu0 %4593 }
0x1252   : > { %v4823_v48 = vrot.slane %v4387_v30, %v7654_v4 }
0x1254   : > { %4614 = vadd.xlane.f32.xlu1 %v4613_v58  ;;  %4518 = vadd.xlane.f32.xlu0 %v4517_v60  ;;  %v5052_v60 = vrot.slane %v7542_v46, %v7647_v26  ;;  %v5091_v46 = vrot.slane %v7539_v44, %v7647_v26 }
0x1255   : > { %v4459_v51 = vpop.xlane.xlu1 %4458  ;;  %v7634_v61 = vpop.xlane.xlu0 %4338 }
0x1256   : > { %v4940_v56 = vrot.slane %v4459_v51, %v7654_v4 }
0x1259   : > { %v4531_v11 = vpop.xlane.xlu1 %4530  ;;  %v7641_v12 = vpop.xlane.xlu0 %4410 }
0x125a   : > { %v5057_v62 = vrot.slane %v4531_v11, %v7654_v4 }
0x125d   : > { %v4357_v41 = vpop.xlane.xlu1 %4356  ;;  %v7659_v21 = vpop.xlane.xlu0 %4434 }
0x125e   : > { %v4774_v59 = vrot.slane %v4357_v41, %v7644_v24 }
0x1260   : > { %v4775_v13 = vsel %vm4723_vm8, %v4774_v59, %v4770_v54 }
0x1261   : > { %v4780_v20 = vsel %vm4730_vm9, %v4779_v22, %v4775_v13  ;;  %v4381_v37 = vpop.xlane.xlu1 %4380  ;;  %v4555_v39 = vpop.xlane.xlu0 %4554 }
0x1262   : > { %v4813_v52 = vrot.slane %v4381_v37, %v7644_v24  ;;  %v7670_v34 = vsel %vm4737_vm10, %v4784_v0, %v4780_v20  ;;  %v5096_v11 = vrot.slane %v4555_v39, %v7654_v4 }
0x1264   : > { %v4814_v23 = vsel %vm4723_vm8, %v4813_v52, %v4809_v38  ;;  %v4974_v38 = vrot.slane %v7554_v49, %v7647_v26  ;;  %v4717_v49 = vrot.slane %v7564_v17, %v7651_v27  ;;  %v5160_v17 = vrot.slane %v7628_v31, %v7651_v27 }
0x1265   : > { %v4819_v1 = vsel %vm4730_vm9, %v4818_v7, %v4814_v23  ;;  %v4453_v9 = vpop.xlane.xlu1 %4452  ;;  %v4483_v43 = vpop.xlane.xlu0 %4482  ;;  %v4857_v31 = vrot.slane %v7532_v42, %v7647_v26  ;;  %v4887_v42 = vrot.slane %v7601_v40, %v7651_v27  ;;  %v5004_v40 = vrot.slane %v7611_v45, %v7651_v27 }
0x1266   : > { %v4930_v57 = vrot.slane %v4453_v9, %v7644_v24  ;;  %v7681_v3 = vsel %vm4737_vm10, %v4823_v48, %v4819_v1  ;;  %v4979_v44 = vrot.slane %v4483_v43, %v7654_v4  ;;  %v5121_v48 = vrot.slane %v7622_v50, %v7651_v27 }
0x1267   : > { %v5130_v9 = vrot.slane %v7551_v35, %v7647_v26 }
0x1268   : > { %v4931_v16 = vsel %vm4723_vm8, %v4930_v57, %v4926_v2  ;;  %v4729_v57 = vrot.slane %v7511_v10, %v7647_v26 }
0x1269   : > { %v4936_v19 = vsel %vm4730_vm9, %v4935_v5, %v4931_v16  ;;  %v4525_v25 = vpop.xlane.xlu1 %4524  ;;  %v4579_v30 = vpop.xlane.xlu0 %4578  ;;  %v4736_v5 = vrot.slane %v7634_v61, %v7654_v4  ;;  %v4848_v61 = vrot.slane %v7591_v29, %v7651_v27 }
0x126a   : > { %v5047_v32 = vrot.slane %v4525_v25, %v7644_v24  ;;  %v7692_v58 = vsel %vm4737_vm10, %v4940_v56, %v4936_v19  ;;  %v5135_v43 = vrot.slane %v4579_v30, %v7654_v4 }
0x126c   : > { %v5048_v51 = vsel %vm4723_vm8, %v5047_v32, %v5043_v28  ;;  %v5169_v32 = vrot.slane %v7571_v53, %v7647_v26 }
0x126d   : > { %v5053_v18 = vsel %vm4730_vm9, %v5052_v60, %v5048_v51  ;;  %v4549_v8 = vpop.xlane.xlu1 %4548  ;;  %v7702_v41 = vpop.xlane.xlu0 %4506 }
0x126e   : > { %v5086_v15 = vrot.slane %v4549_v8, %v7644_v24  ;;  %v7705_v54 = vsel %vm4737_vm10, %v5057_v62, %v5053_v18  ;;  %v4862_v18 = vrot.slane %v7641_v12, %v7654_v4  ;;  %v4896_v12 = vrot.slane %v7518_v14, %v7647_v26 }
0x126f   : > { %v5013_v14 = vrot.slane %v7561_v6, %v7647_v26 }
0x1270   : > { %v5087_v59 = vsel %vm4723_vm8, %v5086_v15, %v5082_v63 }
0x1271   : > { %v5092_v22 = vsel %vm4730_vm9, %v5091_v46, %v5087_v59  ;;  %v4477_v0 = vpop.xlane.xlu1 %4476  ;;  %v4603_v20 = vpop.xlane.xlu0 %4602 }
0x1272   : > { %v4969_v13 = vrot.slane %v4477_v0, %v7644_v24  ;;  %v7716_v37 = vsel %vm4737_vm10, %v5096_v11, %v5092_v22  ;;  %v5174_v62 = vrot.slane %v4603_v20, %v7654_v4  ;;  %v4901_v22 = vrot.slane %v7659_v21, %v7654_v4 }
0x1273   : > { %v5018_v21 = vrot.slane %v7702_v41, %v7654_v4 }
0x1274   : > { %v4970_v52 = vsel %vm4723_vm8, %v4969_v13, %v4965_v36 }
0x1275   : > { %v4975_v39 = vsel %vm4730_vm9, %v4974_v38, %v4970_v52  ;;  %v4573_v7 = vpop.xlane.xlu1 %4572  ;;  %v4333_v23 = vpop.xlane.xlu0 %4332 }
0x1276   : > { %v5125_v47 = vrot.slane %v4573_v7, %v7644_v24  ;;  %v7727_v1 = vsel %vm4737_vm10, %v4979_v44, %v4975_v39  ;;  %v4722_v2 = vrot.slane %v4333_v23, %v7644_v24 }
0x1278   : > { %v5126_v50 = vsel %vm4723_vm8, %v5125_v47, %v5121_v48  ;;  %v4724_v16 = vsel %vm4723_vm8, %v4722_v2, %v4717_v49 }
0x1279   : > { %v5131_v56 = vsel %vm4730_vm9, %v5130_v9, %v5126_v50  ;;  %v4597_v35 = vpop.xlane.xlu1 %4596  ;;  %v4731_v19 = vsel %vm4730_vm9, %v4729_v57, %v4724_v16  ;;  %v4405_v10 = vpop.xlane.xlu0 %4404 }
0x127a   : > { %v5164_v25 = vrot.slane %v4597_v35, %v7644_v24  ;;  %v7747_v28 = vsel %vm4737_vm10, %v5135_v43, %v5131_v56  ;;  %v4852_v30 = vrot.slane %v4405_v10, %v7644_v24  ;;  %v7755_v60 = vsel %vm4737_vm10, %v4736_v5, %v4731_v19 }
0x127c   : > { %v5165_v51 = vsel %vm4723_vm8, %v5164_v25, %v5160_v17  ;;  %v4853_v8 = vsel %vm4723_vm8, %v4852_v30, %v4848_v61  ;;  %v4739_v30 = vadd.s32 4294967264, %v7630_v33 }
0x127d   : > { %v5170_v53 = vsel %vm4730_vm9, %v5169_v32, %v5165_v51  ;;  %v7765_v29 = vpop.xlane.xlu1 %4371  ;;  %v4858_v63 = vsel %vm4730_vm9, %v4857_v31, %v4853_v8  ;;  %v4429_v15 = vpop.xlane.xlu0 %4428  ;;  %v4746_v51 = vadd.s32 4294967256, %v7630_v33 }
0x127e   : > { %v7769_v46 = vsel %vm4737_vm10, %v5174_v62, %v5170_v53  ;;  %v4891_v11 = vrot.slane %v4429_v15, %v7644_v24  ;;  %v7775_v59 = vsel %vm4737_vm10, %v4862_v18, %v4858_v63  ;;  %v7851_v18 = vsub.s32 %v4739_v30, %v7637_v55 }
0x127f   : > { %v4753_v53 = vadd.s32 4294967248, %v7630_v33  ;;  %v7859_v15 = vsub.s32 %v4746_v51, %v7637_v55 }
0x1280   : > { %v4892_v0 = vsel %vm4723_vm8, %v4891_v11, %v4887_v42 }
0x1281   : > { %v7782_v36 = vpop.xlane.xlu1 %4419  ;;  %v4897_v13 = vsel %vm4730_vm9, %v4896_v12, %v4892_v0  ;;  %v4501_v20 = vpop.xlane.xlu0 %4500  ;;  %v7863_v11 = vsub.s32 %v4753_v53, %v7637_v55 }
0x1282   : > { %v5008_v38 = vrot.slane %v4501_v20, %v7644_v24  ;;  %v7789_v44 = vsel %vm4737_vm10, %v4901_v22, %v4897_v13 }
0x1283   : > { %v4877_v30 = vrot.slane %v7782_v36, %v7863_v11  ;;  %v4799_v36 = vrot.slane %v7765_v29, %v7863_v11 }
0x1284   : > { %v5009_v52 = vsel %vm4723_vm8, %v5008_v38, %v5004_v40  ;;  %v4760_v38 = vadd.s32 4294967240, %v7630_v33  ;;  %vm5218_vm8 = vcmask 461824  }
0x1285   : > { %v7796_v39 = vpop.xlane.xlu1 %4443  ;;  %v5014_v7 = vsel %vm4730_vm9, %v5013_v14, %v5009_v52  ;;  %v4348_v48 = vpop.xlane.xlu0 %4347  ;;  %vm5227_vm9 = vcmask 3072  }
0x1286   : > { %v7800_v45 = vsel %vm4737_vm10, %v5018_v21, %v5014_v7  ;;  %v4757_v13 = vrot.slane %v4348_v48, %v7863_v11 }
0x1289   : > { %v7802_v24 = vpop.xlane.xlu1 %4539  ;;  %v7804_v27 = vpop.xlane.xlu0 %4395 }
0x128a   : > { %v4838_v29 = vrot.slane %v7804_v27, %v7863_v11 }
0x128d   : > { %v7806_v47 = vpop.xlane.xlu1 %4515  ;;  %v7808_v6 = vpop.xlane.xlu0 %4467 }
0x1291   : > { %v7810_v26 = vpop.xlane.xlu1 %4611  ;;  %v7812_v4 = vpop.xlane.xlu0 %4563 }
0x1295   : > { %v4342_v41 = vpop.xlane.xlu1 %4341  ;;  %v7814_v23 = vpop.xlane.xlu0 %4491 }
0x1296   : > { %v4743_v42 = vrot.slane %v4342_v41, %v7851_v18 }
0x1298   : > { %v4745_v20 = vsel %vm4744_vm11, %v4743_v42, %v7755_v60 }
0x1299   : > { %v7816_v9 = vpop.xlane.xlu1 %4389  ;;  %v7818_v49 = vpop.xlane.xlu0 %4587 }
0x129d   : > { %v4414_v2 = vpop.xlane.xlu1 %4413  ;;  %v7820_v57 = vpop.xlane.xlu0 %4365 }
0x129e   : > { %v4867_v40 = vrot.slane %v4414_v2, %v7851_v18  ;;  %v4789_v33 = vrot.slane %v7820_v57, %v7851_v18  ;;  %v7886_v2 = vsub.s32 %v4760_v38, %v7637_v55  ;;  %v4916_v55 = vrot.slane %v7796_v39, %v7863_v11 }
0x12a0   : > { %v4868_v48 = vsel %vm4744_vm11, %v4867_v40, %v7775_v59 }
0x12a1   : > { %v7822_v43 = vpop.xlane.xlu1 %4461  ;;  %v7824_v50 = vpop.xlane.xlu0 %4437 }
0x12a5   : > { %v7826_v5 = vpop.xlane.xlu1 %4557  ;;  %v4534_v56 = vpop.xlane.xlu0 %4533 }
0x12a6   : > { %v5062_v60 = vrot.slane %v4534_v56, %v7851_v18 }
0x12a9   : > { %v7828_v16 = vpop.xlane.xlu1 %4485  ;;  %v7830_v35 = vpop.xlane.xlu0 %4509 }
0x12aa   : > { %v4984_v59 = vrot.slane %v7828_v16, %v7851_v18  ;;  %v4828_v16 = vrot.slane %v7816_v9, %v7851_v18  ;;  %v4994_v9 = vrot.slane %v7814_v23, %v7863_v11 }
0x12ac   : > { %v4829_v23 = vsel %vm4744_vm11, %v4828_v16, %v7681_v3  ;;  %v4945_v3 = vrot.slane %v7822_v43, %v7851_v18 }
0x12ad   : > { %v7832_v17 = vpop.xlane.xlu1 %4581  ;;  %v7834_v19 = vpop.xlane.xlu0 %4605 }
0x12b1   : > { %v7836_v25 = vpop.xlane.xlu1 %4374  ;;  %v7838_v10 = vpop.xlane.xlu0 %4350 }
0x12b2   : > { %v4804_v39 = vrot.slane %v7836_v25, %v7886_v2 }
0x12b5   : > { %v7840_v32 = vpop.xlane.xlu1 %4446  ;;  %v7842_v61 = vpop.xlane.xlu0 %4398 }
0x12b6   : > { %v4921_v16 = vrot.slane %v7840_v32, %v7886_v2 }
0x12b9   : > { %v7845_v31 = vpop.xlane.xlu1 %4470  ;;  %v7847_v62 = vpop.xlane.xlu0 %4422 }
0x12bd   : > { %v7854_v8 = vpop.xlane.xlu1 %4566  ;;  %v7856_v63 = vpop.xlane.xlu0 %4542 }
0x12c1   : > { %v4345_v12 = vpop.xlane.xlu1 %4344  ;;  %v7866_v0 = vpop.xlane.xlu0 %4494 }
0x12c2   : > { %v4750_v22 = vrot.slane %v4345_v12, %v7859_v15  ;;  %v5072_v12 = vrot.slane %v7802_v24, %v7863_v11  ;;  %v4764_v24 = vrot.slane %v7838_v10, %v7886_v2  ;;  %v5140_v10 = vrot.slane %v7832_v17, %v7851_v18 }
0x12c3   : > { %v4843_v17 = vrot.slane %v7842_v61, %v7886_v2  ;;  %v5023_v61 = vrot.slane %v7830_v35, %v7851_v18 }
0x12c4   : > { %v4752_v14 = vsel %vm4751_vm12, %v4750_v22, %v4745_v20  ;;  %v5063_v22 = vsel %vm4744_vm11, %v5062_v60, %v7705_v54  ;;  %v4790_v20 = vsel %vm4744_vm11, %v4789_v33, %v7670_v34  ;;  %v4985_v34 = vsel %vm4744_vm11, %v4984_v59, %v7727_v1 }
0x12c5   : > { %v4759_v21 = vsel %vm4758_vm13, %v4757_v13, %v4752_v14  ;;  %v4417_v52 = vpop.xlane.xlu1 %4416  ;;  %v7876_v41 = vpop.xlane.xlu0 %4590  ;;  %v4906_v1 = vrot.slane %v7824_v50, %v7851_v18  ;;  %v4882_v50 = vrot.slane %v7847_v62, %v7886_v2  ;;  %v5024_v32 = vsel %vm4744_vm11, %v5023_v61, %v7800_v45 }
0x12c6   : > { %v4872_v7 = vrot.slane %v4417_v52, %v7859_v15  ;;  %v5189_v45 = vrot.slane %v7810_v26, %v7863_v11 }
0x12c7   : > { %v4907_v43 = vsel %vm4744_vm11, %v4906_v1, %v7789_v44  ;;  %v5101_v44 = vrot.slane %v7826_v5, %v7851_v18  ;;  %v4946_v5 = vsel %vm4744_vm11, %v4945_v3, %v7692_v58  ;;  %v4999_v58 = vrot.slane %v7866_v0, %v7886_v2 }
0x12c8   : > { %v4873_v51 = vsel %vm4751_vm12, %v4872_v7, %v4868_v48  ;;  %v4766_v7 = vsel %vm4765_vm14, %v4764_v24, %v4759_v21 }
0x12c9   : > { %v4878_v53 = vsel %vm4758_vm13, %v4877_v30, %v4873_v51  ;;  %v4537_v42 = vpop.xlane.xlu1 %4536  ;;  %v4369_v57 = vpop.xlane.xlu0 %4368  ;;  %v5150_v51 = vrot.slane %v7818_v49, %v7863_v11  ;;  %v5102_v26 = vsel %vm4744_vm11, %v5101_v44, %v7716_v37 }
0x12ca   : > { %v5067_v56 = vrot.slane %v4537_v42, %v7859_v15  ;;  %v4794_v13 = vrot.slane %v4369_v57, %v7859_v15  ;;  %v5141_v57 = vsel %vm4744_vm11, %v5140_v10, %v7747_v28 }
0x12cc   : > { %v5068_v40 = vsel %vm4751_vm12, %v5067_v56, %v5063_v22  ;;  %v4795_v38 = vsel %vm4751_vm12, %v4794_v13, %v4790_v20  ;;  %v4883_v13 = vsel %vm4765_vm14, %v4882_v50, %v4878_v53 }
0x12cd   : > { %v7914_v54 = vsel %vm4758_vm13, %v5072_v12, %v5068_v40  ;;  %v4489_v27 = vpop.xlane.xlu1 %4488  ;;  %v4800_v14 = vsel %vm4758_vm13, %v4799_v36, %v4795_v38  ;;  %v4393_v52 = vpop.xlane.xlu0 %4392 }
0x12ce   : > { %v4989_v25 = vrot.slane %v4489_v27, %v7859_v15  ;;  %v4805_v30 = vsel %vm4765_vm14, %v4804_v39, %v4800_v14  ;;  %v4833_v48 = vrot.slane %v4393_v52, %v7859_v15  ;;  %v5033_v39 = vrot.slane %v7806_v47, %v7863_v11 }
0x12cf   : > { %v5197_v33 = vsel %vm5196_vm15, %v4805_v30, %v4766_v7  ;;  %v5179_v27 = vrot.slane %v7834_v19, %v7851_v18  ;;  %v4955_v47 = vrot.slane %v7808_v6, %v7863_v11  ;;  %v4960_v19 = vrot.slane %v7845_v31, %v7886_v2 }
0x12d0   : > { %v4990_v60 = vsel %vm4751_vm12, %v4989_v25, %v4985_v34  ;;  %v4834_v42 = vsel %vm4751_vm12, %v4833_v48, %v4829_v23  ;;  %v5111_v6 = vrot.slane %v7812_v4, %v7863_v11  ;;  %v5116_v4 = vrot.slane %v7854_v8, %v7886_v2 }
0x12d1   : > { %v4995_v21 = vsel %vm4758_vm13, %v4994_v9, %v4990_v60  ;;  %v4585_v36 = vpop.xlane.xlu1 %4584  ;;  %v4839_v59 = vsel %vm4758_vm13, %v4838_v29, %v4834_v42  ;;  %v4441_v49 = vpop.xlane.xlu0 %4440  ;;  %v5180_v31 = vsel %vm4744_vm11, %v5179_v27, %v7769_v46  ;;  %v5077_v60 = vrot.slane %v7856_v63, %v7886_v2 }
0x12d2   : > { %v5145_v56 = vrot.slane %v4585_v36, %v7859_v15  ;;  %v4844_v12 = vsel %vm4765_vm14, %v4843_v17, %v4839_v59  ;;  %v4911_v22 = vrot.slane %v4441_v49, %v7859_v15  ;;  %v5000_v0 = vsel %vm4765_vm14, %v4999_v58, %v4995_v21 }
0x12d3   : > { %v5199_v29 = vsel %vm5198_vm0, %v4844_v12, %v5197_v33  ;;  %v5078_v63 = vsel %vm4765_vm14, %v5077_v60, %v7914_v54  ;;  %v5222_v12 = vld [vmem:[%s6738_s4] sm:$0xff] }
0x12d4   : > { %v5146_v62 = vsel %vm4751_vm12, %v5145_v56, %v5141_v57  ;;  %v4912_v28 = vsel %vm4751_vm12, %v4911_v22, %v4907_v43  ;;  %v5201_v40 = vsel %vm5200_vm1, %v4883_v13, %v5199_v29  ;;  %v5223_v57 = vld [vmem:[%s6738_s4 + $0x8] sm:$0xf] }
0x12d5   : > { %v5151_v35 = vsel %vm4758_vm13, %v5150_v51, %v5146_v62  ;;  %v4513_v20 = vpop.xlane.xlu1 %4512  ;;  %v4917_v53 = vsel %vm4758_vm13, %v4916_v55, %v4912_v28  ;;  %v4465_v38 = vpop.xlane.xlu0 %4464  ;;  %v5155_v51 = vrot.slane %v7876_v41, %v7886_v2 }
0x12d6   : > { %v5028_v24 = vrot.slane %v4513_v20, %v7859_v15  ;;  %v4922_v9 = vsel %vm4765_vm14, %v4921_v16, %v4917_v53  ;;  %v4950_v34 = vrot.slane %v4465_v38, %v7859_v15 }
0x12d7   : > { %v5203_v14 = vsel %vm5202_vm2, %v4922_v9, %v5201_v40  ;;  %v5156_v3 = vsel %vm4765_vm14, %v5155_v51, %v5151_v35 }
0x12d8   : > { %v5029_v55 = vsel %vm4751_vm12, %v5028_v24, %v5024_v32  ;;  %v4951_v18 = vsel %vm4751_vm12, %v4950_v34, %v4946_v5 }
0x12d9   : > { %v4609_v25 = vpop.xlane.xlu1 %4608  ;;  %v5034_v52 = vsel %vm4758_vm13, %v5033_v39, %v5029_v55  ;;  %v4956_v10 = vsel %vm4758_vm13, %v4955_v47, %v4951_v18  ;;  %v4561_v30 = vpop.xlane.xlu0 %4560 }
0x12da   : > { %v5184_v7 = vrot.slane %v4609_v25, %v7859_v15  ;;  %v5106_v48 = vrot.slane %v4561_v30, %v7859_v15  ;;  %v4961_v23 = vsel %vm4765_vm14, %v4960_v19, %v4956_v10 }
0x12db   : > { %v5205_v1 = vsel %vm5204_vm4, %v4961_v23, %v5203_v14 }
0x12dc   : > { %v5185_v11 = vsel %vm4751_vm12, %v5184_v7, %v5180_v31  ;;  %v5107_v37 = vsel %vm4751_vm12, %v5106_v48, %v5102_v26  ;;  %v5207_v15 = vsel %vm5206_vm6, %v5000_v0, %v5205_v1 }
0x12dd   : > { %v4615_v33 = vpop.xlane.xlu1 %4614  ;;  %v5190_v46 = vsel %vm4758_vm13, %v5189_v45, %v5185_v11  ;;  %v5112_v8 = vsel %vm4758_vm13, %v5111_v6, %v5107_v37  ;;  %v4519_v21 = vpop.xlane.xlu0 %4518 }
0x12de   : > { %v5194_v17 = vrot.slane %v4615_v33, %v7886_v2  ;;  %v5038_v42 = vrot.slane %v4519_v21, %v7886_v2  ;;  %v5117_v36 = vsel %vm4765_vm14, %v5116_v4, %v5112_v8 }
0x12df   : > { %v5210_v41 = vsel %vm5196_vm15, %v5117_v36, %v5078_v63 }
0x12e0   : > { %v5195_v50 = vsel %vm4765_vm14, %v5194_v17, %v5190_v46  ;;  %v5211_v59 = vsel %vm5198_vm0, %v5156_v3, %v5210_v41  ;;  %v5039_v56 = vsel %vm4765_vm14, %v5038_v42, %v5034_v52 }
0x12e1   : > { %v5212_v2 = vsel %vm5200_vm1, %v5195_v50, %v5211_v59  ;;  %v5209_v49 = vsel %vm5208_vm7, %v5039_v56, %v5207_v15 }
0x12e2   : > { %v5219_v61 = vsel %vm5218_vm8, %v5212_v2, 0.0  ;;  %v5215_v54 = vsel %vm1082_vm3, %v5209_v49, 0.0 }
0x12e3   : > { %5220 = vadd.xlane.f32.xlu1 %v5219_v61  ;;  %5216 = vadd.xlane.f32.xlu0 %v5215_v54 }
0x136c   : > { %v5221_v22 = vpop.xlane.xlu1 %5220  ;;  %v5217_v43 = vpop.xlane.xlu0 %5216 }
0x136d   : > { %v5225_v62 = vadd.f32 %v5223_v57, %v5221_v22  ;;  %v5224_v13 = vadd.f32 %v5222_v12, %v5217_v43 }
0x136f   : > { %v5228_v29 = vsel %vm5227_vm9, %v5225_v62, -inf  ;;  %v5226_v16 = vsel %vm2602_vm5, %v5224_v13, -inf }
0x1370   : > { %v5229_v35 = vmax.f32 %v5226_v16, %v5228_v29 }
0x1372   : > { %v5230_v28 = vrot.slane %v5229_v35, 4 }
0x1374   : > { %v5231_v20 = vmax.f32 %v5229_v35, %v5230_v28 }
0x1376   : > { %v5232_v40 = vrot.slane %v5231_v20, 2 }
0x1378   : > { %v5233_v39 = vmax.f32 %v5231_v20, %v5232_v40 }
0x137a   : > { %v5234_v44 = vrot.slane %v5233_v39, 1 }
0x137c   : > { %v5235_v53 = vmax.f32 %v5233_v39, %v5234_v44 }
0x137e   : > { %v5236_v24 = vsub.f32 %v5224_v13, %v5235_v53  ;;  %v5237_v38 = vsub.f32 %v5225_v62, %v5235_v53 }
0x1380   : > { %v5238_v32 = vmul.f32 1.442695, %v5236_v24  ;;  %v5240_v27 = vmul.f32 1.442695, %v5237_v38 }
0x1382   : > { %6558 = vpow2.f32 %v5238_v32 }
0x1383   : > { %6560 = vpow2.f32 %v5240_v27 }
0x138f   : > { %v6559_v9 = vpop.eup %6558 }
0x1390   : > { %v6561_v34 = vpop.eup %6560  ;;  %v5242_v47 = vsel %vm2602_vm5, %v6559_v9, 0.0 }
0x1391   : > { %v5243_v5 = vsel %vm5227_vm9, %v6561_v34, 0.0 }
0x1392   : > { %v5244_v55 = vadd.f32 %v5243_v5, %v5242_v47 }
0x1394   : > { %v5245_v14 = vrot.slane %v5244_v55, 4 }
0x1396   : > { %v5246_v45 = vadd.f32 %v5245_v14, %v5244_v55 }
0x1398   : > { %v5247_v19 = vrot.slane %v5246_v45, 2 }
0x139a   : > { %v5248_v18 = vadd.f32 %v5247_v19, %v5246_v45 }
0x139c   : > { %v5249_v25 = vrot.slane %v5248_v18, 1 }
0x139e   : > { %v5250_v52 = vadd.f32 %v5249_v25, %v5248_v18 }
0x13a0   : > { %6562 = vlog2.f32 %v5250_v52 }
0x13ad   : > { %v6563_v6 = vpop.eup %6562 }
0x13ae   : > { %v5252_v58 = vmul.f32 0.6931472, %v6563_v6 }
0x13b0   : > { %v5253_v10 = vsub.f32 %v5236_v24, %v5252_v58  ;;  %v5254_v7 = vsub.f32 %v5237_v38, %v5252_v58 }
0x13b2   : > { %5255 = vst.msk [vmem:[%s929_s16] sm:$0xff] %vm2602_vm5, %v5253_v10 }
0x13b3   : > { %5256 = vst.msk [vmem:[%s929_s16 + $0x8] sm:$0xf] %vm5227_vm9, %v5254_v7 }
0x13b4 PF: > { %s72_s15 = sadd.s32 1, %s6570_s15  }
0x13b5   : > { %p69_p4 = scmp.ge.s32.totalorder %s72_s15, 4  }
0x13b7   :  { %71 = sbr.rel (!%p69_p4) target bundleno = 42 (0x2a), region = 211 }

</bundles_post_ra>
